<compile_context>
chip_gen: v6e
topology: v6e:2x2x1
jax: 0.10.0
libtpu: 0.0.40
codegen_flags: <defaults>
</compile_context>

<pallas_src>
import numpy as np
import jax
import jax.numpy as jnp
from jax.experimental import pallas as pl
from jax.experimental.pallas import tpu as pltpu

EPS = 1e-5
C1, C2, C3 = 32, 32, 16      # conv channel widths fixed by the module
K23 = 8                      # conv2/conv3 kernel size
STRIDE1 = 2                  # conv1 stride


def _round_up(x, m):
    return (x + m - 1) // m * m


def make_kernel(pool, inv1, inv2, inv3, compute_dtype):
    """Fused forward kernel. Activations stay 2D (N, padded C*L) and lane-dense."""
    f32 = jnp.float32
    cdt = compute_dtype

    def _bn_flat(h, mseg, mseg_t, gamma, beta, inv_count):
        # Training-mode BatchNorm1d on the flat (N, P) layout.  One-pass stats via a
        # (P, C) segment matmul; padded lanes fall in no segment so stats are exact.
        s = jnp.concatenate(
            [jnp.sum(h, axis=0, keepdims=True),
             jnp.sum(h * h, axis=0, keepdims=True)], axis=0)              # (2, P) sublane cat
        cs = jnp.dot(s, mseg, preferred_element_type=f32)                 # (2, C)
        mean = cs[0:1] * inv_count
        var = jnp.maximum(cs[1:2] * inv_count - mean * mean, 0.0)         # clamp 1-pass var
        scale = gamma * jax.lax.rsqrt(var + EPS)
        shift = beta - mean * scale
        sb = jnp.dot(jnp.concatenate([scale, shift], axis=0), mseg_t,
                     preferred_element_type=f32)                          # (2, P)
        return h * sb[0:1] + sb[1:2]

    def kernel(x_ref, pavg_ref, pbc_ref,
               w1_ref, b1_ref, seg1_ref, seg1t_ref, g1_ref, be1_ref,
               w2_ref, b2_ref, seg2_ref, seg2t_ref, g2_ref, be2_ref,
               w3_ref, b3_ref, seg3_ref, seg3t_ref, g3_ref, be3_ref,
               wp_ref, bl1_ref, wl2_ref, bl2_ref,
               o_ref):
        xr = x_ref[...]                                                   # (N, d) f32

        # ---- InstanceNorm1d: per-(batch, time) stats over each sample's k regions.
        # Two small dots per stage instead of lane-axis concats (no relayout copies).
        pavg = pavg_ref[...]                                              # (b, N)
        m_g = jnp.dot(pavg, xr, preferred_element_type=f32)               # (b, d)
        sq_g = jnp.dot(pavg, xr * xr, preferred_element_type=f32)         # (b, d)
        s_g = jax.lax.rsqrt(jnp.maximum(sq_g - m_g * m_g, 0.0) + EPS)     # (b, d)
        pbc = pbc_ref[...]                                                # (N, b)
        sc = jnp.dot(pbc, s_g, preferred_element_type=f32)                # (N, d)
        sh = jnp.dot(pbc, m_g * s_g, preferred_element_type=f32)          # (N, d)
        xn = xr * sc - sh

        # ---- conv1 (stride 2) as one dense Toeplitz matmul -> (N, P1), lane-dense.
        h1 = jnp.dot(xn.astype(cdt), w1_ref[...],
                     preferred_element_type=f32) + b1_ref[...]
        h1 = _bn_flat(h1, seg1_ref[...], seg1t_ref[...],
                      g1_ref[...], be1_ref[...], inv1)

        # ---- conv2 -> (N, P2)
        h2 = jnp.dot(h1.astype(cdt), w2_ref[...],
                     preferred_element_type=f32) + b2_ref[...]
        h2 = _bn_flat(h2, seg2_ref[...], seg2t_ref[...],
                      g2_ref[...], be2_ref[...], inv2)

        # ---- conv3 -> (N, P3)
        h3 = jnp.dot(h2.astype(cdt), w3_ref[...],
                     preferred_element_type=f32) + b3_ref[...]
        h3 = _bn_flat(h3, seg3_ref[...], seg3t_ref[...],
                      g3_ref[...], be3_ref[...], inv3)

        # ---- MaxPool1d(pool) fused with Linear(C3*L4, H):
        # lane j of m holds max(h3[j-pool+1 .. j]) (trailing window), built with XLU rolls
        # (pltpu.roll follows jnp.roll semantics: roll(x, q)[j] == x[j-q]).  wp has nonzero
        # rows only at the window-END lanes of each pool window, all of which are >= pool-1
        # and inside the real (non-padded) lanes, so wrapped/padded values are never read.
        m = h3
        for q in range(1, pool):
            m = jnp.maximum(m, pltpu.roll(h3, shift=q, axis=1))
        y = jnp.dot(m.astype(cdt), wp_ref[...],
                    preferred_element_type=f32) + bl1_ref[...]            # (N, PH)
        y = jnp.where(y >= 0, y, 0.2 * y)                                 # LeakyReLU(0.2)

        # ---- Linear(H, OUT); store transposed so N sits on the lane axis.
        y = jnp.dot(y.astype(cdt), wl2_ref[...],
                    preferred_element_type=f32) + bl2_ref[...]            # (N, OUT)
        o_ref[...] = y.T                                                  # (OUT, N)

    return kernel


def _build_effective_weights(params, *, b, k, d, kernel_size, pool_size,
                             hidden, out_size, compute_dtype):
    """Host-side, once-per-parameter-set construction of all dense GEMM operands."""
    K1 = kernel_size
    L1 = (d - K1) // STRIDE1 + 1
    L2 = L1 - K23 + 1
    L3 = L2 - K23 + 1
    L4 = L3 // pool_size
    # PyTorch MaxPool1d default truncation: windows never exceed L3.
    assert L4 >= 1 and L4 * pool_size <= L3
    N = b * k
    P1 = _round_up(C1 * L1, 128)
    P2 = _round_up(C2 * L2, 128)
    P3 = _round_up(C3 * L3, 128)
    PH = _round_up(hidden, 128)

    p = {name: np.asarray(v, np.float32) for name, v in params.items()}

    # InstanceNorm group-membership matrices (O(N*b), not O(N^2)).
    pavg = np.kron(np.eye(b, dtype=np.float32),
                   np.full((1, k), 1.0 / k, np.float32))                  # (b, N)
    pbc = np.kron(np.eye(b, dtype=np.float32),
                  np.ones((k, 1), np.float32))                            # (N, b)

    # conv1 (in_channels=1, stride 2) as Toeplitz: e1[2l+t, c*L1+l] = w1[c, 0, t].
    e1 = np.zeros((d, P1), np.float32)
    w1 = p['w_conv1'][:, 0, :]                                            # (C1, K1)
    for c in range(C1):
        for l in range(L1):
            e1[STRIDE1 * l:STRIDE1 * l + K1, c * L1 + l] = w1[c]

    # conv2 / conv3 as Toeplitz: e[ci*Lin + l + t, o*Lout + l] = w[o, ci, t].
    def toeplitz(w, l_in, l_out, p_in, p_out):
        c_out, c_in, kk = w.shape
        e = np.zeros((p_in, p_out), np.float32)
        for o in range(c_out):
            for ci in range(c_in):
                for l in range(l_out):
                    e[ci * l_in + l: ci * l_in + l + kk, o * l_out + l] = w[o, ci]
        return e

    e2 = toeplitz(p['w_conv2'], L1, L2, P1, P2)                           # (P1, P2)
    e3 = toeplitz(p['w_conv3'], L2, L3, P2, P3)                           # (P2, P3)

    # Per-channel <-> flat-lane reduce / broadcast matrices for the BatchNorms
    # (padded lanes belong to no segment -> statistics unaffected).
    def seg(c, l, pwidth):
        m = np.zeros((pwidth, c), np.float32)
        m[:c * l, :] = np.kron(np.eye(c, dtype=np.float32),
                               np.ones((l, 1), np.float32))
        return m, np.ascontiguousarray(m.T)

    seg1, seg1t = seg(C1, L1, P1)
    seg2, seg2t = seg(C2, L2, P2)
    seg3, seg3t = seg(C3, L3, P3)

    def flat_bias(bvec, l, pwidth):
        out = np.zeros((1, pwidth), np.float32)
        out[0, :bvec.shape[0] * l] = np.repeat(bvec, l)
        return out

    # MaxPool + Linear1 fusion: scatter w_lin1 columns onto window-END lanes
    # (the kernel builds trailing-window maxima with pltpu.roll).
    wp = np.zeros((P3, PH), np.float32)
    wl1 = p['w_lin1']                                                     # (hidden, C3*L4)
    for c in range(C3):
        for q in range(L4):
            wp[c * L3 + q * pool_size + pool_size - 1, :hidden] = wl1[:, c * L4 + q]
    bl1 = np.zeros((1, PH), np.float32)
    bl1[0, :hidden] = p['b_lin1']
    wl2 = np.zeros((PH, out_size), np.float32)
    wl2[:hidden, :] = p['w_lin2'].T
    bl2 = p['b_lin2'].reshape(1, out_size)

    row = lambda v, c: np.asarray(v, np.float32).reshape(1, c)
    cdt = compute_dtype
    dev = lambda a, dt=jnp.float32: jnp.asarray(a, dt)

    weights = (
        dev(pavg), dev(pbc),
        dev(e1, cdt), dev(flat_bias(p['b_conv1'], L1, P1)), dev(seg1), dev(seg1t),
        dev(row(p['g1'], C1)), dev(row(p['be1'], C1)),
        dev(e2, cdt), dev(flat_bias(p['b_conv2'], L2, P2)), dev(seg2), dev(seg2t),
        dev(row(p['g2'], C2)), dev(row(p['be2'], C2)),
        dev(e3, cdt), dev(flat_bias(p['b_conv3'], L3, P3)), dev(seg3), dev(seg3t),
        dev(row(p['g3'], C3)), dev(row(p['be3'], C3)),
        dev(wp, cdt), dev(bl1), dev(wl2, cdt), dev(bl2),
    )

    # Size the VMEM budget from actual operand + intermediate bytes (not hard-coded),
    # clamped to the smallest physical VMEM across generations (64 MiB/core on v7x).
    operand_bytes = (sum(int(a.size) * a.dtype.itemsize for a in weights)
                     + 4 * N * d + 4 * out_size * N)
    intermediate_bytes = 4 * N * (P1 + P2 + P3 + PH) * 3
    vmem_limit = int(min(64 << 20,
                         max(16 << 20, 2 * (operand_bytes + intermediate_bytes))))

    dims = dict(N=N, L1=L1, L2=L2, L3=L3, L4=L4,
                P1=P1, P2=P2, P3=P3, PH=PH, vmem_limit=vmem_limit)
    return weights, dims


def make_conv_k_region(params, *, b, k, d, kernel_size=8, pool_size=4,
                       hidden=32, out_size=8, compute_dtype=jnp.bfloat16):
    """Build fused GEMM operands ONCE; return a jitted forward: (b, k, d) -> (b, k, out)."""
    weights, dims = _build_effective_weights(
        params, b=b, k=k, d=d, kernel_size=kernel_size, pool_size=pool_size,
        hidden=hidden, out_size=out_size, compute_dtype=compute_dtype)
    N = dims['N']
    inv1 = 1.0 / float(N * dims['L1'])
    inv2 = 1.0 / float(N * dims['L2'])
    inv3 = 1.0 / float(N * dims['L3'])
    kernel = make_kernel(pool_size, inv1, inv2, inv3, compute_dtype)

    vmem = pl.BlockSpec(memory_space=pltpu.MemorySpace.VMEM)
    call = pl.pallas_call(
        kernel,
        out_shape=jax.ShapeDtypeStruct((out_size, N), jnp.float32),
        in_specs=[vmem] * (1 + len(weights)),
        out_specs=vmem,
        compiler_params=pltpu.CompilerParams(vmem_limit_bytes=dims['vmem_limit']),
    )

    def _forward(x, w):
        xr = x.reshape(N, d).astype(jnp.float32)
        out = call(xr, *w)                                   # (OUT, N), N on lanes
        return out.T.reshape(b, k, out_size)

    fwd = jax.jit(_forward)
    return lambda x: fwd(x, weights)


def init_params(key, *, time_series, kernel_size, pool_size, hidden=32, out_size=8):
    L1 = (time_series - kernel_size) // 2 + 1
    L2 = L1 - 8 + 1
    L3 = L2 - 8 + 1
    L4 = L3 // pool_size
    ks = jax.random.split(key, 10)
    nrm = lambda kk, shape: 0.1 * jax.random.normal(kk, shape, jnp.float32)
    return dict(
        w_conv1=nrm(ks[0], (C1, 1, kernel_size)), b_conv1=nrm(ks[1], (C1,)),
        w_conv2=nrm(ks[2], (C2, C1, 8)),          b_conv2=nrm(ks[3], (C2,)),
        w_conv3=nrm(ks[4], (C3, C2, 8)),          b_conv3=nrm(ks[5], (C3,)),
        w_lin1=nrm(ks[6], (hidden, C3 * L4)),     b_lin1=nrm(ks[7], (hidden,)),
        w_lin2=nrm(ks[8], (out_size, hidden)),    b_lin2=nrm(ks[9], (out_size,)),
        g1=jnp.ones((C1,), jnp.float32), be1=jnp.zeros((C1,), jnp.float32),
        g2=jnp.ones((C2,), jnp.float32), be2=jnp.zeros((C2,), jnp.float32),
        g3=jnp.ones((C3,), jnp.float32), be3=jnp.zeros((C3,), jnp.float32),
    )


def reference_forward(x, p, *, pool_size, out_size):
    """Pure-JAX reference mirroring the PyTorch forward (training-mode BN, default eps)."""
    b, k, d = x.shape
    xt = jnp.transpose(x, (0, 2, 1))                      # (b, d, k)
    mu = xt.mean(-1, keepdims=True)
    var = ((xt - mu) ** 2).mean(-1, keepdims=True)
    xt = (xt - mu) / jnp.sqrt(var + EPS)
    h = jnp.transpose(xt, (0, 2, 1)).reshape(b * k, 1, d)

    def conv1d(h, w, bia, stride=1):
        o = jax.lax.conv_general_dilated(h, w, (stride,), 'VALID',
                                         dimension_numbers=('NCH', 'OIH', 'NCH'))
        return o + bia[None, :, None]

    def bn(h, g, be):
        m = h.mean(axis=(0, 2), keepdims=True)
        v = ((h - m) ** 2).mean(axis=(0, 2), keepdims=True)
        return (h - m) / jnp.sqrt(v + EPS) * g[None, :, None] + be[None, :, None]

    h = bn(conv1d(h, p['w_conv1'], p['b_conv1'], 2), p['g1'], p['be1'])
    h = bn(conv1d(h, p['w_conv2'], p['b_conv2']), p['g2'], p['be2'])
    h = bn(conv1d(h, p['w_conv3'], p['b_conv3']), p['g3'], p['be3'])
    N, C, L = h.shape
    L4 = L // pool_size
    h = h[:, :, :L4 * pool_size].reshape(N, C, L4, pool_size).max(-1)
    h = h.reshape(b, k, C * L4)
    y = h @ p['w_lin1'].T + p['b_lin1']
    y = jnp.where(y >= 0, y, 0.2 * y)
    return y @ p['w_lin2'].T + p['b_lin2']


if __name__ == "__main__":
    b, k, d = 2, 4, 64          # batch=2, k=4 regions, time_series=64
    kernel_size, pool_size, hidden, out_size = 8, 4, 32, 8

    key = jax.random.PRNGKey(0)
    kx, kp = jax.random.split(key)
    x = jax.random.normal(kx, (b, k, d), jnp.float32)
    params = init_params(kp, time_series=d, kernel_size=kernel_size,
                         pool_size=pool_size, hidden=hidden, out_size=out_size)

    ref = jax.block_until_ready(
        reference_forward(x, params, pool_size=pool_size, out_size=out_size))
    max_ref = float(jnp.max(jnp.abs(ref)))

    # f32 matmul operands: near-exact check against the pure-JAX reference.
    fwd_f32 = make_conv_k_region(params, b=b, k=k, d=d, kernel_size=kernel_size,
                                 pool_size=pool_size, hidden=hidden, out_size=out_size,
                                 compute_dtype=jnp.float32)
    out = jax.block_until_ready(fwd_f32(x))
    assert out.shape == (b, k, out_size)
    err = float(jnp.max(jnp.abs(out - ref)))
    assert err < 2e-3, f"f32 mismatch vs reference: {err}"

    # bf16 matmul operands (stats stay f32): MXU-native production path.
    fwd_bf16 = make_conv_k_region(params, b=b, k=k, d=d, kernel_size=kernel_size,
                                  pool_size=pool_size, hidden=hidden, out_size=out_size,
                                  compute_dtype=jnp.bfloat16)
    out_bf = jax.block_until_ready(fwd_bf16(x))
    err_bf = float(jnp.max(jnp.abs(out_bf - ref)))
    assert err_bf < 5e-2 * (1.0 + max_ref), f"bf16 mismatch vs reference: {err_bf}"

    # Operands are cached inside the closure: a second call reuses the compiled executable
    # with zero host-side rebuild (review item #1).
    jax.block_until_ready(fwd_bf16(x))

    print("KERNEL_OK")
</pallas_src>

<mosaic_0001>
module attributes {stable_mosaic.version = 11 : i64} {
  func.func @kernel(%arg0: memref<8x64xf32, #tpu.memory_space<vmem>>, %arg1: memref<2x8xf32, #tpu.memory_space<vmem>>, %arg2: memref<8x2xf32, #tpu.memory_space<vmem>>, %arg3: memref<64x1024xf32, #tpu.memory_space<vmem>>, %arg4: memref<1x1024xf32, #tpu.memory_space<vmem>>, %arg5: memref<1024x32xf32, #tpu.memory_space<vmem>>, %arg6: memref<32x1024xf32, #tpu.memory_space<vmem>>, %arg7: memref<1x32xf32, #tpu.memory_space<vmem>>, %arg8: memref<1x32xf32, #tpu.memory_space<vmem>>, %arg9: memref<1024x768xf32, #tpu.memory_space<vmem>>, %arg10: memref<1x768xf32, #tpu.memory_space<vmem>>, %arg11: memref<768x32xf32, #tpu.memory_space<vmem>>, %arg12: memref<32x768xf32, #tpu.memory_space<vmem>>, %arg13: memref<1x32xf32, #tpu.memory_space<vmem>>, %arg14: memref<1x32xf32, #tpu.memory_space<vmem>>, %arg15: memref<768x256xf32, #tpu.memory_space<vmem>>, %arg16: memref<1x256xf32, #tpu.memory_space<vmem>>, %arg17: memref<256x16xf32, #tpu.memory_space<vmem>>, %arg18: memref<16x256xf32, #tpu.memory_space<vmem>>, %arg19: memref<1x16xf32, #tpu.memory_space<vmem>>, %arg20: memref<1x16xf32, #tpu.memory_space<vmem>>, %arg21: memref<256x128xf32, #tpu.memory_space<vmem>>, %arg22: memref<1x128xf32, #tpu.memory_space<vmem>>, %arg23: memref<128x8xf32, #tpu.memory_space<vmem>>, %arg24: memref<1x8xf32, #tpu.memory_space<vmem>>, %arg25: memref<8x8xf32, #tpu.memory_space<vmem>>) attributes {dimension_semantics = [], scalar_prefetch = 0 : i64, scratch_operands = 0 : i64, tpu.core_type = #tpu.core_type<tc>} {
    %c0 = arith.constant 0 : index
    %c0_0 = arith.constant 0 : index
    %0 = vector.load %arg0[%c0, %c0_0] : memref<8x64xf32, #tpu.memory_space<vmem>>, vector<8x64xf32>
    %c0_1 = arith.constant 0 : index
    %c0_2 = arith.constant 0 : index
    %1 = vector.load %arg1[%c0_1, %c0_2] : memref<2x8xf32, #tpu.memory_space<vmem>>, vector<2x8xf32>
    %cst = arith.constant dense<0.000000e+00> : vector<2x64xf32>
    %2 = tpu.matmul %1, %0, %cst {dimension_numbers = #tpu.dot_dimension_numbers<[1], [0], [0], [1], [0, 0, 1, 1], [], []>} : vector<2x8xf32>, vector<8x64xf32>, vector<2x64xf32> -> vector<2x64xf32>
    %3 = arith.mulf %0, %0 : vector<8x64xf32>
    %cst_3 = arith.constant dense<0.000000e+00> : vector<2x64xf32>
    %4 = tpu.matmul %1, %3, %cst_3 {dimension_numbers = #tpu.dot_dimension_numbers<[1], [0], [0], [1], [0, 0, 1, 1], [], []>} : vector<2x8xf32>, vector<8x64xf32>, vector<2x64xf32> -> vector<2x64xf32>
    %5 = arith.mulf %2, %2 : vector<2x64xf32>
    %6 = arith.subf %4, %5 : vector<2x64xf32>
    %cst_4 = arith.constant 0.000000e+00 : f32
    %7 = vector.broadcast %cst_4 : f32 to vector<2x64xf32>
    %8 = arith.maximumf %6, %7 : vector<2x64xf32>
    %cst_5 = arith.constant 9.99999974E-6 : f32
    %9 = vector.broadcast %cst_5 : f32 to vector<2x64xf32>
    %10 = arith.addf %8, %9 : vector<2x64xf32>
    %11 = math.rsqrt %10 : vector<2x64xf32>
    %c0_6 = arith.constant 0 : index
    %c0_7 = arith.constant 0 : index
    %12 = vector.load %arg2[%c0_6, %c0_7] : memref<8x2xf32, #tpu.memory_space<vmem>>, vector<8x2xf32>
    %cst_8 = arith.constant dense<0.000000e+00> : vector<8x64xf32>
    %13 = tpu.matmul %12, %11, %cst_8 {dimension_numbers = #tpu.dot_dimension_numbers<[1], [0], [0], [1], [0, 0, 1, 1], [], []>} : vector<8x2xf32>, vector<2x64xf32>, vector<8x64xf32> -> vector<8x64xf32>
    %14 = arith.mulf %2, %11 : vector<2x64xf32>
    %cst_9 = arith.constant dense<0.000000e+00> : vector<8x64xf32>
    %15 = tpu.matmul %12, %14, %cst_9 {dimension_numbers = #tpu.dot_dimension_numbers<[1], [0], [0], [1], [0, 0, 1, 1], [], []>} : vector<8x2xf32>, vector<2x64xf32>, vector<8x64xf32> -> vector<8x64xf32>
    %16 = arith.mulf %0, %13 : vector<8x64xf32>
    %17 = arith.subf %16, %15 : vector<8x64xf32>
    %c0_10 = arith.constant 0 : index
    %c0_11 = arith.constant 0 : index
    %18 = vector.load %arg3[%c0_10, %c0_11] : memref<64x1024xf32, #tpu.memory_space<vmem>>, vector<64x1024xf32>
    %cst_12 = arith.constant dense<0.000000e+00> : vector<8x1024xf32>
    %19 = tpu.matmul %17, %18, %cst_12 {dimension_numbers = #tpu.dot_dimension_numbers<[1], [0], [0], [1], [0, 0, 1, 1], [], []>} : vector<8x64xf32>, vector<64x1024xf32>, vector<8x1024xf32> -> vector<8x1024xf32>
    %c0_13 = arith.constant 0 : index
    %c0_14 = arith.constant 0 : index
    %20 = vector.load %arg4[%c0_13, %c0_14] : memref<1x1024xf32, #tpu.memory_space<vmem>>, vector<1x1024xf32>
    %21 = vector.broadcast %20 : vector<1x1024xf32> to vector<8x1024xf32>
    %22 = arith.addf %19, %21 : vector<8x1024xf32>
    %c0_15 = arith.constant 0 : index
    %c0_16 = arith.constant 0 : index
    %23 = vector.load %arg5[%c0_15, %c0_16] : memref<1024x32xf32, #tpu.memory_space<vmem>>, vector<1024x32xf32>
    %c0_17 = arith.constant 0 : index
    %c0_18 = arith.constant 0 : index
    %24 = vector.load %arg6[%c0_17, %c0_18] : memref<32x1024xf32, #tpu.memory_space<vmem>>, vector<32x1024xf32>
    %c0_19 = arith.constant 0 : index
    %c0_20 = arith.constant 0 : index
    %25 = vector.load %arg7[%c0_19, %c0_20] : memref<1x32xf32, #tpu.memory_space<vmem>>, vector<1x32xf32>
    %c0_21 = arith.constant 0 : index
    %c0_22 = arith.constant 0 : index
    %26 = vector.load %arg8[%c0_21, %c0_22] : memref<1x32xf32, #tpu.memory_space<vmem>>, vector<1x32xf32>
    %cst_23 = arith.constant dense<0.000000e+00> : vector<1024xf32>
    %27 = vector.multi_reduction <add>, %22, %cst_23 [0] : vector<8x1024xf32> to vector<1024xf32>
    %28 = vector.shape_cast %27 : vector<1024xf32> to vector<1x1024xf32>
    %29 = arith.mulf %22, %22 : vector<8x1024xf32>
    %cst_24 = arith.constant dense<0.000000e+00> : vector<1024xf32>
    %30 = vector.multi_reduction <add>, %29, %cst_24 [0] : vector<8x1024xf32> to vector<1024xf32>
    %31 = vector.shape_cast %30 : vector<1024xf32> to vector<1x1024xf32>
    %32 = tpu.concatenate %28, %31 in 0 : vector<1x1024xf32>, vector<1x1024xf32> -> vector<2x1024xf32>
    %cst_25 = arith.constant dense<0.000000e+00> : vector<2x32xf32>
    %33 = tpu.matmul %32, %23, %cst_25 {dimension_numbers = #tpu.dot_dimension_numbers<[1], [0], [0], [1], [0, 0, 1, 1], [], []>} : vector<2x1024xf32>, vector<1024x32xf32>, vector<2x32xf32> -> vector<2x32xf32>
    %34 = vector.extract_strided_slice %33 {offsets = [0, 0], sizes = [1, 32], strides = [1, 1]} : vector<2x32xf32> to vector<1x32xf32>
    %cst_26 = arith.constant 0.00431034481 : f32
    %35 = vector.broadcast %cst_26 : f32 to vector<1x32xf32>
    %36 = arith.mulf %34, %35 : vector<1x32xf32>
    %37 = vector.extract_strided_slice %33 {offsets = [1, 0], sizes = [1, 32], strides = [1, 1]} : vector<2x32xf32> to vector<1x32xf32>
    %cst_27 = arith.constant 0.00431034481 : f32
    %38 = vector.broadcast %cst_27 : f32 to vector<1x32xf32>
    %39 = arith.mulf %37, %38 : vector<1x32xf32>
    %40 = arith.mulf %36, %36 : vector<1x32xf32>
    %41 = arith.subf %39, %40 : vector<1x32xf32>
    %cst_28 = arith.constant 0.000000e+00 : f32
    %42 = vector.broadcast %cst_28 : f32 to vector<1x32xf32>
    %43 = arith.maximumf %41, %42 : vector<1x32xf32>
    %cst_29 = arith.constant 9.99999974E-6 : f32
    %44 = vector.broadcast %cst_29 : f32 to vector<1x32xf32>
    %45 = arith.addf %43, %44 : vector<1x32xf32>
    %46 = math.rsqrt %45 : vector<1x32xf32>
    %47 = arith.mulf %25, %46 : vector<1x32xf32>
    %48 = arith.mulf %36, %47 : vector<1x32xf32>
    %49 = arith.subf %26, %48 : vector<1x32xf32>
    %50 = tpu.concatenate %47, %49 in 0 : vector<1x32xf32>, vector<1x32xf32> -> vector<2x32xf32>
    %cst_30 = arith.constant dense<0.000000e+00> : vector<2x1024xf32>
    %51 = tpu.matmul %50, %24, %cst_30 {dimension_numbers = #tpu.dot_dimension_numbers<[1], [0], [0], [1], [0, 0, 1, 1], [], []>} : vector<2x32xf32>, vector<32x1024xf32>, vector<2x1024xf32> -> vector<2x1024xf32>
    %52 = vector.extract_strided_slice %51 {offsets = [0, 0], sizes = [1, 1024], strides = [1, 1]} : vector<2x1024xf32> to vector<1x1024xf32>
    %53 = vector.broadcast %52 : vector<1x1024xf32> to vector<8x1024xf32>
    %54 = arith.mulf %22, %53 : vector<8x1024xf32>
    %55 = vector.extract_strided_slice %51 {offsets = [1, 0], sizes = [1, 1024], strides = [1, 1]} : vector<2x1024xf32> to vector<1x1024xf32>
    %56 = vector.broadcast %55 : vector<1x1024xf32> to vector<8x1024xf32>
    %57 = arith.addf %54, %56 : vector<8x1024xf32>
    %c0_31 = arith.constant 0 : index
    %c0_32 = arith.constant 0 : index
    %58 = vector.load %arg9[%c0_31, %c0_32] : memref<1024x768xf32, #tpu.memory_space<vmem>>, vector<1024x768xf32>
    %cst_33 = arith.constant dense<0.000000e+00> : vector<8x768xf32>
    %59 = tpu.matmul %57, %58, %cst_33 {dimension_numbers = #tpu.dot_dimension_numbers<[1], [0], [0], [1], [0, 0, 1, 1], [], []>} : vector<8x1024xf32>, vector<1024x768xf32>, vector<8x768xf32> -> vector<8x768xf32>
    %c0_34 = arith.constant 0 : index
    %c0_35 = arith.constant 0 : index
    %60 = vector.load %arg10[%c0_34, %c0_35] : memref<1x768xf32, #tpu.memory_space<vmem>>, vector<1x768xf32>
    %61 = vector.broadcast %60 : vector<1x768xf32> to vector<8x768xf32>
    %62 = arith.addf %59, %61 : vector<8x768xf32>
    %c0_36 = arith.constant 0 : index
    %c0_37 = arith.constant 0 : index
    %63 = vector.load %arg11[%c0_36, %c0_37] : memref<768x32xf32, #tpu.memory_space<vmem>>, vector<768x32xf32>
    %c0_38 = arith.constant 0 : index
    %c0_39 = arith.constant 0 : index
    %64 = vector.load %arg12[%c0_38, %c0_39] : memref<32x768xf32, #tpu.memory_space<vmem>>, vector<32x768xf32>
    %c0_40 = arith.constant 0 : index
    %c0_41 = arith.constant 0 : index
    %65 = vector.load %arg13[%c0_40, %c0_41] : memref<1x32xf32, #tpu.memory_space<vmem>>, vector<1x32xf32>
    %c0_42 = arith.constant 0 : index
    %c0_43 = arith.constant 0 : index
    %66 = vector.load %arg14[%c0_42, %c0_43] : memref<1x32xf32, #tpu.memory_space<vmem>>, vector<1x32xf32>
    %cst_44 = arith.constant dense<0.000000e+00> : vector<768xf32>
    %67 = vector.multi_reduction <add>, %62, %cst_44 [0] : vector<8x768xf32> to vector<768xf32>
    %68 = vector.shape_cast %67 : vector<768xf32> to vector<1x768xf32>
    %69 = arith.mulf %62, %62 : vector<8x768xf32>
    %cst_45 = arith.constant dense<0.000000e+00> : vector<768xf32>
    %70 = vector.multi_reduction <add>, %69, %cst_45 [0] : vector<8x768xf32> to vector<768xf32>
    %71 = vector.shape_cast %70 : vector<768xf32> to vector<1x768xf32>
    %72 = tpu.concatenate %68, %71 in 0 : vector<1x768xf32>, vector<1x768xf32> -> vector<2x768xf32>
    %cst_46 = arith.constant dense<0.000000e+00> : vector<2x32xf32>
    %73 = tpu.matmul %72, %63, %cst_46 {dimension_numbers = #tpu.dot_dimension_numbers<[1], [0], [0], [1], [0, 0, 1, 1], [], []>} : vector<2x768xf32>, vector<768x32xf32>, vector<2x32xf32> -> vector<2x32xf32>
    %74 = vector.extract_strided_slice %73 {offsets = [0, 0], sizes = [1, 32], strides = [1, 1]} : vector<2x32xf32> to vector<1x32xf32>
    %cst_47 = arith.constant 0.00568181835 : f32
    %75 = vector.broadcast %cst_47 : f32 to vector<1x32xf32>
    %76 = arith.mulf %74, %75 : vector<1x32xf32>
    %77 = vector.extract_strided_slice %73 {offsets = [1, 0], sizes = [1, 32], strides = [1, 1]} : vector<2x32xf32> to vector<1x32xf32>
    %cst_48 = arith.constant 0.00568181835 : f32
    %78 = vector.broadcast %cst_48 : f32 to vector<1x32xf32>
    %79 = arith.mulf %77, %78 : vector<1x32xf32>
    %80 = arith.mulf %76, %76 : vector<1x32xf32>
    %81 = arith.subf %79, %80 : vector<1x32xf32>
    %cst_49 = arith.constant 0.000000e+00 : f32
    %82 = vector.broadcast %cst_49 : f32 to vector<1x32xf32>
    %83 = arith.maximumf %81, %82 : vector<1x32xf32>
    %cst_50 = arith.constant 9.99999974E-6 : f32
    %84 = vector.broadcast %cst_50 : f32 to vector<1x32xf32>
    %85 = arith.addf %83, %84 : vector<1x32xf32>
    %86 = math.rsqrt %85 : vector<1x32xf32>
    %87 = arith.mulf %65, %86 : vector<1x32xf32>
    %88 = arith.mulf %76, %87 : vector<1x32xf32>
    %89 = arith.subf %66, %88 : vector<1x32xf32>
    %90 = tpu.concatenate %87, %89 in 0 : vector<1x32xf32>, vector<1x32xf32> -> vector<2x32xf32>
    %cst_51 = arith.constant dense<0.000000e+00> : vector<2x768xf32>
    %91 = tpu.matmul %90, %64, %cst_51 {dimension_numbers = #tpu.dot_dimension_numbers<[1], [0], [0], [1], [0, 0, 1, 1], [], []>} : vector<2x32xf32>, vector<32x768xf32>, vector<2x768xf32> -> vector<2x768xf32>
    %92 = vector.extract_strided_slice %91 {offsets = [0, 0], sizes = [1, 768], strides = [1, 1]} : vector<2x768xf32> to vector<1x768xf32>
    %93 = vector.broadcast %92 : vector<1x768xf32> to vector<8x768xf32>
    %94 = arith.mulf %62, %93 : vector<8x768xf32>
    %95 = vector.extract_strided_slice %91 {offsets = [1, 0], sizes = [1, 768], strides = [1, 1]} : vector<2x768xf32> to vector<1x768xf32>
    %96 = vector.broadcast %95 : vector<1x768xf32> to vector<8x768xf32>
    %97 = arith.addf %94, %96 : vector<8x768xf32>
    %c0_52 = arith.constant 0 : index
    %c0_53 = arith.constant 0 : index
    %98 = vector.load %arg15[%c0_52, %c0_53] : memref<768x256xf32, #tpu.memory_space<vmem>>, vector<768x256xf32>
    %cst_54 = arith.constant dense<0.000000e+00> : vector<8x256xf32>
    %99 = tpu.matmul %97, %98, %cst_54 {dimension_numbers = #tpu.dot_dimension_numbers<[1], [0], [0], [1], [0, 0, 1, 1], [], []>} : vector<8x768xf32>, vector<768x256xf32>, vector<8x256xf32> -> vector<8x256xf32>
    %c0_55 = arith.constant 0 : index
    %c0_56 = arith.constant 0 : index
    %100 = vector.load %arg16[%c0_55, %c0_56] : memref<1x256xf32, #tpu.memory_space<vmem>>, vector<1x256xf32>
    %101 = vector.broadcast %100 : vector<1x256xf32> to vector<8x256xf32>
    %102 = arith.addf %99, %101 : vector<8x256xf32>
    %c0_57 = arith.constant 0 : index
    %c0_58 = arith.constant 0 : index
    %103 = vector.load %arg17[%c0_57, %c0_58] : memref<256x16xf32, #tpu.memory_space<vmem>>, vector<256x16xf32>
    %c0_59 = arith.constant 0 : index
    %c0_60 = arith.constant 0 : index
    %104 = vector.load %arg18[%c0_59, %c0_60] : memref<16x256xf32, #tpu.memory_space<vmem>>, vector<16x256xf32>
    %c0_61 = arith.constant 0 : index
    %c0_62 = arith.constant 0 : index
    %105 = vector.load %arg19[%c0_61, %c0_62] : memref<1x16xf32, #tpu.memory_space<vmem>>, vector<1x16xf32>
    %c0_63 = arith.constant 0 : index
    %c0_64 = arith.constant 0 : index
    %106 = vector.load %arg20[%c0_63, %c0_64] : memref<1x16xf32, #tpu.memory_space<vmem>>, vector<1x16xf32>
    %cst_65 = arith.constant dense<0.000000e+00> : vector<256xf32>
    %107 = vector.multi_reduction <add>, %102, %cst_65 [0] : vector<8x256xf32> to vector<256xf32>
    %108 = vector.shape_cast %107 : vector<256xf32> to vector<1x256xf32>
    %109 = arith.mulf %102, %102 : vector<8x256xf32>
    %cst_66 = arith.constant dense<0.000000e+00> : vector<256xf32>
    %110 = vector.multi_reduction <add>, %109, %cst_66 [0] : vector<8x256xf32> to vector<256xf32>
    %111 = vector.shape_cast %110 : vector<256xf32> to vector<1x256xf32>
    %112 = tpu.concatenate %108, %111 in 0 : vector<1x256xf32>, vector<1x256xf32> -> vector<2x256xf32>
    %cst_67 = arith.constant dense<0.000000e+00> : vector<2x16xf32>
    %113 = tpu.matmul %112, %103, %cst_67 {dimension_numbers = #tpu.dot_dimension_numbers<[1], [0], [0], [1], [0, 0, 1, 1], [], []>} : vector<2x256xf32>, vector<256x16xf32>, vector<2x16xf32> -> vector<2x16xf32>
    %114 = vector.extract_strided_slice %113 {offsets = [0, 0], sizes = [1, 16], strides = [1, 1]} : vector<2x16xf32> to vector<1x16xf32>
    %cst_68 = arith.constant 0.00833333377 : f32
    %115 = vector.broadcast %cst_68 : f32 to vector<1x16xf32>
    %116 = arith.mulf %114, %115 : vector<1x16xf32>
    %117 = vector.extract_strided_slice %113 {offsets = [1, 0], sizes = [1, 16], strides = [1, 1]} : vector<2x16xf32> to vector<1x16xf32>
    %cst_69 = arith.constant 0.00833333377 : f32
    %118 = vector.broadcast %cst_69 : f32 to vector<1x16xf32>
    %119 = arith.mulf %117, %118 : vector<1x16xf32>
    %120 = arith.mulf %116, %116 : vector<1x16xf32>
    %121 = arith.subf %119, %120 : vector<1x16xf32>
    %cst_70 = arith.constant 0.000000e+00 : f32
    %122 = vector.broadcast %cst_70 : f32 to vector<1x16xf32>
    %123 = arith.maximumf %121, %122 : vector<1x16xf32>
    %cst_71 = arith.constant 9.99999974E-6 : f32
    %124 = vector.broadcast %cst_71 : f32 to vector<1x16xf32>
    %125 = arith.addf %123, %124 : vector<1x16xf32>
    %126 = math.rsqrt %125 : vector<1x16xf32>
    %127 = arith.mulf %105, %126 : vector<1x16xf32>
    %128 = arith.mulf %116, %127 : vector<1x16xf32>
    %129 = arith.subf %106, %128 : vector<1x16xf32>
    %130 = tpu.concatenate %127, %129 in 0 : vector<1x16xf32>, vector<1x16xf32> -> vector<2x16xf32>
    %cst_72 = arith.constant dense<0.000000e+00> : vector<2x256xf32>
    %131 = tpu.matmul %130, %104, %cst_72 {dimension_numbers = #tpu.dot_dimension_numbers<[1], [0], [0], [1], [0, 0, 1, 1], [], []>} : vector<2x16xf32>, vector<16x256xf32>, vector<2x256xf32> -> vector<2x256xf32>
    %132 = vector.extract_strided_slice %131 {offsets = [0, 0], sizes = [1, 256], strides = [1, 1]} : vector<2x256xf32> to vector<1x256xf32>
    %133 = vector.broadcast %132 : vector<1x256xf32> to vector<8x256xf32>
    %134 = arith.mulf %102, %133 : vector<8x256xf32>
    %135 = vector.extract_strided_slice %131 {offsets = [1, 0], sizes = [1, 256], strides = [1, 1]} : vector<2x256xf32> to vector<1x256xf32>
    %136 = vector.broadcast %135 : vector<1x256xf32> to vector<8x256xf32>
    %137 = arith.addf %134, %136 : vector<8x256xf32>
    %c1_i32 = arith.constant 1 : i32
    %138 = tpu.dynamic_rotate %137 by %c1_i32 dim 1 : vector<8x256xf32>, i32 -> vector<8x256xf32>
    %139 = arith.maximumf %137, %138 : vector<8x256xf32>
    %c2_i32 = arith.constant 2 : i32
    %140 = tpu.dynamic_rotate %137 by %c2_i32 dim 1 : vector<8x256xf32>, i32 -> vector<8x256xf32>
    %141 = arith.maximumf %139, %140 : vector<8x256xf32>
    %c3_i32 = arith.constant 3 : i32
    %142 = tpu.dynamic_rotate %137 by %c3_i32 dim 1 : vector<8x256xf32>, i32 -> vector<8x256xf32>
    %143 = arith.maximumf %141, %142 : vector<8x256xf32>
    %c0_73 = arith.constant 0 : index
    %c0_74 = arith.constant 0 : index
    %144 = vector.load %arg21[%c0_73, %c0_74] : memref<256x128xf32, #tpu.memory_space<vmem>>, vector<256x128xf32>
    %cst_75 = arith.constant dense<0.000000e+00> : vector<8x128xf32>
    %145 = tpu.matmul %143, %144, %cst_75 {dimension_numbers = #tpu.dot_dimension_numbers<[1], [0], [0], [1], [0, 0, 1, 1], [], []>} : vector<8x256xf32>, vector<256x128xf32>, vector<8x128xf32> -> vector<8x128xf32>
    %c0_76 = arith.constant 0 : index
    %c0_77 = arith.constant 0 : index
    %146 = vector.load %arg22[%c0_76, %c0_77] : memref<1x128xf32, #tpu.memory_space<vmem>>, vector<1x128xf32>
    %147 = vector.broadcast %146 : vector<1x128xf32> to vector<8x128xf32>
    %148 = arith.addf %145, %147 : vector<8x128xf32>
    %cst_78 = arith.constant 0.000000e+00 : f32
    %149 = vector.broadcast %cst_78 : f32 to vector<8x128xf32>
    %150 = arith.cmpf oge, %148, %149 : vector<8x128xf32>
    %cst_79 = arith.constant 2.000000e-01 : f32
    %151 = vector.broadcast %cst_79 : f32 to vector<8x128xf32>
    %152 = arith.mulf %151, %148 : vector<8x128xf32>
    %153 = arith.select %150, %148, %152 : vector<8x128xi1>, vector<8x128xf32>
    %c0_80 = arith.constant 0 : index
    %c0_81 = arith.constant 0 : index
    %154 = vector.load %arg23[%c0_80, %c0_81] : memref<128x8xf32, #tpu.memory_space<vmem>>, vector<128x8xf32>
    %cst_82 = arith.constant dense<0.000000e+00> : vector<8x8xf32>
    %155 = tpu.matmul %153, %154, %cst_82 {dimension_numbers = #tpu.dot_dimension_numbers<[1], [0], [0], [1], [0, 0, 1, 1], [], []>} : vector<8x128xf32>, vector<128x8xf32>, vector<8x8xf32> -> vector<8x8xf32>
    %c0_83 = arith.constant 0 : index
    %c0_84 = arith.constant 0 : index
    %156 = vector.load %arg24[%c0_83, %c0_84] : memref<1x8xf32, #tpu.memory_space<vmem>>, vector<1x8xf32>
    %157 = vector.broadcast %156 : vector<1x8xf32> to vector<8x8xf32>
    %158 = arith.addf %155, %157 : vector<8x8xf32>
    %159 = tpu.transpose %158, [1, 0] : vector<8x8xf32> -> vector<8x8xf32>
    %c0_85 = arith.constant 0 : index
    %c0_86 = arith.constant 0 : index
    %160 = vector.load %arg25[%c0_85, %c0_86] : memref<8x8xf32, #tpu.memory_space<vmem>>, vector<8x8xf32>
    tpu.vector_store %arg25[%c0_85, %c0_86], %159 {strides = array<i32>} : memref<8x8xf32, #tpu.memory_space<vmem>>, vector<8x8xf32>,
    return
  }
}

</mosaic_0001>

<bundles_post_ra>
// kernel: _forward.1
= control target key start
LH: loop header
LB: loop body
LE: loop exit
PB: predicated region body
PF: predicated region fallthrough
CT: control target
= control target key end

     0   :  { %s7648_s0 = inlined_call_operand.hbm [shape: f32[8,64], index: 0, kind: input, shape index: {}]   ;;  %s7649_s1 = inlined_call_operand.hbm [shape: f32[2,8], index: 1, kind: input, shape index: {}]   ;;  %s7650_s2 = inlined_call_operand.vmem [shape: f32[8,2], index: 2, kind: input, shape index: {}]   ;;  %s7651_s3 = inlined_call_operand.hbm [shape: f32[64,1024], index: 3, kind: input, shape index: {}]   ;;  %s7652_s4 = inlined_call_operand.hbm [shape: f32[1,1024], index: 4, kind: input, shape index: {}]   ;;  %s7653_s5 = inlined_call_operand.vmem [shape: f32[1024,32], index: 5, kind: input, shape index: {}]   ;;  %s7654_s6 = inlined_call_operand.hbm [shape: f32[32,1024], index: 6, kind: input, shape index: {}]   ;;  %s7655_s7 = inlined_call_operand.hbm [shape: f32[1,32], index: 7, kind: input, shape index: {}]   ;;  %s7656_s8 = inlined_call_operand.hbm [shape: f32[1,32], index: 8, kind: input, shape index: {}]   ;;  %s7657_s9 = inlined_call_operand.hbm [shape: f32[1024,768], index: 9, kind: input, shape index: {}]   ;;  %s7658_s10 = inlined_call_operand.hbm [shape: f32[1,768], index: 10, kind: input, shape index: {}]   ;;  %s7659_s11 = inlined_call_operand.vmem [shape: f32[768,32], index: 11, kind: input, shape index: {}]   ;;  %s7660_s12 = inlined_call_operand.hbm [shape: f32[32,768], index: 12, kind: input, shape index: {}]   ;;  %s7661_s13 = inlined_call_operand.hbm [shape: f32[1,32], index: 13, kind: input, shape index: {}]   ;;  %s7662_s14 = inlined_call_operand.hbm [shape: f32[1,32], index: 14, kind: input, shape index: {}]   ;;  %s7663_s15 = inlined_call_operand.hbm [shape: f32[768,256], index: 15, kind: input, shape index: {}]   ;;  %s7664_s16 = inlined_call_operand.hbm [shape: f32[1,256], index: 16, kind: input, shape index: {}]   ;;  %s7665_s17 = inlined_call_operand.vmem [shape: f32[256,16], index: 17, kind: input, shape index: {}]   ;;  %s7666_s18 = inlined_call_operand.hbm [shape: f32[16,256], index: 18, kind: input, shape index: {}]   ;;  %s7667_s19 = inlined_call_operand.hbm [shape: f32[1,16], index: 19, kind: input, shape index: {}]   ;;  %s7668_s20 = inlined_call_operand.hbm [shape: f32[1,16], index: 20, kind: input, shape index: {}]   ;;  %s7669_s21 = inlined_call_operand.hbm [shape: f32[256,128], index: 21, kind: input, shape index: {}]   ;;  %s7670_s22 = inlined_call_operand.hbm [shape: f32[1,128], index: 22, kind: input, shape index: {}]   ;;  %s7671_s23 = inlined_call_operand.vmem [shape: f32[128,8], index: 23, kind: input, shape index: {}]   ;;  %s7672_s24 = inlined_call_operand.hbm [shape: f32[1,8], index: 24, kind: input, shape index: {}]   ;;  %s7673_s25 = inlined_call_operand.vmem [shape: f32[8,8], index: 25, kind: output, shape index: {}]  }
   0x1   :  { %7675 = sst [smem:[#allocation44_spill]] %s7648_s0 }
   0x2   :  { %7676 = sst [smem:[#allocation45_spill]] %s7649_s1 }
   0x3   :  { %7677 = sst [smem:[#allocation46_spill]] %s7650_s2 }
   0x4   :  { %7678 = sst [smem:[#allocation47_spill]] %s7651_s3 }
   0x5   :  { %7679 = sst [smem:[#allocation48_spill]] %s7652_s4 }
   0x6   :  { %7680 = sst [smem:[#allocation49_spill]] %s7653_s5 }
   0x7   :  { %7681 = sst [smem:[#allocation50_spill]] %s7654_s6 }
   0x8   :  { %7682 = sst [smem:[#allocation51_spill]] %s7655_s7 }
   0x9   :  { %7683 = sst [smem:[#allocation52_spill]] %s7656_s8 }
   0xa   :  { %7684 = sst [smem:[#allocation53_spill]] %s7657_s9 }
   0xb   :  { %30 = vsyncpa [#allocation3], 0 }
   0xc   :  { %31 = vsyncpa [#allocation5], 0 }
   0xd   :  { %32 = vsyncpa [#allocation8], 0 }
   0xe   :  { %33 = vsyncpa [#allocation11], 0 }
   0xf   :  { %34 = vsyncpa [#allocation14], 0 }
  0x10   :  { %35 = vsyncpa [#allocation17], 0 }
  0x11   :  { %36 = vsyncpa [#allocation20], 0 }
  0x12   :  { %37 = vsyncpa [#allocation23], 0 }
  0x13   :  { %38 = vsyncpa [#allocation26], 0 }
  0x14   :  { %39 = vsyncpa [#allocation29], 0 }
  0x15   :  { %40 = vsyncpa [#allocation32], 0  ;;  %s6225_s29 = smov [#allocation4]   ;;  %s6226_s6 = smov [#allocation7]  }
  0x16   :  { %s57_s2 = sshll.u32 %s6225_s29, 4  ;;  %s81_s30 = sshll.u32 %s6226_s6, 4  ;;  %s58_s2 = int_to_ptr.vmem [resolvable:$true] %s57_s2  ;;  %s82_s30 = int_to_ptr.vmem [resolvable:$true] %s81_s30 }
  0x17   :  { %s5811_s7 = scalar_lea.vmem %s58_s2, 32  ;;  %p5816_p1 = scmp.lt.s32.totalorder %s58_s2, %s58_s2 }
  0x18   :  { %p5812_p0 = scmp.ne.s32.totalorder %s58_s2, %s5811_s7  ;;  %p5817_p2 = scmp.lt.s32.totalorder %s5811_s7, %s5811_s7 }
  0x1a   :  { %p5818_p3 = por %p5817_p2, %p5816_p1 }
  0x1c   :  { %p5819_p4 = pnand %p5818_p3, %p5812_p0 }
  0x1e   :  { %5822 = shalt.err (!%p5819_p4)
}
  0x1f   :  { %s7685_s1 = sld [smem:[#allocation45_spill]]  ;;  %s5831_s8 = scalar_lea.vmem %s82_s30, 128 }
  0x20   :  { %p5832_p5 = scmp.ne.s32.totalorder %s82_s30, %s5831_s8  ;;  %p5836_p6 = scmp.lt.s32.totalorder %s82_s30, %s82_s30 }
  0x21   :  { %p5837_p7 = scmp.lt.s32.totalorder %s5831_s8, %s5831_s8 }
  0x23   :  { %p5838_p8 = por %p5837_p7, %p5836_p6 }
  0x25   :  { %60 = dma.hbm_to_vmem [thread:$0]  %s7685_s1, 32, %s58_s2, [#allocation5]  }
  0x26   :  { %p5839_p9 = pnand %p5838_p8, %p5832_p5 }
  0x28   :  { %5842 = shalt.err (!%p5839_p9)
}
  0x29   :  { %s7686_s28 = sld [smem:[#allocation48_spill]]  ;;  %s6227_s9 = smov [#allocation10]  }
  0x2a   :  { %s105_s5 = sshll.u32 %s6227_s9, 4  ;;  %s6228_s0 = smov [#allocation13]   ;;  %s106_s5 = int_to_ptr.vmem [resolvable:$true] %s105_s5 }
  0x2b   :  { %s124_s29 = sshll.u32 %s6228_s0, 4  ;;  %s5851_s6 = scalar_lea.vmem %s106_s5, 16  ;;  %s125_s29 = int_to_ptr.vmem [resolvable:$true] %s124_s29 }
  0x2c   :  { %p5852_p10 = scmp.ne.s32.totalorder %s106_s5, %s5851_s6  ;;  %s5855_s2 = scalar_lea.vmem %s106_s5, 32 }
  0x2d   :  { %p5856_p11 = scmp.lt.s32.totalorder %s106_s5, %s106_s5  ;;  %p5857_p12 = scmp.lt.s32.totalorder %s5855_s2, %s5851_s6 }
  0x2f   :  { %84 = dma.hbm_to_vmem [thread:$0]  %s7686_s28, 128, %s82_s30, [#allocation8]  }
  0x30   :  { %p5858_p13 = por %p5857_p12, %p5856_p11 }
  0x32   :  { %p5859_p0 = pnand %p5858_p13, %p5852_p10 }
  0x34   :  { %5862 = shalt.err (!%p5859_p0)
}
  0x35   :  { %s7687_s26 = sld [smem:[#allocation51_spill]]  ;;  %s5871_s1 = scalar_lea.vmem %s125_s29, 98304 }
  0x36   :  { %p5872_p1 = scmp.ne.s32.totalorder %s125_s29, %s5871_s1  ;;  %p5876_p2 = scmp.lt.s32.totalorder %s125_s29, %s125_s29 }
  0x37   :  { %p5877_p3 = scmp.lt.s32.totalorder %s5871_s1, %s5871_s1 }
  0x39   :  { %p5878_p4 = por %p5877_p3, %p5876_p2 }
  0x3b   :  { %108 = dma.hbm_to_vmem [thread:$0]  %s7687_s26, 16, %s106_s5, [#allocation11]  }
  0x3c   :  { %p5879_p5 = pnand %p5878_p4, %p5872_p1 }
  0x3e   :  { %5882 = shalt.err (!%p5879_p5)
}
  0x3f   :  { %s6229_s30 = smov 768   ;;  %s6230_s8 = smov 48  }
  0x40   :  { %s7688_s28 = sld [smem:[#allocation53_spill]]  ;;  %s6231_s9 = smov [#allocation16]  }
  0x41   :  { %s148_s0 = sshll.u32 %s6231_s9, 4  ;;  %s6232_s6 = smov [#allocation19]   ;;  %s149_s0 = int_to_ptr.vmem [resolvable:$true] %s148_s0 }
  0x42   :  { %s171_s2 = sshll.u32 %s6232_s6, 4  ;;  %s5891_s5 = scalar_lea.vmem %s149_s0, 3072  ;;  %s172_s2 = int_to_ptr.vmem [resolvable:$true] %s171_s2 }
  0x43   :  { %p5892_p6 = scmp.ne.s32.totalorder %s149_s0, %s5891_s5  ;;  %p5896_p7 = scmp.lt.s32.totalorder %s149_s0, %s149_s0 }
  0x44   :  { %p5897_p8 = scmp.lt.s32.totalorder %s5891_s5, %s5891_s5 }
  0x46   :  { %130 = dma.hbm_to_vmem [thread:$0]  %s7688_s28, 98304, %s125_s29, [#allocation14], %s6229_s30, %s6229_s30, %s6230_s8  }
  0x47   :  { %p5898_p9 = por %p5897_p8, %p5896_p7 }
  0x49   :  { %p5899_p10 = pnand %p5898_p9, %p5892_p6 }
  0x4b   :  { %5902 = shalt.err (!%p5899_p10)
}
  0x4c   :  { %154 = dma.hbm_to_vmem [thread:$0]  %s7660_s12, 3072, %s149_s0, [#allocation17], %s6229_s30, %s6229_s30, %s6230_s8  }
  0x4d   :  { %s5911_s26 = scalar_lea.vmem %s172_s2, 16  ;;  %s5915_s29 = scalar_lea.vmem %s172_s2, 32 }
  0x4e   :  { %p5912_p11 = scmp.ne.s32.totalorder %s172_s2, %s5911_s26  ;;  %p5916_p12 = scmp.lt.s32.totalorder %s172_s2, %s172_s2 }
  0x4f   :  { %p5917_p13 = scmp.lt.s32.totalorder %s5915_s29, %s5911_s26 }
  0x51   :  { %p5918_p0 = por %p5917_p13, %p5916_p12 }
  0x53   :  { %p5919_p1 = pnand %p5918_p0, %p5912_p11 }
  0x55   :  { %5922 = shalt.err (!%p5919_p1)
}
  0x56   :  { %174 = dma.hbm_to_vmem [thread:$0]  %s7662_s14, 16, %s172_s2, [#allocation20]  }
  0x57   :  { %s6233_s4 = smov [#allocation22]   ;;  %s6234_s9 = smov [#allocation25]  }
  0x58   :  { %s193_s28 = sshll.u32 %s6233_s4, 4  ;;  %s217_s6 = sshll.u32 %s6234_s9, 4  ;;  %s194_s28 = int_to_ptr.vmem [resolvable:$true] %s193_s28  ;;  %s218_s6 = int_to_ptr.vmem [resolvable:$true] %s217_s6 }
  0x59   :  { %s5931_s5 = scalar_lea.vmem %s194_s28, 32  ;;  %p5936_p3 = scmp.lt.s32.totalorder %s194_s28, %s194_s28 }
  0x5a   :  { %p5932_p2 = scmp.ne.s32.totalorder %s194_s28, %s5931_s5  ;;  %p5937_p4 = scmp.lt.s32.totalorder %s5931_s5, %s5931_s5 }
  0x5c   :  { %p5938_p5 = por %p5937_p4, %p5936_p3 }
  0x5e   :  { %p5939_p6 = pnand %p5938_p5, %p5932_p2 }
  0x60   :  { %5942 = shalt.err (!%p5939_p6)
}
  0x61   :  { %196 = dma.hbm_to_vmem [thread:$0]  %s7664_s16, 32, %s194_s28, [#allocation23]  }
  0x62   :  { %s5951_s8 = scalar_lea.vmem %s218_s6, 16  ;;  %s5955_s14 = scalar_lea.vmem %s218_s6, 32 }
  0x63   :  { %p5952_p7 = scmp.ne.s32.totalorder %s218_s6, %s5951_s8  ;;  %p5956_p8 = scmp.lt.s32.totalorder %s218_s6, %s218_s6 }
  0x64   :  { %p5957_p9 = scmp.lt.s32.totalorder %s5955_s14, %s5951_s8 }
  0x66   :  { %p5958_p10 = por %p5957_p9, %p5956_p8 }
  0x68   :  { %p5959_p11 = pnand %p5958_p10, %p5952_p7 }
  0x6a   :  { %5962 = shalt.err (!%p5959_p11)
}
  0x6b   :  { %220 = dma.hbm_to_vmem [thread:$0]  %s7667_s19, 16, %s218_s6, [#allocation26]  }
  0x6c   :  { %s6235_s7 = smov [#allocation28]  }
  0x6d   :  { %s236_s3 = sshll.u32 %s6235_s7, 4  ;;  %s237_s3 = int_to_ptr.vmem [resolvable:$true] %s236_s3 }
  0x6e   :  { %s5971_s26 = scalar_lea.vmem %s237_s3, 4096  ;;  %p5976_p13 = scmp.lt.s32.totalorder %s237_s3, %s237_s3 }
  0x6f   :  { %p5972_p12 = scmp.ne.s32.totalorder %s237_s3, %s5971_s26  ;;  %p5977_p0 = scmp.lt.s32.totalorder %s5971_s26, %s5971_s26 }
  0x71   :  { %p5978_p1 = por %p5977_p0, %p5976_p13 }
  0x73   :  { %p5979_p2 = pnand %p5978_p1, %p5972_p12 }
  0x75   :  { %5982 = shalt.err (!%p5979_p2)
}
  0x76   :  { %s6236_s16 = smov 128   ;;  %s6237_s29 = smov 8  }
  0x77   :  { %242 = dma.hbm_to_vmem [thread:$0]  %s7669_s21, 4096, %s237_s3, [#allocation29], %s6236_s16, %s6236_s16, %s6237_s29  }
  0x78   :  { %s6238_s4 = smov [#allocation2]   ;;  %s6239_s19 = smov [#allocation6]  }
  0x79   :  { %s47_s28 = sshll.u32 %s6238_s4, 4  ;;  %s68_s9 = sshll.u32 %s6239_s19, 4  ;;  %s48_s28 = int_to_ptr.vmem [resolvable:$true] %s47_s28  ;;  %s69_s9 = int_to_ptr.vmem [resolvable:$true] %s68_s9 }
  0x7a   :  { %s5991_s6 = scalar_lea.vmem %s48_s28, 128  ;;  %p5996_p4 = scmp.lt.s32.totalorder %s48_s28, %s48_s28 }
  0x7b   :  { %p5992_p3 = scmp.ne.s32.totalorder %s48_s28, %s5991_s6  ;;  %p5997_p5 = scmp.lt.s32.totalorder %s5991_s6, %s5991_s6 }
  0x7d   :  { %p5998_p6 = por %p5997_p5, %p5996_p4 }
  0x7f   :  { %p5999_p7 = pnand %p5998_p6, %p5992_p3 }
  0x81   :  { %6002 = shalt.err (!%p5999_p7)
}
  0x82   :  { %s7689_s30 = sld [smem:[#allocation44_spill]]  ;;  %s6011_s8 = scalar_lea.vmem %s69_s9, 8192 }
  0x83   :  { %p6012_p8 = scmp.ne.s32.totalorder %s69_s9, %s6011_s8  ;;  %p6016_p9 = scmp.lt.s32.totalorder %s69_s9, %s69_s9 }
  0x84   :  { %p6017_p10 = scmp.lt.s32.totalorder %s6011_s8, %s6011_s8 }
  0x86   :  { %p6018_p11 = por %p6017_p10, %p6016_p9 }
  0x88   :  { %50 = dma.hbm_to_vmem [thread:$0]  %s7689_s30, 128, %s48_s28, [#allocation3]  }
  0x89   :  { %p6019_p12 = pnand %p6018_p11, %p6012_p8 }
  0x8b   :  { %6022 = shalt.err (!%p6019_p12)
}
  0x8c   :  { %s6240_s21 = smov 1024   ;;  %s6241_s14 = smov 64  }
  0x8d   :  { %s7690_s7 = sld [smem:[#allocation47_spill]]  ;;  %s6242_s3 = smov [#allocation9]  }
  0x8e   :  { %s92_s26 = sshll.u32 %s6242_s3, 4  ;;  %s6243_s16 = smov [#allocation12]   ;;  %s93_s26 = int_to_ptr.vmem [resolvable:$true] %s92_s26 }
  0x8f   :  { %s115_s29 = sshll.u32 %s6243_s16, 4  ;;  %s6031_s1 = scalar_lea.vmem %s93_s26, 4096  ;;  %s116_s29 = int_to_ptr.vmem [resolvable:$true] %s115_s29 }
  0x90   :  { %p6032_p13 = scmp.ne.s32.totalorder %s93_s26, %s6031_s1  ;;  %p6036_p0 = scmp.lt.s32.totalorder %s93_s26, %s93_s26 }
  0x91   :  { %p6037_p1 = scmp.lt.s32.totalorder %s6031_s1, %s6031_s1 }
  0x93   :  { %74 = dma.hbm_to_vmem [thread:$0]  %s7690_s7, 8192, %s69_s9, [#allocation5], %s6240_s21, %s6240_s21, %s6241_s14  }
  0x94   :  { %p6038_p2 = por %p6037_p1, %p6036_p0 }
  0x96   :  { %p6039_p3 = pnand %p6038_p2, %p6032_p13 }
  0x98   :  { %6042 = shalt.err (!%p6039_p3)
}
  0x99   :  { %s7691_s28 = sld [smem:[#allocation50_spill]]  ;;  %s6051_s19 = scalar_lea.vmem %s116_s29, 16 }
  0x9a   :  { %p6052_p4 = scmp.ne.s32.totalorder %s116_s29, %s6051_s19  ;;  %s6055_s9 = scalar_lea.vmem %s116_s29, 32 }
  0x9b   :  { %p6056_p5 = scmp.lt.s32.totalorder %s116_s29, %s116_s29  ;;  %p6057_p6 = scmp.lt.s32.totalorder %s6055_s9, %s6051_s19 }
  0x9d   :  { %p6058_p7 = por %p6057_p6, %p6056_p5 }
  0x9f   :  { %98 = dma.hbm_to_vmem [thread:$0]  %s7691_s28, 4096, %s93_s26, [#allocation8], %s6240_s21, %s6240_s21, %s6241_s14  }
  0xa0   :  { %p6059_p8 = pnand %p6058_p7, %p6052_p4 }
  0xa2   :  { %6062 = shalt.err (!%p6059_p8)
}
  0xa3   :  { %s7692_s12 = sld [smem:[#allocation52_spill]]  ;;  %s6244_s30 = smov [#allocation15]  }
  0xa4   :  { %s137_s8 = sshll.u32 %s6244_s30, 4  ;;  %s6245_s0 = smov [#allocation18]   ;;  %s138_s8 = int_to_ptr.vmem [resolvable:$true] %s137_s8 }
  0xa5   :  { %s161_s2 = sshll.u32 %s6245_s0, 4  ;;  %s6071_s7 = scalar_lea.vmem %s138_s8, 96  ;;  %s162_s2 = int_to_ptr.vmem [resolvable:$true] %s161_s2 }
  0xa6   :  { %p6072_p9 = scmp.ne.s32.totalorder %s138_s8, %s6071_s7  ;;  %p6076_p10 = scmp.lt.s32.totalorder %s138_s8, %s138_s8 }
  0xa7   :  { %p6077_p11 = scmp.lt.s32.totalorder %s6071_s7, %s6071_s7 }
  0xa9   :  { %118 = dma.hbm_to_vmem [thread:$0]  %s7692_s12, 16, %s116_s29, [#allocation11]  }
  0xaa   :  { %p6078_p12 = por %p6077_p11, %p6076_p10 }
  0xac   :  { %p6079_p13 = pnand %p6078_p12, %p6072_p9 }
  0xae   :  { %6082 = shalt.err (!%p6079_p13)
}
  0xaf   :  { %140 = dma.hbm_to_vmem [thread:$0]  %s7658_s10, 96, %s138_s8, [#allocation14]  }
  0xb0   :  { %s6091_s3 = scalar_lea.vmem %s162_s2, 16  ;;  %s6095_s26 = scalar_lea.vmem %s162_s2, 32 }
  0xb1   :  { %p6092_p0 = scmp.ne.s32.totalorder %s162_s2, %s6091_s3  ;;  %p6096_p1 = scmp.lt.s32.totalorder %s162_s2, %s162_s2 }
  0xb2   :  { %p6097_p2 = scmp.lt.s32.totalorder %s6095_s26, %s6091_s3 }
  0xb4   :  { %p6098_p3 = por %p6097_p2, %p6096_p1 }
  0xb6   :  { %p6099_p4 = pnand %p6098_p3, %p6092_p0 }
  0xb8   :  { %6102 = shalt.err (!%p6099_p4)
}
  0xb9   :  { %164 = dma.hbm_to_vmem [thread:$0]  %s7661_s13, 16, %s162_s2, [#allocation17]  }
  0xba   :  { %s6246_s1 = smov [#allocation21]  }
  0xbb   :  { %s180_s27 = sshll.u32 %s6246_s1, 4  ;;  %s181_s27 = int_to_ptr.vmem [resolvable:$true] %s180_s27 }
  0xbc   :  { %s6111_s4 = scalar_lea.vmem %s181_s27, 24576  ;;  %p6116_p6 = scmp.lt.s32.totalorder %s181_s27, %s181_s27 }
  0xbd   :  { %p6112_p5 = scmp.ne.s32.totalorder %s181_s27, %s6111_s4  ;;  %p6117_p7 = scmp.lt.s32.totalorder %s6111_s4, %s6111_s4 }
  0xbf   :  { %p6118_p8 = por %p6117_p7, %p6116_p6 }
  0xc1   :  { %p6119_p9 = pnand %p6118_p8, %p6112_p5 }
  0xc3   :  { %6122 = shalt.err (!%p6119_p9)
}
  0xc4   :  { %s6247_s10 = smov 256   ;;  %s6248_s28 = smov 16  }
  0xc5   :  { %186 = dma.hbm_to_vmem [thread:$0]  %s7663_s15, 24576, %s181_s27, [#allocation20], %s6247_s10, %s6247_s10, %s6248_s28  }
  0xc6   :  { %s6249_s6 = smov [#allocation24]   ;;  %s6250_s12 = smov [#allocation27]  }
  0xc7   :  { %s204_s5 = sshll.u32 %s6249_s6, 4  ;;  %s227_s13 = sshll.u32 %s6250_s12, 4  ;;  %s205_s5 = int_to_ptr.vmem [resolvable:$true] %s204_s5  ;;  %s228_s13 = int_to_ptr.vmem [resolvable:$true] %s227_s13 }
  0xc8   :  { %s6131_s30 = scalar_lea.vmem %s205_s5, 512  ;;  %p6136_p11 = scmp.lt.s32.totalorder %s205_s5, %s205_s5 }
  0xc9   :  { %p6132_p10 = scmp.ne.s32.totalorder %s205_s5, %s6131_s30  ;;  %p6137_p12 = scmp.lt.s32.totalorder %s6131_s30, %s6131_s30 }
  0xcb   :  { %p6138_p13 = por %p6137_p12, %p6136_p11 }
  0xcd   :  { %p6139_p0 = pnand %p6138_p13, %p6132_p10 }
  0xcf   :  { %6142 = shalt.err (!%p6139_p0)
}
  0xd0   :  { %210 = dma.hbm_to_vmem [thread:$0]  %s7666_s18, 512, %s205_s5, [#allocation23], %s6247_s10, %s6247_s10, %s6248_s28  }
  0xd1   :  { %s6151_s2 = scalar_lea.vmem %s228_s13, 16  ;;  %s6155_s15 = scalar_lea.vmem %s228_s13, 32 }
  0xd2   :  { %p6152_p1 = scmp.ne.s32.totalorder %s228_s13, %s6151_s2  ;;  %p6156_p2 = scmp.lt.s32.totalorder %s228_s13, %s228_s13 }
  0xd3   :  { %p6157_p3 = scmp.lt.s32.totalorder %s6155_s15, %s6151_s2 }
  0xd5   :  { %p6158_p4 = por %p6157_p3, %p6156_p2 }
  0xd7   :  { %p6159_p5 = pnand %p6158_p4, %p6152_p1 }
  0xd9   :  { %6162 = shalt.err (!%p6159_p5)
}
  0xda   :  { %230 = dma.hbm_to_vmem [thread:$0]  %s7668_s20, 16, %s228_s13, [#allocation26]  }
  0xdb   :  { %s6251_s14 = smov [#allocation30]   ;;  %s6252_s26 = smov [#allocation31]  }
  0xdc   :  { %s249_s3 = sshll.u32 %s6251_s14, 4  ;;  %s261_s16 = sshll.u32 %s6252_s26, 4  ;;  %s250_s3 = int_to_ptr.vmem [resolvable:$true] %s249_s3  ;;  %s262_s16 = int_to_ptr.vmem [resolvable:$true] %s261_s16 }
  0xdd   :  { %s6171_s29 = scalar_lea.vmem %s250_s3, 16  ;;  %s6175_s18 = scalar_lea.vmem %s250_s3, 32 }
  0xde   :  { %p6172_p6 = scmp.ne.s32.totalorder %s250_s3, %s6171_s29  ;;  %p6176_p7 = scmp.lt.s32.totalorder %s250_s3, %s250_s3 }
  0xdf   :  { %p6177_p8 = scmp.lt.s32.totalorder %s6175_s18, %s6171_s29 }
  0xe1   :  { %p6178_p9 = por %p6177_p8, %p6176_p7 }
  0xe3   :  { %p6179_p10 = pnand %p6178_p9, %p6172_p6 }
  0xe5   :  { %6182 = shalt.err (!%p6179_p10)
}
  0xe6   :  { %252 = dma.hbm_to_vmem [thread:$0]  %s7670_s22, 16, %s250_s3, [#allocation29]  }
  0xe7   :  { %s6191_s4 = scalar_lea.vmem %s262_s16, 16  ;;  %s6195_s20 = scalar_lea.vmem %s262_s16, 32 }
  0xe8   :  { %p6192_p11 = scmp.ne.s32.totalorder %s262_s16, %s6191_s4  ;;  %p6196_p12 = scmp.lt.s32.totalorder %s262_s16, %s262_s16 }
  0xe9   :  { %p6197_p13 = scmp.lt.s32.totalorder %s6195_s20, %s6191_s4 }
  0xeb   :  { %p6198_p0 = por %p6197_p13, %p6196_p12 }
  0xed   :  { %p6199_p1 = pnand %p6198_p0, %p6192_p11 }
  0xef   :  { %6202 = shalt.err (!%p6199_p1)
}
  0xf0   :  { %264 = dma.hbm_to_vmem [thread:$0]  %s7672_s24, 16, %s262_s16, [#allocation32]  }
  0xf1   :  { %6203 = dma.done.wait [#allocation3], 128  }
  0xf2   :  { %6204 = vsyncadd [#allocation3], 4294967168 }
  0xf3   :  { %6205 = dma.done.wait [#allocation5], 8224  }
  0xf4   :  { %6206 = vsyncadd [#allocation5], 4294959072 }
  0xf5   :  { %6207 = dma.done.wait [#allocation8], 4224  }
  0xf6   :  { %6208 = vsyncadd [#allocation8], 4294963072 }
  0xf7   :  { %6209 = dma.done.wait [#allocation11], 32  }
  0xf8   :  { %6210 = vsyncadd [#allocation11], 4294967264 }
  0xf9   :  { %6211 = dma.done.wait [#allocation14], 98400  }
  0xfa   :  { %6212 = vsyncadd [#allocation14], 4294868896 }
  0xfb   :  { %6213 = dma.done.wait [#allocation17], 3088  }
  0xfc   :  { %6214 = vsyncadd [#allocation17], 4294964208 }
  0xfd   :  { %6215 = dma.done.wait [#allocation20], 24592  }
  0xfe   :  { %6216 = vsyncadd [#allocation20], 4294942704 }
  0xff   :  { %6217 = dma.done.wait [#allocation23], 544  }
 0x100   :  { %6218 = vsyncadd [#allocation23], 4294966752 }
 0x101   :  { %6219 = dma.done.wait [#allocation26], 32  }
 0x102   :  { %6220 = vsyncadd [#allocation26], 4294967264 }
 0x103   :  { %6221 = dma.done.wait [#allocation29], 4112  }
 0x104   :  { %6222 = vsyncadd [#allocation29], 4294963184 }
 0x105   :  { %6223 = dma.done.wait [#allocation32], 16  }
 0x106   :  { %6224 = vsyncadd [#allocation32], 4294967280  ;;  %v6253_v0 = vmov 0.0   ;;  %vm6254_vm0 = vmmov 0   ;;  %vm327_vm1 = vcmask 64512   ;;  %v6455_v1 = vld [vmem:[#allocation2] sm:$0xff] }
 0x107   :  { %5691 = vmatprep.subr.mxu0 %v6253_v0  ;;  %5693 = vmatprep.mubr.msk.f32.mxu0 %vm6254_vm0, %v6253_v0  ;;  %v326_v2 = vld [vmem:[#allocation4] sm:$0x3]  ;;  %v401_v3 = vmul.f32 %v6455_v1, %v6455_v1  ;;  %vm482_vm2 = vcmask 1041408   ;;  %s7693_s19 = sld [smem:[#allocation46_spill]]  ;;  %vm478_vm3 = vcmask 15360   ;;  %v689_v13 = vld [vmem:[#allocation6 + $0x1c8] sm:$0xff] }
 0x108   :  { %5696 = vmatprep.subr.mxu1 %v6253_v0  ;;  %5698 = vmatprep.mubr.msk.f32.mxu1 %vm6254_vm0, %v6253_v0  ;;  %v688_v15 = vld [vmem:[#allocation6 + $0x1c0] sm:$0xff]  ;;  %v691_v17 = vld [vmem:[#allocation6 + $0x1d8] sm:$0xff]  ;;  %v690_v18 = vld [vmem:[#allocation6 + $0x1d0] sm:$0xff]  ;;  %vm738_vm4 = vcmask 523264   ;;  %s7694_s5 = sld [smem:[#allocation49_spill]]  ;;  %vm1292_vm5 = vcmask 1040384  }
 0x109   :  { %5692 = vmatpush3.msra.mxu0 %v6455_v1  ;;  %5697 = vmatpush3.msra.mxu1 %v401_v3  ;;  %v681_v19 = vld [vmem:[#allocation6 + $0x188] sm:$0xff]  ;;  %v683_v20 = vld [vmem:[#allocation6 + $0x198] sm:$0xff]  ;;  %v680_v21 = vld [vmem:[#allocation6 + $0x180] sm:$0xff]  ;;  %vm1617_vm6 = vcmask 261120   ;;  %vm4954_vm7 = vcmask 130048   ;;  %s6256_s0 = smov 3  }
 0x10a   :  { %5694 = vmatmul.mubr.msk.f32.vlgmr.msra.gmra.mxu0 %vm327_vm1, %v326_v2  ;;  %5701 = vmatprep.subr.mxu0 %v6253_v0  ;;  %v682_v22 = vld [vmem:[#allocation6 + $0x190] sm:$0xff]  ;;  %v673_v23 = vld [vmem:[#allocation6 + $0x148] sm:$0xff]  ;;  %v675_v24 = vld [vmem:[#allocation6 + $0x158] sm:$0xff]  ;;  %s6257_s2 = smov 1   ;;  %s6258_s3 = smov 2  }
 0x10b   :  { %5703 = vmatprep.mubr.msk.f32.mxu0 %vm6254_vm0, %v6253_v0  ;;  %5699 = vmatmul.mubr.msk.f32.vlgmr.msra.gmra.mxu1 %vm327_vm1, %v326_v2  ;;  %v672_v25 = vld [vmem:[#allocation6 + $0x140] sm:$0xff]  ;;  %v674_v26 = vld [vmem:[#allocation6 + $0x150] sm:$0xff]  ;;  %v665_v27 = vld [vmem:[#allocation6 + $0x108] sm:$0xff] }
 0x10c   :  { %5706 = vmatprep.subr.mxu1 %v6253_v0  ;;  %5708 = vmatprep.mubr.msk.f32.mxu1 %vm6254_vm0, %v6253_v0  ;;  %v667_v28 = vld [vmem:[#allocation6 + $0x118] sm:$0xff]  ;;  %v664_v29 = vld [vmem:[#allocation6 + $0x100] sm:$0xff]  ;;  %v666_v30 = vld [vmem:[#allocation6 + $0x110] sm:$0xff] }
 0x10d   :  { %v477_v12 = vld [vmem:[%s7693_s19] sm:$0xff]  ;;  %v657_v31 = vld [vmem:[#allocation6 + $0xc8] sm:$0xff]  ;;  %v656_v33 = vld [vmem:[#allocation6 + $0xc0] sm:$0xff] }
 0x10e   :  { %v659_v32 = vld [vmem:[#allocation6 + $0xd8] sm:$0xff]  ;;  %v658_v34 = vld [vmem:[#allocation6 + $0xd0] sm:$0xff]  ;;  %v649_v35 = vld [vmem:[#allocation6 + $0x88] sm:$0xff] }
 0x10f   :  { %v651_v36 = vld [vmem:[#allocation6 + $0x98] sm:$0xff]  ;;  %v648_v37 = vld [vmem:[#allocation6 + $0x80] sm:$0xff]  ;;  %v650_v38 = vld [vmem:[#allocation6 + $0x90] sm:$0xff] }
 0x110   :  { %v641_v39 = vld [vmem:[#allocation6 + $0x48] sm:$0xff]  ;;  %v643_v40 = vld [vmem:[#allocation6 + $0x58] sm:$0xff]  ;;  %v640_v41 = vld [vmem:[#allocation6 + $0x40] sm:$0xff] }
 0x111   :  { %v642_v42 = vld [vmem:[#allocation6 + $0x50] sm:$0xff]  ;;  %v633_v43 = vld [vmem:[#allocation6 + $0x8] sm:$0xff]  ;;  %v635_v44 = vld [vmem:[#allocation6 + $0x18] sm:$0xff] }
 0x112   :  { %v632_v45 = vld [vmem:[#allocation6] sm:$0xff]  ;;  %v634_v46 = vld [vmem:[#allocation6 + $0x10] sm:$0xff]  ;;  %v693_v47 = vld [vmem:[#allocation6 + $0x1e8] sm:$0xff] }
 0x113   :  { %v695_v48 = vld [vmem:[#allocation6 + $0x1f8] sm:$0xff]  ;;  %v692_v54 = vld [vmem:[#allocation6 + $0x1e0] sm:$0xff]  ;;  %v694_v55 = vld [vmem:[#allocation6 + $0x1f0] sm:$0xff] }
 0x114   :  { %v685_v57 = vld [vmem:[#allocation6 + $0x1a8] sm:$0xff]  ;;  %v687_v58 = vld [vmem:[#allocation6 + $0x1b8] sm:$0xff]  ;;  %v684_v59 = vld [vmem:[#allocation6 + $0x1a0] sm:$0xff] }
 0x115   :  { %v686_v60 = vld [vmem:[#allocation6 + $0x1b0] sm:$0xff]  ;;  %v677_v61 = vld [vmem:[#allocation6 + $0x168] sm:$0xff]  ;;  %v679_v62 = vld [vmem:[#allocation6 + $0x178] sm:$0xff] }
 0x116   :  { %v676_v63 = vld [vmem:[#allocation6 + $0x160] sm:$0xff]  ;;  %v669_v2 = vld [vmem:[#allocation6 + $0x128] sm:$0xff]  ;;  %v671_v3 = vld [vmem:[#allocation6 + $0x138] sm:$0xff] }
 0x1ca   :  { %v397_v4 = vpop.f32.mrf.mxu0 }
 0x1cb   :  { %v472_v5 = vmul.f32 %v397_v4, %v397_v4  ;;  %v468_v7 = vpop.f32.mrf.mxu1 }
 0x1cc   :  { %v5695_v6 = vpop.f32.mrf.mxu0 }
 0x1cd   :  { %v473_v8 = vsub.f32 %v468_v7, %v472_v5  ;;  %v5700_v9 = vpop.f32.mrf.mxu1  ;;  %v670_v5 = vld [vmem:[#allocation6 + $0x130] sm:$0xff]  ;;  %v661_v6 = vld [vmem:[#allocation6 + $0xe8] sm:$0xff]  ;;  %v663_v7 = vld [vmem:[#allocation6 + $0xf8] sm:$0xff] }
 0x1ce   :  { %v662_v9 = vld [vmem:[#allocation6 + $0xf0] sm:$0xff] }
 0x1cf   :  { %v474_v10 = vmax.f32 %v473_v8, 0.0  ;;  %v660_v8 = vld [vmem:[#allocation6 + $0xe0] sm:$0xff] }
 0x1d1   :  { %v475_v11 = vadd.f32 1e-05, %v474_v10  ;;  %v653_v10 = vld [vmem:[#allocation6 + $0xa8] sm:$0xff] }
 0x1d3   :  { %5795 = vrsqrt.f32 %v475_v11  ;;  %v655_v11 = vld [vmem:[#allocation6 + $0xb8] sm:$0xff] }
 0x1e0   :  { %v5796_v14 = vpop.eup %5795 }
 0x1e1   :  { %5702 = vmatpush3.msk.msra.mxu0 %vm482_vm2, %v5796_v14  ;;  %v556_v16 = vmul.f32 %v5796_v14, %v397_v4  ;;  %v668_v4 = vld [vmem:[#allocation6 + $0x120] sm:$0xff]  ;;  %v645_v14 = vld [vmem:[#allocation6 + $0x68] sm:$0xff] }
 0x1e2   :  { %5704 = vmatmul.mubr.msk.f32.vlgmr.msra.gmra.mxu0 %vm478_vm3, %v477_v12  ;;  %758 = vmatprep.subr.mxu0 %v689_v13  ;;  %v654_v13 = vld [vmem:[#allocation6 + $0xb0] sm:$0xff] }
 0x1e3   :  { %5707 = vmatpush3.msk.msra.mxu1 %vm482_vm2, %v556_v16  ;;  %759 = vmatpush1.msra.mxu0 %v688_v15  ;;  %v647_v15 = vld [vmem:[#allocation6 + $0x78] sm:$0xff]  ;;  %v644_v16 = vld [vmem:[#allocation6 + $0x60] sm:$0xff] }
 0x1e4   :  { %5709 = vmatmul.mubr.msk.f32.vlgmr.msra.gmra.mxu1 %vm478_vm3, %v477_v12  ;;  %829 = vmatprep.subr.mxu1 %v691_v17  ;;  %v652_v12 = vld [vmem:[#allocation6 + $0xa0] sm:$0xff]  ;;  %v646_v17 = vld [vmem:[#allocation6 + $0x70] sm:$0xff] }
 0x1e5   :  { %830 = vmatpush1.msra.mxu1 %v690_v18  ;;  %760 = vmatprep.subr.mxu0 %v681_v19  ;;  %v637_v18 = vld [vmem:[#allocation6 + $0x28] sm:$0xff]  ;;  %v639_v19 = vld [vmem:[#allocation6 + $0x38] sm:$0xff] }
 0x1e6   :  { %831 = vmatprep.subr.mxu1 %v683_v20  ;;  %761 = vmatpush1.msra.mxu0 %v680_v21  ;;  %v636_v20 = vld [vmem:[#allocation6 + $0x20] sm:$0xff]  ;;  %v638_v21 = vld [vmem:[#allocation6 + $0x30] sm:$0xff] }
 0x1e7   :  { %832 = vmatpush1.msra.mxu1 %v682_v22  ;;  %762 = vmatprep.subr.mxu0 %v673_v23  ;;  %v1057_v22 = vld [vmem:[%s7694_s5 + $0xf8] sm:$0xff] }
 0x1e8   :  { %833 = vmatprep.subr.mxu1 %v675_v24  ;;  %763 = vmatpush1.msra.mxu0 %v672_v25  ;;  %v1089_v23 = vld [vmem:[%s7694_s5 + $0x1f8] sm:$0xff] }
 0x1e9   :  { %834 = vmatpush1.msra.mxu1 %v674_v26  ;;  %764 = vmatprep.subr.mxu0 %v665_v27  ;;  %v1041_v24 = vld [vmem:[%s7694_s5 + $0x78] sm:$0xff]  ;;  %v1056_v26 = vld [vmem:[%s7694_s5 + $0xf0] sm:$0xff] }
 0x1ea   :  { %835 = vmatprep.subr.mxu1 %v667_v28  ;;  %765 = vmatpush1.msra.mxu0 %v664_v29  ;;  %v1073_v25 = vld [vmem:[%s7694_s5 + $0x178] sm:$0xff]  ;;  %v1088_v27 = vld [vmem:[%s7694_s5 + $0x1f0] sm:$0xff] }
 0x1eb   :  { %836 = vmatpush1.msra.mxu1 %v666_v30  ;;  %766 = vmatprep.subr.mxu0 %v657_v31  ;;  %v1040_v28 = vld [vmem:[%s7694_s5 + $0x70] sm:$0xff]  ;;  %v1055_v30 = vld [vmem:[%s7694_s5 + $0xe8] sm:$0xff] }
 0x1ec   :  { %837 = vmatprep.subr.mxu1 %v659_v32  ;;  %767 = vmatpush1.msra.mxu0 %v656_v33  ;;  %v1072_v29 = vld [vmem:[%s7694_s5 + $0x170] sm:$0xff]  ;;  %v1087_v31 = vld [vmem:[%s7694_s5 + $0x1e8] sm:$0xff] }
 0x1ed   :  { %838 = vmatpush1.msra.mxu1 %v658_v34  ;;  %768 = vmatprep.subr.mxu0 %v649_v35  ;;  %v1039_v32 = vld [vmem:[%s7694_s5 + $0x68] sm:$0xff]  ;;  %v1054_v34 = vld [vmem:[%s7694_s5 + $0xe0] sm:$0xff] }
 0x1ee   :  { %839 = vmatprep.subr.mxu1 %v651_v36  ;;  %769 = vmatpush1.msra.mxu0 %v648_v37  ;;  %v1071_v33 = vld [vmem:[%s7694_s5 + $0x168] sm:$0xff]  ;;  %v1086_v35 = vld [vmem:[%s7694_s5 + $0x1e0] sm:$0xff] }
 0x1ef   :  { %840 = vmatpush1.msra.mxu1 %v650_v38  ;;  %806 = vmatprep.mubr.f32.mxu0 %v6253_v0  ;;  %v1038_v36 = vld [vmem:[%s7694_s5 + $0x60] sm:$0xff]  ;;  %v1053_v38 = vld [vmem:[%s7694_s5 + $0xd8] sm:$0xff] }
 0x1f0   :  { %877 = vmatprep.mubr.f32.mxu1 %v6253_v0  ;;  %770 = vmatprep.subr.mxu0 %v641_v39  ;;  %v1070_v37 = vld [vmem:[%s7694_s5 + $0x160] sm:$0xff]  ;;  %v1085_v39 = vld [vmem:[%s7694_s5 + $0x1d8] sm:$0xff] }
 0x1f1   :  { %841 = vmatprep.subr.mxu1 %v643_v40  ;;  %771 = vmatpush1.msra.mxu0 %v640_v41  ;;  %v1037_v40 = vld [vmem:[%s7694_s5 + $0x58] sm:$0xff] }
 0x1f2   :  { %842 = vmatpush1.msra.mxu1 %v642_v42  ;;  %772 = vmatprep.subr.mxu0 %v633_v43  ;;  %v1069_v41 = vld [vmem:[%s7694_s5 + $0x158] sm:$0xff]  ;;  %v1052_v42 = vld [vmem:[%s7694_s5 + $0xd0] sm:$0xff] }
 0x1f3   :  { %843 = vmatprep.subr.mxu1 %v635_v44  ;;  %773 = vmatpush1.msra.mxu0 %v632_v45  ;;  %v1084_v43 = vld [vmem:[%s7694_s5 + $0x1d0] sm:$0xff] }
 0x1f4   :  { %844 = vmatpush1.msra.mxu1 %v634_v46  ;;  %900 = vmatprep.subr.mxu0 %v693_v47  ;;  %v1036_v44 = vld [vmem:[%s7694_s5 + $0x50] sm:$0xff]  ;;  %v1051_v46 = vld [vmem:[%s7694_s5 + $0xc8] sm:$0xff] }
 0x1f5   :  { %971 = vmatprep.subr.mxu1 %v695_v48  ;;  %v1068_v45 = vld [vmem:[%s7694_s5 + $0x150] sm:$0xff]  ;;  %v1083_v47 = vld [vmem:[%s7694_s5 + $0x1c8] sm:$0xff] }
 0x1f6   :  { %v1035_v48 = vld [vmem:[%s7694_s5 + $0x48] sm:$0xff] }
 0x2a2   :  { %v552_v49 = vpop.f32.mrf.mxu0 }
 0x2a3   :  { %v630_v50 = vmul.f32 %v552_v49, %v6455_v1  ;;  %v678_v1 = vld [vmem:[#allocation6 + $0x170] sm:$0xff]  ;;  %v1067_v49 = vld [vmem:[%s7694_s5 + $0x148] sm:$0xff] }
 0x2a4   :  { %v626_v51 = vpop.f32.mrf.mxu1  ;;  %v5705_v52 = vpop.f32.mrf.mxu0 }
 0x2a5   :  { %v6474_v53 = vsub.f32 %v630_v50, %v626_v51  ;;  %v1050_v50 = vld [vmem:[%s7694_s5 + $0xc0] sm:$0xff] }
 0x2a6   :  { %v5710_v56 = vpop.f32.mrf.mxu1  ;;  %v1082_v51 = vld [vmem:[%s7694_s5 + $0x1c0] sm:$0xff] }
 0x2a7   :  { %5337 = vmatmul.mubr.msk.f32.vlgmr.msra.gmra.mxu0 %vm738_vm4, %v6474_v53  ;;  %5338 = vmatmul.mubr.msk.f32.vlgmr.msra.gmra.mxu1 %vm738_vm4, %v6474_v53  ;;  %v1034_v52 = vld [vmem:[%s7694_s5 + $0x40] sm:$0xff]  ;;  %v1033_v56 = vld [vmem:[%s7694_s5 + $0x38] sm:$0xff] }
 0x2a8   :  { %901 = vmatpush1.msra.mxu0 %v692_v54  ;;  %972 = vmatpush1.msra.mxu1 %v694_v55  ;;  %v1049_v54 = vld [vmem:[%s7694_s5 + $0xb8] sm:$0xff] }
 0x2a9   :  { %902 = vmatprep.subr.mxu0 %v685_v57  ;;  %973 = vmatprep.subr.mxu1 %v687_v58  ;;  %v1081_v55 = vld [vmem:[%s7694_s5 + $0x1b8] sm:$0xff]  ;;  %v1048_v58 = vld [vmem:[%s7694_s5 + $0xb0] sm:$0xff] }
 0x2aa   :  { %903 = vmatpush1.msra.mxu0 %v684_v59  ;;  %974 = vmatpush1.msra.mxu1 %v686_v60  ;;  %v1065_v57 = vld [vmem:[%s7694_s5 + $0x138] sm:$0xff]  ;;  %v1080_v59 = vld [vmem:[%s7694_s5 + $0x1b0] sm:$0xff] }
 0x2ab   :  { %904 = vmatprep.subr.mxu0 %v677_v61  ;;  %975 = vmatprep.subr.mxu1 %v679_v62  ;;  %v1032_v60 = vld [vmem:[%s7694_s5 + $0x30] sm:$0xff]  ;;  %v1047_v62 = vld [vmem:[%s7694_s5 + $0xa8] sm:$0xff] }
 0x2ac   :  { %905 = vmatpush1.msra.mxu0 %v676_v63  ;;  %976 = vmatpush1.msra.mxu1 %v678_v1  ;;  %v1064_v61 = vld [vmem:[%s7694_s5 + $0x130] sm:$0xff]  ;;  %v1079_v63 = vld [vmem:[%s7694_s5 + $0x1a8] sm:$0xff] }
 0x2ad   :  { %906 = vmatprep.subr.mxu0 %v669_v2  ;;  %977 = vmatprep.subr.mxu1 %v671_v3  ;;  %v1031_v1 = vld [vmem:[%s7694_s5 + $0x28] sm:$0xff]  ;;  %v1046_v3 = vld [vmem:[%s7694_s5 + $0xa0] sm:$0xff] }
 0x2ae   :  { %907 = vmatpush1.msra.mxu0 %v668_v4  ;;  %978 = vmatpush1.msra.mxu1 %v670_v5  ;;  %v1063_v2 = vld [vmem:[%s7694_s5 + $0x128] sm:$0xff]  ;;  %v1078_v4 = vld [vmem:[%s7694_s5 + $0x1a0] sm:$0xff] }
 0x2af   :  { %908 = vmatprep.subr.mxu0 %v661_v6  ;;  %979 = vmatprep.subr.mxu1 %v663_v7  ;;  %v1030_v5 = vld [vmem:[%s7694_s5 + $0x20] sm:$0xff]  ;;  %v1045_v7 = vld [vmem:[%s7694_s5 + $0x98] sm:$0xff] }
 0x2b0   :  { %909 = vmatpush1.msra.mxu0 %v660_v8  ;;  %980 = vmatpush1.msra.mxu1 %v662_v9  ;;  %v1062_v6 = vld [vmem:[%s7694_s5 + $0x120] sm:$0xff]  ;;  %v1077_v8 = vld [vmem:[%s7694_s5 + $0x198] sm:$0xff] }
 0x2b1   :  { %910 = vmatprep.subr.mxu0 %v653_v10  ;;  %981 = vmatprep.subr.mxu1 %v655_v11  ;;  %v1029_v9 = vld [vmem:[%s7694_s5 + $0x18] sm:$0xff]  ;;  %v1044_v11 = vld [vmem:[%s7694_s5 + $0x90] sm:$0xff] }
 0x2b2   :  { %911 = vmatpush1.msra.mxu0 %v652_v12  ;;  %982 = vmatpush1.msra.mxu1 %v654_v13  ;;  %v1061_v10 = vld [vmem:[%s7694_s5 + $0x118] sm:$0xff]  ;;  %v1076_v12 = vld [vmem:[%s7694_s5 + $0x190] sm:$0xff] }
 0x2b3   :  { %912 = vmatprep.subr.mxu0 %v645_v14  ;;  %983 = vmatprep.subr.mxu1 %v647_v15  ;;  %v1028_v13 = vld [vmem:[%s7694_s5 + $0x10] sm:$0xff]  ;;  %v1043_v15 = vld [vmem:[%s7694_s5 + $0x88] sm:$0xff] }
 0x2b4   :  { %913 = vmatpush1.msra.mxu0 %v644_v16  ;;  %984 = vmatpush1.msra.mxu1 %v646_v17  ;;  %v1060_v14 = vld [vmem:[%s7694_s5 + $0x110] sm:$0xff]  ;;  %v1075_v16 = vld [vmem:[%s7694_s5 + $0x188] sm:$0xff] }
 0x2b5   :  { %914 = vmatprep.subr.mxu0 %v637_v18  ;;  %985 = vmatprep.subr.mxu1 %v639_v19  ;;  %v1027_v17 = vld [vmem:[%s7694_s5 + $0x8] sm:$0xff]  ;;  %v1042_v19 = vld [vmem:[%s7694_s5 + $0x80] sm:$0xff] }
 0x2b6   :  { %915 = vmatpush1.msra.mxu0 %v636_v20  ;;  %948 = vmatprep.mubr.f32.mxu0 %v6253_v0  ;;  %v1059_v18 = vld [vmem:[%s7694_s5 + $0x108] sm:$0xff]  ;;  %v1074_v20 = vld [vmem:[%s7694_s5 + $0x180] sm:$0xff] }
 0x2b7   :  { %986 = vmatpush1.msra.mxu1 %v638_v21  ;;  %1019 = vmatprep.mubr.f32.mxu1 %v6253_v0  ;;  %v1026_v21 = vld [vmem:[%s7694_s5] sm:$0xff] }
 0x2b8   :  { %5339 = vmatmul.mubr.msk.f32.vlgmr.msra.gmra.mxu0 %vm738_vm4, %v6474_v53  ;;  %5340 = vmatmul.mubr.msk.f32.vlgmr.msra.gmra.mxu1 %vm738_vm4, %v6474_v53  ;;  %v1066_v53 = vld [vmem:[%s7694_s5 + $0x140] sm:$0xff] }
 0x2b9   :  { %5359 = vmatprep.subr.mxu0 %v1057_v22  ;;  %5394 = vmatprep.subr.mxu1 %v1089_v23  ;;  %v1058_v22 = vld [vmem:[%s7694_s5 + $0x100] sm:$0xff]  ;;  %v1121_v23 = vld [vmem:[%s7694_s5 + $0x2f8] sm:$0xff] }
 0x2ba   :  { %5360 = vmatpush3.msra.mxu0 %v1041_v24  ;;  %5395 = vmatpush3.msra.mxu1 %v1073_v25  ;;  %v1153_v24 = vld [vmem:[%s7694_s5 + $0x3f8] sm:$0xff]  ;;  %v698_v25 = vlaneseq }
 0x2bb   :  { %5361 = vmatprep.subr.mxu0 %v1056_v26  ;;  %5396 = vmatprep.subr.mxu1 %v1088_v27 }
 0x2bc   :  { %5362 = vmatpush3.msra.mxu0 %v1040_v28  ;;  %5397 = vmatpush3.msra.mxu1 %v1072_v29  ;;  %v6685_v26 = vshrl.u32 %v698_v25, 7  ;;  %v6691_v29 = vld [vmem:[#allocation7] sm:$0xff] }
 0x2bd   :  { %5363 = vmatprep.subr.mxu0 %v1055_v30  ;;  %5398 = vmatprep.subr.mxu1 %v1087_v31 }
 0x2be   :  { %5364 = vmatpush3.msra.mxu0 %v1039_v32  ;;  %5399 = vmatpush3.msra.mxu1 %v1071_v33  ;;  %v6688_v27 = vsub.s32 0, %v6685_v26  ;;  %v708_v28 = vsub.s32 2, %v6685_v26  ;;  %v6694_v30 = vsub.s32 1, %v6685_v26  ;;  %v712_v31 = vsub.s32 3, %v6685_v26 }
 0x2bf   :  { %5365 = vmatprep.subr.mxu0 %v1054_v34  ;;  %5400 = vmatprep.subr.mxu1 %v1086_v35 }
 0x2c0   :  { %5366 = vmatpush3.msra.mxu0 %v1038_v36  ;;  %5401 = vmatpush3.msra.mxu1 %v1070_v37  ;;  %v701_v32 = vrot.slane %v6691_v29, %v6688_v27  ;;  %v709_v33 = vrot.slane %v6691_v29, %v708_v28  ;;  %v705_v36 = vrot.slane %v6691_v29, %v6694_v30 }
 0x2c1   :  { %5367 = vmatprep.subr.mxu0 %v1053_v38  ;;  %5402 = vmatprep.subr.mxu1 %v1085_v39  ;;  %v713_v37 = vrot.slane %v6691_v29, %v712_v31 }
 0x2c2   :  { %5368 = vmatpush3.msra.mxu0 %v1037_v40  ;;  %5403 = vmatpush3.msra.mxu1 %v1069_v41 }
 0x2c3   :  { %5369 = vmatprep.subr.mxu0 %v1052_v42  ;;  %5404 = vmatprep.subr.mxu1 %v1084_v43 }
 0x2c4   :  { %5370 = vmatpush3.msra.mxu0 %v1036_v44  ;;  %5405 = vmatpush3.msra.mxu1 %v1068_v45 }
 0x2c5   :  { %5371 = vmatprep.subr.mxu0 %v1051_v46  ;;  %5406 = vmatprep.subr.mxu1 %v1083_v47 }
 0x2c6   :  { %5372 = vmatpush3.msra.mxu0 %v1035_v48  ;;  %5407 = vmatpush3.msra.mxu1 %v1067_v49 }
 0x2c7   :  { %5373 = vmatprep.subr.mxu0 %v1050_v50  ;;  %5408 = vmatprep.subr.mxu1 %v1082_v51 }
 0x2c8   :  { %5374 = vmatpush3.msra.mxu0 %v1034_v52  ;;  %5409 = vmatpush3.msra.mxu1 %v1066_v53 }
 0x2c9   :  { %5375 = vmatprep.subr.mxu0 %v1049_v54  ;;  %5410 = vmatprep.subr.mxu1 %v1081_v55 }
 0x2ca   :  { %5376 = vmatpush3.msra.mxu0 %v1033_v56  ;;  %5411 = vmatpush3.msra.mxu1 %v1065_v57 }
 0x2cb   :  { %5377 = vmatprep.subr.mxu0 %v1048_v58  ;;  %5412 = vmatprep.subr.mxu1 %v1080_v59 }
 0x2cc   :  { %5378 = vmatpush3.msra.mxu0 %v1032_v60  ;;  %5413 = vmatpush3.msra.mxu1 %v1064_v61 }
 0x2cd   :  { %5379 = vmatprep.subr.mxu0 %v1047_v62  ;;  %5414 = vmatprep.subr.mxu1 %v1079_v63 }
 0x2ce   :  { %5380 = vmatpush3.msra.mxu0 %v1031_v1  ;;  %5415 = vmatpush3.msra.mxu1 %v1063_v2 }
 0x2cf   :  { %5381 = vmatprep.subr.mxu0 %v1046_v3  ;;  %5416 = vmatprep.subr.mxu1 %v1078_v4 }
 0x2d0   :  { %5382 = vmatpush3.msra.mxu0 %v1030_v5  ;;  %5417 = vmatpush3.msra.mxu1 %v1062_v6 }
 0x2d1   :  { %5383 = vmatprep.subr.mxu0 %v1045_v7  ;;  %5418 = vmatprep.subr.mxu1 %v1077_v8  ;;  %v716_v8 = vsub.s32 4, %v6685_v26 }
 0x2d2   :  { %5384 = vmatpush3.msra.mxu0 %v1029_v9  ;;  %5419 = vmatpush3.msra.mxu1 %v1061_v10 }
 0x2d3   :  { %5385 = vmatprep.subr.mxu0 %v1044_v11  ;;  %5420 = vmatprep.subr.mxu1 %v1076_v12 }
 0x2d4   :  { %5386 = vmatpush3.msra.mxu0 %v1028_v13  ;;  %5421 = vmatpush3.msra.mxu1 %v1060_v14 }
 0x2d5   :  { %5387 = vmatprep.subr.mxu0 %v1043_v15  ;;  %5422 = vmatprep.subr.mxu1 %v1075_v16  ;;  %v724_v16 = vsub.s32 6, %v6685_v26 }
 0x2d6   :  { %5388 = vmatpush3.msra.mxu0 %v1027_v17  ;;  %5423 = vmatpush3.msra.mxu1 %v1059_v18  ;;  %v720_v17 = vsub.s32 5, %v6685_v26  ;;  %v728_v18 = vsub.s32 7, %v6685_v26 }
 0x2d7   :  { %5389 = vmatprep.subr.mxu0 %v1042_v19  ;;  %5424 = vmatprep.subr.mxu1 %v1074_v20 }
 0x2d8   :  { %5390 = vmatpush3.msra.mxu0 %v1026_v21  ;;  %5425 = vmatpush3.msra.mxu1 %v1058_v22 }
 0x2d9   :  { %5429 = vmatprep.subr.mxu0 %v1121_v23  ;;  %5464 = vmatprep.subr.mxu1 %v1153_v24  ;;  %v717_v24 = vrot.slane %v6691_v29, %v716_v8 }
 0x367   :  { %v808_v34 = vpop.f32.mrf.mxu0  ;;  %v879_v35 = vpop.f32.mrf.mxu1 }
 0x368   :  { %v6707_v38 = vadd.f32 %v808_v34, %v701_v32  ;;  %v6709_v39 = vadd.f32 %v879_v35, %v709_v33 }
 0x369   :  { %v810_v40 = vpop.f32.mrf.mxu0  ;;  %v881_v41 = vpop.f32.mrf.mxu1 }
 0x36a   :  { %v1188_v42 = vrot.slane %v6707_v38, 4  ;;  %v1236_v43 = vmul.f32 %v6707_v38, %v6707_v38  ;;  %v1200_v44 = vrot.slane %v6709_v39, 4  ;;  %v1238_v45 = vmul.f32 %v6709_v39, %v6709_v39 }
 0x36b   :  { %v6717_v46 = vadd.f32 %v810_v40, %v705_v36  ;;  %v6719_v47 = vadd.f32 %v881_v41, %v713_v37  ;;  %v725_v41 = vrot.slane %v6691_v29, %v724_v16 }
 0x36c   :  { %v1189_v48 = vadd.f32 %v1188_v42, %v6707_v38  ;;  %v1244_v49 = vrot.slane %v1236_v43, 4  ;;  %v1201_v50 = vadd.f32 %v1200_v44, %v6709_v39  ;;  %v1256_v51 = vrot.slane %v1238_v45, 4 }
 0x36d   :  { %v1194_v52 = vrot.slane %v6717_v46, 4  ;;  %v1237_v53 = vmul.f32 %v6717_v46, %v6717_v46  ;;  %v1206_v54 = vrot.slane %v6719_v47, 4  ;;  %v1239_v55 = vmul.f32 %v6719_v47, %v6719_v47 }
 0x36e   :  { %v1190_v56 = vrot.slane %v1189_v48, 2  ;;  %v1245_v57 = vadd.f32 %v1244_v49, %v1236_v43  ;;  %v1202_v58 = vrot.slane %v1201_v50, 2  ;;  %v1257_v59 = vadd.f32 %v1256_v51, %v1238_v45 }
 0x36f   :  { %v1195_v60 = vadd.f32 %v1194_v52, %v6717_v46  ;;  %v1250_v61 = vrot.slane %v1237_v53, 4  ;;  %v1207_v62 = vadd.f32 %v1206_v54, %v6719_v47  ;;  %v1262_v63 = vrot.slane %v1239_v55, 4 }
 0x370   :  { %v1191_v1 = vadd.f32 %v1190_v56, %v1189_v48  ;;  %v1246_v2 = vrot.slane %v1245_v57, 2  ;;  %v1258_v3 = vrot.slane %v1257_v59, 2  ;;  %v1203_v10 = vadd.f32 %v1202_v58, %v1201_v50 }
 0x371   :  { %v1196_v4 = vrot.slane %v1195_v60, 2  ;;  %v1251_v5 = vadd.f32 %v1250_v61, %v1237_v53  ;;  %v1208_v6 = vrot.slane %v1207_v62, 2  ;;  %v1263_v7 = vadd.f32 %v1262_v63, %v1239_v55  ;;  %v1137_v61 = vld [vmem:[%s7694_s5 + $0x378] sm:$0xff] }
 0x372   :  { %v1247_v9 = vadd.f32 %v1246_v2, %v1245_v57  ;;  %v1259_v11 = vadd.f32 %v1258_v3, %v1257_v59  ;;  %v1192_v22 = vrot.slane %v1191_v1, 1  ;;  %v1204_v37 = vrot.slane %v1203_v10, 1  ;;  %v1120_v2 = vld [vmem:[%s7694_s5 + $0x2f0] sm:$0xff] }
 0x373   :  { %v1197_v12 = vadd.f32 %v1196_v4, %v1195_v60  ;;  %v1252_v13 = vrot.slane %v1251_v5, 2  ;;  %v1209_v14 = vadd.f32 %v1208_v6, %v1207_v62  ;;  %v1264_v15 = vrot.slane %v1263_v7, 2  ;;  %v1105_v60 = vld [vmem:[%s7694_s5 + $0x278] sm:$0xff]  ;;  %v1152_v3 = vld [vmem:[%s7694_s5 + $0x3f0] sm:$0xff] }
 0x374   :  { %v1248_v19 = vrot.slane %v1247_v9, 1  ;;  %v1260_v23 = vrot.slane %v1259_v11, 1  ;;  %v721_v43 = vrot.slane %v6691_v29, %v720_v17  ;;  %v729_v44 = vrot.slane %v6691_v29, %v728_v18  ;;  %v1103_v18 = vld [vmem:[%s7694_s5 + $0x268] sm:$0xff] }
 0x375   :  { %v1253_v20 = vadd.f32 %v1252_v13, %v1251_v5  ;;  %v1265_v21 = vadd.f32 %v1264_v15, %v1263_v7  ;;  %v1198_v32 = vrot.slane %v1197_v12, 1  ;;  %v1210_v33 = vrot.slane %v1209_v14, 1 }
 0x376   :  { %v1249_v36 = vadd.f32 %v1248_v19, %v1247_v9  ;;  %v1193_v49 = vadd.f32 %v1192_v22, %v1191_v1  ;;  %v1261_v50 = vadd.f32 %v1260_v23, %v1259_v11  ;;  %v1205_v56 = vadd.f32 %v1204_v37, %v1203_v10  ;;  %v1104_v9 = vld [vmem:[%s7694_s5 + $0x270] sm:$0xff]  ;;  %v1119_v11 = vld [vmem:[%s7694_s5 + $0x2e8] sm:$0xff]  ;;  %v1118_v22 = vld [vmem:[%s7694_s5 + $0x2e0] sm:$0xff] }
 0x377   :  { %v1254_v34 = vrot.slane %v1253_v20, 1  ;;  %v1266_v35 = vrot.slane %v1265_v21, 1  ;;  %v1199_v53 = vadd.f32 %v1198_v32, %v1197_v12  ;;  %v1211_v54 = vadd.f32 %v1210_v33, %v1209_v14  ;;  %v1136_v10 = vld [vmem:[%s7694_s5 + $0x370] sm:$0xff]  ;;  %v1151_v12 = vld [vmem:[%s7694_s5 + $0x3e8] sm:$0xff]  ;;  %v1150_v23 = vld [vmem:[%s7694_s5 + $0x3e0] sm:$0xff] }
 0x378   :  { %v950_v40 = vpop.f32.mrf.mxu0  ;;  %v1021_v42 = vpop.f32.mrf.mxu1  ;;  %v1293_v55 = vsel %vm1292_vm5, %v1193_v49, %v1249_v36  ;;  %v1295_v1 = vsel %vm1292_vm5, %v1205_v56, %v1261_v50  ;;  %v1135_v19 = vld [vmem:[%s7694_s5 + $0x368] sm:$0xff]  ;;  %v1134_v32 = vld [vmem:[%s7694_s5 + $0x360] sm:$0xff]  ;;  %v1117_v37 = vld [vmem:[%s7694_s5 + $0x2d8] sm:$0xff] }
 0x379   :  { %v1255_v45 = vadd.f32 %v1254_v34, %v1253_v20  ;;  %v1267_v48 = vadd.f32 %v1266_v35, %v1265_v21  ;;  %v6756_v62 = vadd.f32 %v950_v40, %v717_v24  ;;  %v6758_v63 = vadd.f32 %v1021_v42, %v725_v41  ;;  %v1102_v24 = vld [vmem:[%s7694_s5 + $0x260] sm:$0xff]  ;;  %v1149_v40 = vld [vmem:[%s7694_s5 + $0x3d8] sm:$0xff] }
 0x37a   :  { %v952_v51 = vpop.f32.mrf.mxu0  ;;  %v1023_v52 = vpop.f32.mrf.mxu1  ;;  %v1101_v41 = vld [vmem:[%s7694_s5 + $0x258] sm:$0xff] }
 0x37b   :  { %v6744_v57 = vadd.f32 %v952_v51, %v721_v43  ;;  %v6746_v58 = vadd.f32 %v1023_v52, %v729_v44  ;;  %v1294_v59 = vsel %vm1292_vm5, %v1199_v53, %v1255_v45  ;;  %v1296_v29 = vsel %vm1292_vm5, %v1211_v54, %v1267_v48  ;;  %v1133_v42 = vld [vmem:[%s7694_s5 + $0x358] sm:$0xff]  ;;  %v1116_v51 = vld [vmem:[%s7694_s5 + $0x2d0] sm:$0xff] }
 0x37c   :  { %1365 = vmatprep.mubr.f32.mxu0 %v1294_v59  ;;  %1435 = vmatprep.mubr.f32.mxu1 %v1296_v29  ;;  %v1240_v20 = vmul.f32 %v6756_v62, %v6756_v62  ;;  %v1242_v21 = vmul.f32 %v6758_v63, %v6758_v63  ;;  %v1148_v52 = vld [vmem:[%s7694_s5 + $0x3d0] sm:$0xff] }
 0x37d   :  { %v1218_v4 = vrot.slane %v6744_v57, 4  ;;  %v1241_v5 = vmul.f32 %v6744_v57, %v6744_v57  ;;  %v1230_v6 = vrot.slane %v6746_v58, 4  ;;  %v1243_v7 = vmul.f32 %v6746_v58, %v6746_v58  ;;  %1366 = vmatmul.mubr.f32.vlgmr.msra.gmra.mxu0 %v1293_v55  ;;  %1436 = vmatmul.mubr.f32.vlgmr.msra.gmra.mxu1 %v1295_v1  ;;  %v1100_v53 = vld [vmem:[%s7694_s5 + $0x250] sm:$0xff]  ;;  %v1147_v1 = vld [vmem:[%s7694_s5 + $0x3c8] sm:$0xff] }
 0x37e   :  { %5430 = vmatpush3.msra.mxu0 %v1105_v60  ;;  %5465 = vmatpush3.msra.mxu1 %v1137_v61  ;;  %v1268_v49 = vrot.slane %v1240_v20, 4  ;;  %v1280_v50 = vrot.slane %v1242_v21, 4  ;;  %v1132_v54 = vld [vmem:[%s7694_s5 + $0x350] sm:$0xff]  ;;  %v1212_v60 = vrot.slane %v6756_v62, 4  ;;  %v1115_v61 = vld [vmem:[%s7694_s5 + $0x2c8] sm:$0xff] }
 0x37f   :  { %v1219_v13 = vadd.f32 %v1218_v4, %v6744_v57  ;;  %v1274_v14 = vrot.slane %v1241_v5, 4  ;;  %v1231_v15 = vadd.f32 %v1230_v6, %v6746_v58  ;;  %v1286_v16 = vrot.slane %v1243_v7, 4  ;;  %5431 = vmatprep.subr.mxu0 %v1120_v2  ;;  %5466 = vmatprep.subr.mxu1 %v1152_v3  ;;  %v1099_v3 = vld [vmem:[%s7694_s5 + $0x248] sm:$0xff] }
 0x380   :  { %5432 = vmatpush3.msra.mxu0 %v1104_v9  ;;  %5467 = vmatpush3.msra.mxu1 %v1136_v10  ;;  %v1224_v2 = vrot.slane %v6758_v63, 4  ;;  %v1131_v4 = vld [vmem:[%s7694_s5 + $0x348] sm:$0xff]  ;;  %v1281_v9 = vadd.f32 %v1280_v50, %v1242_v21  ;;  %v1114_v10 = vld [vmem:[%s7694_s5 + $0x2c0] sm:$0xff] }
 0x381   :  { %5433 = vmatprep.subr.mxu0 %v1119_v11  ;;  %5468 = vmatprep.subr.mxu1 %v1151_v12  ;;  %v1220_v33 = vrot.slane %v1219_v13, 2  ;;  %v1275_v34 = vadd.f32 %v1274_v14, %v1241_v5  ;;  %v1232_v35 = vrot.slane %v1231_v15, 2  ;;  %v1287_v36 = vadd.f32 %v1286_v16, %v1243_v7  ;;  %v1146_v11 = vld [vmem:[%s7694_s5 + $0x3c0] sm:$0xff] }
 0x382   :  { %5434 = vmatpush3.msra.mxu0 %v1103_v18  ;;  %5469 = vmatpush3.msra.mxu1 %v1135_v19  ;;  %v1269_v7 = vadd.f32 %v1268_v49, %v1240_v20  ;;  %v1213_v18 = vadd.f32 %v1212_v60, %v6756_v62  ;;  %v1130_v19 = vld [vmem:[%s7694_s5 + $0x340] sm:$0xff]  ;;  %v1225_v20 = vadd.f32 %v1224_v2, %v6758_v63  ;;  %v1127_v49 = vld [vmem:[%s7694_s5 + $0x328] sm:$0xff]  ;;  %v1108_v2 = vld [vmem:[%s7694_s5 + $0x290] sm:$0xff] }
 0x383   :  { %5435 = vmatprep.subr.mxu0 %v1118_v22  ;;  %5470 = vmatprep.subr.mxu1 %v1150_v23  ;;  %v1221_v43 = vadd.f32 %v1220_v33, %v1219_v13  ;;  %v1276_v44 = vrot.slane %v1275_v34, 2  ;;  %v1233_v45 = vadd.f32 %v1232_v35, %v1231_v15  ;;  %v1288_v48 = vrot.slane %v1287_v36, 2  ;;  %v1098_v13 = vld [vmem:[%s7694_s5 + $0x240] sm:$0xff]  ;;  %v1113_v23 = vld [vmem:[%s7694_s5 + $0x2b8] sm:$0xff]  ;;  %v1144_v35 = vld [vmem:[%s7694_s5 + $0x3b0] sm:$0xff] }
 0x384   :  { %5436 = vmatpush3.msra.mxu0 %v1102_v24  ;;  %5471 = vmatpush3.msra.mxu1 %v1134_v32  ;;  %v1145_v24 = vld [vmem:[%s7694_s5 + $0x3b8] sm:$0xff]  ;;  %v1110_v50 = vld [vmem:[%s7694_s5 + $0x2a0] sm:$0xff] }
 0x385   :  { %5437 = vmatprep.subr.mxu0 %v1117_v37  ;;  %5472 = vmatprep.subr.mxu1 %v1149_v40  ;;  %v1222_v55 = vrot.slane %v1221_v43, 1  ;;  %v1277_v56 = vadd.f32 %v1276_v44, %v1275_v34  ;;  %v1234_v59 = vrot.slane %v1233_v45, 1  ;;  %v1289_v29 = vadd.f32 %v1288_v48, %v1287_v36  ;;  %v1097_v32 = vld [vmem:[%s7694_s5 + $0x238] sm:$0xff]  ;;  %v1112_v34 = vld [vmem:[%s7694_s5 + $0x2b0] sm:$0xff]  ;;  %v1111_v44 = vld [vmem:[%s7694_s5 + $0x2a8] sm:$0xff] }
 0x386   :  { %5438 = vmatpush3.msra.mxu0 %v1101_v41  ;;  %5473 = vmatpush3.msra.mxu1 %v1133_v42  ;;  %v1129_v33 = vld [vmem:[%s7694_s5 + $0x338] sm:$0xff]  ;;  %v1270_v36 = vrot.slane %v1269_v7, 2  ;;  %v1282_v37 = vrot.slane %v1281_v9, 2  ;;  %v1096_v40 = vld [vmem:[%s7694_s5 + $0x230] sm:$0xff]  ;;  %v1214_v42 = vrot.slane %v1213_v18, 2  ;;  %v1095_v48 = vld [vmem:[%s7694_s5 + $0x228] sm:$0xff] }
 0x387   :  { %5439 = vmatprep.subr.mxu0 %v1116_v51  ;;  %5474 = vmatprep.subr.mxu1 %v1148_v52  ;;  %v1278_v5 = vrot.slane %v1277_v56, 1  ;;  %v1290_v6 = vrot.slane %v1289_v29, 1  ;;  %v1223_v12 = vadd.f32 %v1222_v55, %v1221_v43  ;;  %v1235_v15 = vadd.f32 %v1234_v59, %v1233_v45  ;;  %v1128_v41 = vld [vmem:[%s7694_s5 + $0x330] sm:$0xff]  ;;  %v1143_v45 = vld [vmem:[%s7694_s5 + $0x3a8] sm:$0xff]  ;;  %v1142_v51 = vld [vmem:[%s7694_s5 + $0x3a0] sm:$0xff] }
 0x388   :  { %5440 = vmatpush3.msra.mxu0 %v1100_v53  ;;  %5475 = vmatpush3.msra.mxu1 %v1132_v54  ;;  %v1226_v43 = vrot.slane %v1225_v20, 2  ;;  %v1271_v52 = vadd.f32 %v1270_v36, %v1269_v7  ;;  %v1283_v53 = vadd.f32 %v1282_v37, %v1281_v9  ;;  %v1094_v54 = vld [vmem:[%s7694_s5 + $0x220] sm:$0xff]  ;;  %v1141_v59 = vld [vmem:[%s7694_s5 + $0x398] sm:$0xff]  ;;  %v1124_v7 = vld [vmem:[%s7694_s5 + $0x310] sm:$0xff] }
 0x389   :  { %5441 = vmatprep.subr.mxu0 %v1115_v61  ;;  %5476 = vmatprep.subr.mxu1 %v1147_v1  ;;  %v1279_v14 = vadd.f32 %v1278_v5, %v1277_v56  ;;  %v1291_v16 = vadd.f32 %v1290_v6, %v1289_v29  ;;  %v1126_v55 = vld [vmem:[%s7694_s5 + $0x320] sm:$0xff]  ;;  %v1109_v56 = vld [vmem:[%s7694_s5 + $0x298] sm:$0xff]  ;;  %v1215_v29 = vadd.f32 %v1214_v42, %v1213_v18  ;;  %v1092_v6 = vld [vmem:[%s7694_s5 + $0x210] sm:$0xff] }
 0x38a   :  { %5442 = vmatpush3.msra.mxu0 %v1099_v3  ;;  %5477 = vmatpush3.msra.mxu1 %v1131_v4  ;;  %v1227_v60 = vadd.f32 %v1226_v43, %v1225_v20  ;;  %v1093_v61 = vld [vmem:[%s7694_s5 + $0x218] sm:$0xff]  ;;  %v1140_v3 = vld [vmem:[%s7694_s5 + $0x390] sm:$0xff]  ;;  %v1272_v4 = vrot.slane %v1271_v52, 1  ;;  %v1284_v5 = vrot.slane %v1283_v53, 1  ;;  %v1107_v9 = vld [vmem:[%s7694_s5 + $0x288] sm:$0xff] }
 0x38b   :  { %5443 = vmatprep.subr.mxu0 %v1114_v10  ;;  %5478 = vmatprep.subr.mxu1 %v1146_v11  ;;  %v1298_v21 = vsel %vm1292_vm5, %v1223_v12, %v1279_v14  ;;  %v1300_v22 = vsel %vm1292_vm5, %v1235_v15, %v1291_v16  ;;  %v1125_v1 = vld [vmem:[%s7694_s5 + $0x318] sm:$0xff]  ;;  %v1139_v10 = vld [vmem:[%s7694_s5 + $0x388] sm:$0xff]  ;;  %v1216_v11 = vrot.slane %v1215_v29, 1  ;;  %v1106_v15 = vld [vmem:[%s7694_s5 + $0x280] sm:$0xff] }
 0x38c   :  { %5444 = vmatpush3.msra.mxu0 %v1098_v13  ;;  %1505 = vmatprep.mubr.f32.mxu0 %v1298_v21  ;;  %v1228_v12 = vrot.slane %v1227_v60, 1  ;;  %v1091_v13 = vld [vmem:[%s7694_s5 + $0x208] sm:$0xff]  ;;  %v1138_v16 = vld [vmem:[%s7694_s5 + $0x380] sm:$0xff]  ;;  %v1273_v18 = vadd.f32 %v1272_v4, %v1271_v52 }
 0x38d   :  { %5479 = vmatpush3.msra.mxu1 %v1130_v19  ;;  %1575 = vmatprep.mubr.f32.mxu1 %v1300_v22  ;;  %v1123_v14 = vld [vmem:[%s7694_s5 + $0x308] sm:$0xff]  ;;  %v1285_v19 = vadd.f32 %v1284_v5, %v1283_v53  ;;  %v1090_v20 = vld [vmem:[%s7694_s5 + $0x200] sm:$0xff]  ;;  %v1217_v22 = vadd.f32 %v1216_v11, %v1215_v29 }
 0x38e   :  { %5445 = vmatprep.subr.mxu0 %v1113_v23  ;;  %5480 = vmatprep.subr.mxu1 %v1145_v24  ;;  %v1122_v21 = vld [vmem:[%s7694_s5 + $0x300] sm:$0xff]  ;;  %v1229_v23 = vadd.f32 %v1228_v12, %v1227_v60  ;;  %v1181_v52 = vld [vmem:[#allocation9 + $0xd8] sm:$0xff] }
 0x38f   :  { %5446 = vmatpush3.msra.mxu0 %v1097_v32  ;;  %5481 = vmatpush3.msra.mxu1 %v1129_v33  ;;  %v1297_v24 = vsel %vm1292_vm5, %v1217_v22, %v1273_v18  ;;  %v1179_v33 = vld [vmem:[#allocation9 + $0xc8] sm:$0xff]  ;;  %v1184_v37 = vld [vmem:[#allocation9 + $0xf0] sm:$0xff]  ;;  %v6255_v18 = vmov 1966171168  }
 0x390   :  { %5447 = vmatprep.subr.mxu0 %v1112_v34  ;;  %5482 = vmatprep.subr.mxu1 %v1144_v35  ;;  %v1299_v32 = vsel %vm1292_vm5, %v1229_v23, %v1285_v19  ;;  %v1178_v34 = vld [vmem:[#allocation9 + $0xc0] sm:$0xff]  ;;  %v1185_v35 = vld [vmem:[#allocation9 + $0xf8] sm:$0xff]  ;;  %v1171_v36 = vld [vmem:[#allocation9 + $0x88] sm:$0xff]  ;;  %v1592_v19 = vunpack.c.l.s4 %v6255_v18 }
 0x391   :  { %5448 = vmatpush3.msra.mxu0 %v1096_v40  ;;  %5483 = vmatpush3.msra.mxu1 %v1128_v41  ;;  %v1170_v40 = vld [vmem:[#allocation9 + $0x80] sm:$0xff]  ;;  %v1177_v41 = vld [vmem:[#allocation9 + $0xb8] sm:$0xff]  ;;  %v1163_v42 = vld [vmem:[#allocation9 + $0x48] sm:$0xff] }
 0x392   :  { %5449 = vmatprep.subr.mxu0 %v1111_v44  ;;  %5484 = vmatprep.subr.mxu1 %v1143_v45  ;;  %v1176_v43 = vld [vmem:[#allocation9 + $0xb0] sm:$0xff]  ;;  %v1162_v44 = vld [vmem:[#allocation9 + $0x40] sm:$0xff]  ;;  %v1169_v45 = vld [vmem:[#allocation9 + $0x78] sm:$0xff] }
 0x393   :  { %5450 = vmatpush3.msra.mxu0 %v1095_v48  ;;  %5485 = vmatpush3.msra.mxu1 %v1127_v49  ;;  %v1155_v48 = vld [vmem:[#allocation9 + $0x8] sm:$0xff]  ;;  %v1168_v49 = vld [vmem:[#allocation9 + $0x70] sm:$0xff] }
 0x394   :  { %5451 = vmatprep.subr.mxu0 %v1110_v50  ;;  %5486 = vmatprep.subr.mxu1 %v1142_v51  ;;  %v1154_v50 = vld [vmem:[#allocation9] sm:$0xff]  ;;  %v1161_v51 = vld [vmem:[#allocation9 + $0x38] sm:$0xff]  ;;  %v1160_v53 = vld [vmem:[#allocation9 + $0x30] sm:$0xff] }
 0x395   :  { %5452 = vmatpush3.msra.mxu0 %v1094_v54  ;;  %5487 = vmatpush3.msra.mxu1 %v1126_v55  ;;  %v2268_v54 = vld [vmem:[#allocation13 + $0x8d8] sm:$0xff]  ;;  %v2069_v18 = vld [vmem:[#allocation13 + $0x2a0] sm:$0xff] }
 0x396   :  { %5453 = vmatprep.subr.mxu0 %v1109_v56  ;;  %5488 = vmatprep.subr.mxu1 %v1141_v59 }
 0x397   :  { %5454 = vmatpush3.msra.mxu0 %v1093_v61  ;;  %5489 = vmatpush3.msra.mxu1 %v1125_v1 }
 0x398   :  { %5455 = vmatprep.subr.mxu0 %v1108_v2  ;;  %5490 = vmatprep.subr.mxu1 %v1140_v3 }
 0x399   :  { %5456 = vmatpush3.msra.mxu0 %v1092_v6  ;;  %5491 = vmatpush3.msra.mxu1 %v1124_v7 }
 0x39a   :  { %5457 = vmatprep.subr.mxu0 %v1107_v9  ;;  %5492 = vmatprep.subr.mxu1 %v1139_v10 }
 0x39b   :  { %5458 = vmatpush3.msra.mxu0 %v1091_v13  ;;  %5493 = vmatpush3.msra.mxu1 %v1123_v14 }
 0x39c   :  { %5459 = vmatprep.subr.mxu0 %v1106_v15  ;;  %5494 = vmatprep.subr.mxu1 %v1138_v16 }
 0x39d   :  { %5460 = vmatpush3.msra.mxu0 %v1090_v20  ;;  %5495 = vmatpush3.msra.mxu1 %v1122_v21  ;;  %v1593_v20 = vunpack.c.0.s8 %v1592_v19  ;;  %v2225_v19 = vld [vmem:[#allocation13 + $0x780] sm:$0xff] }
 0x39e   :  { %1506 = vmatmul.mubr.f32.vlgmr.msra.gmra.mxu0 %v1297_v24  ;;  %1576 = vmatmul.mubr.f32.vlgmr.msra.gmra.mxu1 %v1299_v32  ;;  %v1186_v32 = vld [vmem:[#allocation10] sm:$0x1] }
 0x39f   :  { %1685 = vmatprep.mubr.f32.mxu0 %v6253_v0  ;;  %1898 = vmatprep.mubr.f32.mxu1 %v6253_v0  ;;  %v6964_v21 = vsub.s32 %v1593_v20, %v6685_v26  ;;  %v2064_v20 = vld [vmem:[#allocation13 + $0x278] sm:$0xff] }
 0x3a0   :  { %1645 = vmatprep.subr.mxu0 %v1179_v33  ;;  %1858 = vmatprep.subr.mxu1 %v1185_v35  ;;  %v1187_v35 = vld [vmem:[#allocation12] sm:$0x1] }
 0x3a1   :  { %1646 = vmatpush1.msra.mxu0 %v1178_v34  ;;  %1859 = vmatpush1.msra.mxu1 %v1184_v37 }
 0x3a2   :  { %1647 = vmatprep.subr.mxu0 %v1171_v36  ;;  %1860 = vmatprep.subr.mxu1 %v1177_v41  ;;  %v1180_v41 = vld [vmem:[#allocation9 + $0xd0] sm:$0xff] }
 0x3a3   :  { %1648 = vmatpush1.msra.mxu0 %v1170_v40  ;;  %1861 = vmatpush1.msra.mxu1 %v1176_v43  ;;  %v1173_v43 = vld [vmem:[#allocation9 + $0x98] sm:$0xff] }
 0x3a4   :  { %1649 = vmatprep.subr.mxu0 %v1163_v42  ;;  %1862 = vmatprep.subr.mxu1 %v1169_v45  ;;  %v1172_v45 = vld [vmem:[#allocation9 + $0x90] sm:$0xff] }
 0x3a5   :  { %1650 = vmatpush1.msra.mxu0 %v1162_v44  ;;  %1863 = vmatpush1.msra.mxu1 %v1168_v49  ;;  %v2267_v44 = vld [vmem:[#allocation13 + $0x8d0] sm:$0xff] }
 0x3a6   :  { %1651 = vmatprep.subr.mxu0 %v1155_v48  ;;  %1864 = vmatprep.subr.mxu1 %v1161_v51  ;;  %v2262_v48 = vld [vmem:[#allocation13 + $0x8a8] sm:$0xff]  ;;  %v1165_v49 = vld [vmem:[#allocation9 + $0x58] sm:$0xff] }
 0x3a7   :  { %1652 = vmatpush1.msra.mxu0 %v1154_v50  ;;  %1865 = vmatpush1.msra.mxu1 %v1160_v53  ;;  %v2261_v50 = vld [vmem:[#allocation13 + $0x8a0] sm:$0xff]  ;;  %v1164_v51 = vld [vmem:[#allocation9 + $0x50] sm:$0xff]  ;;  %v1157_v53 = vld [vmem:[#allocation9 + $0x18] sm:$0xff] }
 0x3a8   :  { %1716 = vmatprep.subr.mxu0 %v1181_v52  ;;  %2856 = vmatprep.subr.mxu1 %v2268_v54  ;;  %v2256_v52 = vld [vmem:[#allocation13 + $0x878] sm:$0xff]  ;;  %v2255_v54 = vld [vmem:[#allocation13 + $0x870] sm:$0xff] }
 0x43d   :  { %v5391_v55 = vpop.f32.mrf.mxu0  ;;  %v5426_v56 = vpop.f32.mrf.mxu1 }
 0x43f   :  { %v5392_v59 = vpop.f32.mrf.mxu0  ;;  %v5427_v29 = vpop.f32.mrf.mxu1 }
 0x440   :  { %v5393_v60 = vadd.f32 %v5392_v59, %v5391_v55  ;;  %v5428_v61 = vadd.f32 %v5427_v29, %v5426_v56  ;;  %v1156_v55 = vld [vmem:[#allocation9 + $0x10] sm:$0xff]  ;;  %v1183_v59 = vld [vmem:[#allocation9 + $0xe8] sm:$0xff]  ;;  %v1182_v29 = vld [vmem:[#allocation9 + $0xe0] sm:$0xff] }
 0x441   :  { %v2250_v56 = vld [vmem:[#allocation13 + $0x848] sm:$0xff] }
 0x442   :  { %v1438_v5 = vadd.f32 %v5428_v61, %v5393_v60  ;;  %v1175_v60 = vld [vmem:[#allocation9 + $0xa8] sm:$0xff] }
 0x443   :  { %v2249_v61 = vld [vmem:[#allocation13 + $0x840] sm:$0xff] }
 0x45e   :  { %v5461_v1 = vpop.f32.mrf.mxu0  ;;  %v5496_v2 = vpop.f32.mrf.mxu1 }
 0x460   :  { %v5462_v3 = vpop.f32.mrf.mxu0  ;;  %v5497_v4 = vpop.f32.mrf.mxu1 }
 0x461   :  { %v5463_v6 = vadd.f32 %v5462_v3, %v5461_v1  ;;  %v5498_v9 = vadd.f32 %v5497_v4, %v5496_v2  ;;  %v1174_v1 = vld [vmem:[#allocation9 + $0xa0] sm:$0xff]  ;;  %v1167_v3 = vld [vmem:[#allocation9 + $0x68] sm:$0xff]  ;;  %v2243_v4 = vld [vmem:[#allocation13 + $0x810] sm:$0xff] }
 0x462   :  { %v2244_v2 = vld [vmem:[#allocation13 + $0x818] sm:$0xff] }
 0x463   :  { %v1508_v7 = vadd.f32 %v5463_v6, %v1438_v5  ;;  %v1166_v5 = vld [vmem:[#allocation9 + $0x60] sm:$0xff]  ;;  %v2238_v6 = vld [vmem:[#allocation13 + $0x7e8] sm:$0xff] }
 0x465   :  { %v1578_v10 = vadd.f32 %v5498_v9, %v1508_v7  ;;  %v1159_v7 = vld [vmem:[#allocation9 + $0x28] sm:$0xff] }
 0x466   :  { %v2237_v9 = vld [vmem:[#allocation13 + $0x7e0] sm:$0xff] }
 0x467   :  { %v1581_v11 = vmul.f32 0.004310345, %v1578_v10  ;;  %v1158_v10 = vld [vmem:[#allocation9 + $0x20] sm:$0xff] }
 0x469   :  { %v1582_v12 = vmul.f32 %v1581_v11, %v1581_v11 }
 0x46b   :  { %v1584_v13 = vrot.slane %v1582_v12, 7  ;;  %v2076_v12 = vld [vmem:[#allocation13 + $0x2d8] sm:$0xff] }
 0x46d   :  { %v1586_v14 = vsub.f32 %v1581_v11, %v1584_v13  ;;  %v2075_v13 = vld [vmem:[#allocation13 + $0x2d0] sm:$0xff] }
 0x46f   :  { %v1587_v15 = vmax.f32 %v1586_v14, 0.0  ;;  %v2231_v14 = vld [vmem:[#allocation13 + $0x7b0] sm:$0xff] }
 0x471   :  { %v1588_v16 = vadd.f32 1e-05, %v1587_v15  ;;  %v2070_v15 = vld [vmem:[#allocation13 + $0x2a8] sm:$0xff] }
 0x473   :  { %5797 = vrsqrt.f32 %v1588_v16  ;;  %v2226_v16 = vld [vmem:[#allocation13 + $0x788] sm:$0xff] }
 0x480   :  { %v5798_v22 = vpop.eup %5797 }
 0x481   :  { %v1597_v23 = vrot.slane %v5798_v22, %v6964_v21  ;;  %v2220_v22 = vld [vmem:[#allocation13 + $0x758] sm:$0xff] }
 0x483   :  { %v1598_v24 = vcombine.high %v1597_v23, %v1597_v23  ;;  %v2063_v23 = vld [vmem:[#allocation13 + $0x270] sm:$0xff] }
 0x485   :  { %v1605_v33 = vrot.slane %v1598_v24, %v6964_v21  ;;  %v2219_v24 = vld [vmem:[#allocation13 + $0x750] sm:$0xff] }
 0x487   :  { %v1607_v34 = vmul.f32 %v1605_v33, %v1186_v32  ;;  %v2058_v32 = vld [vmem:[#allocation13 + $0x248] sm:$0xff] }
 0x488   :  { %v2214_v33 = vld [vmem:[#allocation13 + $0x728] sm:$0xff] }
 0x489   :  { %v1608_v36 = vmul.f32 %v1607_v34, %v1581_v11  ;;  %v2232_v11 = vld [vmem:[#allocation13 + $0x7b8] sm:$0xff] }
 0x48b   :  { %v1609_v37 = vsub.f32 %v1187_v35, %v1608_v36  ;;  %v2213_v35 = vld [vmem:[#allocation13 + $0x720] sm:$0xff]  ;;  %v2052_v36 = vld [vmem:[#allocation13 + $0x218] sm:$0xff] }
 0x48d   :  { %v1614_v40 = vrot.slane %v1609_v37, %v6688_v27  ;;  %v2208_v37 = vld [vmem:[#allocation13 + $0x6f8] sm:$0xff] }
 0x48f   :  { %v6970_v42 = vsel %vm1292_vm5, %v1607_v34, %v1614_v40  ;;  %v2057_v34 = vld [vmem:[#allocation13 + $0x240] sm:$0xff]  ;;  %v2051_v40 = vld [vmem:[#allocation13 + $0x210] sm:$0xff] }
 0x490   :  { %5341 = vmatmul.mubr.msk.f32.vlgmr.msra.gmra.mxu0 %vm1617_vm6, %v6970_v42  ;;  %5344 = vmatmul.mubr.msk.f32.vlgmr.msra.gmra.mxu1 %vm1617_vm6, %v6970_v42 }
 0x491   :  { %1717 = vmatpush1.msra.mxu0 %v1180_v41  ;;  %1756 = vmatprep.mubr.f32.mxu0 %v6253_v0  ;;  %v2207_v41 = vld [vmem:[#allocation13 + $0x6f0] sm:$0xff] }
 0x492   :  { %1718 = vmatprep.subr.mxu0 %v1173_v43  ;;  %2857 = vmatpush1.msra.mxu1 %v2267_v44  ;;  %v2202_v43 = vld [vmem:[#allocation13 + $0x6c8] sm:$0xff]  ;;  %v2045_v44 = vld [vmem:[#allocation13 + $0x1e0] sm:$0xff] }
 0x493   :  { %1719 = vmatpush1.msra.mxu0 %v1172_v45  ;;  %2858 = vmatprep.subr.mxu1 %v2262_v48  ;;  %v2201_v45 = vld [vmem:[#allocation13 + $0x6c0] sm:$0xff]  ;;  %v2040_v48 = vld [vmem:[#allocation13 + $0x1b8] sm:$0xff] }
 0x494   :  { %1720 = vmatprep.subr.mxu0 %v1165_v49  ;;  %2859 = vmatpush1.msra.mxu1 %v2261_v50  ;;  %v2196_v49 = vld [vmem:[#allocation13 + $0x698] sm:$0xff]  ;;  %v2039_v50 = vld [vmem:[#allocation13 + $0x1b0] sm:$0xff] }
 0x495   :  { %1721 = vmatpush1.msra.mxu0 %v1164_v51  ;;  %2860 = vmatprep.subr.mxu1 %v2256_v52  ;;  %v2195_v51 = vld [vmem:[#allocation13 + $0x690] sm:$0xff]  ;;  %v2034_v52 = vld [vmem:[#allocation13 + $0x188] sm:$0xff] }
 0x496   :  { %1722 = vmatprep.subr.mxu0 %v1157_v53  ;;  %2861 = vmatpush1.msra.mxu1 %v2255_v54  ;;  %v2190_v53 = vld [vmem:[#allocation13 + $0x668] sm:$0xff]  ;;  %v2033_v54 = vld [vmem:[#allocation13 + $0x180] sm:$0xff] }
 0x497   :  { %1723 = vmatpush1.msra.mxu0 %v1156_v55  ;;  %2862 = vmatprep.subr.mxu1 %v2250_v56  ;;  %v2189_v55 = vld [vmem:[#allocation13 + $0x660] sm:$0xff]  ;;  %v2028_v56 = vld [vmem:[#allocation13 + $0x158] sm:$0xff] }
 0x498   :  { %5342 = vmatmul.mubr.msk.f32.vlgmr.msra.gmra.mxu0 %vm1617_vm6, %v6970_v42  ;;  %1787 = vmatprep.subr.mxu0 %v1183_v59  ;;  %v2184_v59 = vld [vmem:[#allocation13 + $0x638] sm:$0xff] }
 0x499   :  { %1788 = vmatpush1.msra.mxu0 %v1182_v29  ;;  %1827 = vmatprep.mubr.f32.mxu0 %v6253_v0  ;;  %v2027_v29 = vld [vmem:[#allocation13 + $0x150] sm:$0xff] }
 0x49a   :  { %1789 = vmatprep.subr.mxu0 %v1175_v60  ;;  %2863 = vmatpush1.msra.mxu1 %v2249_v61  ;;  %v2183_v60 = vld [vmem:[#allocation13 + $0x630] sm:$0xff]  ;;  %v2022_v61 = vld [vmem:[#allocation13 + $0x128] sm:$0xff] }
 0x49b   :  { %1790 = vmatpush1.msra.mxu0 %v1174_v1  ;;  %2864 = vmatprep.subr.mxu1 %v2244_v2  ;;  %v2178_v1 = vld [vmem:[#allocation13 + $0x608] sm:$0xff]  ;;  %v2021_v2 = vld [vmem:[#allocation13 + $0x120] sm:$0xff] }
 0x49c   :  { %1791 = vmatprep.subr.mxu0 %v1167_v3  ;;  %2865 = vmatpush1.msra.mxu1 %v2243_v4  ;;  %v2177_v3 = vld [vmem:[#allocation13 + $0x600] sm:$0xff]  ;;  %v2016_v4 = vld [vmem:[#allocation13 + $0xf8] sm:$0xff] }
 0x49d   :  { %1792 = vmatpush1.msra.mxu0 %v1166_v5  ;;  %2866 = vmatprep.subr.mxu1 %v2238_v6  ;;  %v2364_v5 = vld [vmem:[#allocation13 + $0xbd8] sm:$0xff]  ;;  %v2015_v6 = vld [vmem:[#allocation13 + $0xf0] sm:$0xff] }
 0x49e   :  { %1793 = vmatprep.subr.mxu0 %v1159_v7  ;;  %2867 = vmatpush1.msra.mxu1 %v2237_v9  ;;  %v2363_v7 = vld [vmem:[#allocation13 + $0xbd0] sm:$0xff]  ;;  %v2010_v9 = vld [vmem:[#allocation13 + $0xc8] sm:$0xff] }
 0x49f   :  { %1794 = vmatpush1.msra.mxu0 %v1158_v10  ;;  %2868 = vmatprep.subr.mxu1 %v2232_v11  ;;  %v2358_v10 = vld [vmem:[#allocation13 + $0xba8] sm:$0xff]  ;;  %v2009_v11 = vld [vmem:[#allocation13 + $0xc0] sm:$0xff] }
 0x4a0   :  { %5343 = vmatmul.mubr.msk.f32.vlgmr.msra.gmra.mxu0 %vm1617_vm6, %v6970_v42  ;;  %2785 = vmatprep.subr.mxu0 %v2076_v12  ;;  %v2046_v42 = vld [vmem:[#allocation13 + $0x1e8] sm:$0xff]  ;;  %v2357_v12 = vld [vmem:[#allocation13 + $0xba0] sm:$0xff] }
 0x4a1   :  { %2786 = vmatpush1.msra.mxu0 %v2075_v13  ;;  %2869 = vmatpush1.msra.mxu1 %v2231_v14  ;;  %v2004_v13 = vld [vmem:[#allocation13 + $0x98] sm:$0xff] }
 0x4a2   :  { %2787 = vmatprep.subr.mxu0 %v2070_v15  ;;  %2870 = vmatprep.subr.mxu1 %v2226_v16  ;;  %v2352_v14 = vld [vmem:[#allocation13 + $0xb78] sm:$0xff]  ;;  %v2003_v15 = vld [vmem:[#allocation13 + $0x90] sm:$0xff] }
 0x4a3   :  { %2788 = vmatpush1.msra.mxu0 %v2069_v18  ;;  %2871 = vmatpush1.msra.mxu1 %v2225_v19  ;;  %v2351_v16 = vld [vmem:[#allocation13 + $0xb70] sm:$0xff]  ;;  %v1998_v18 = vld [vmem:[#allocation13 + $0x68] sm:$0xff] }
 0x4a4   :  { %2789 = vmatprep.subr.mxu0 %v2064_v20  ;;  %2872 = vmatprep.subr.mxu1 %v2220_v22  ;;  %v2346_v19 = vld [vmem:[#allocation13 + $0xb48] sm:$0xff]  ;;  %v1997_v20 = vld [vmem:[#allocation13 + $0x60] sm:$0xff] }
 0x4a5   :  { %2790 = vmatpush1.msra.mxu0 %v2063_v23  ;;  %2873 = vmatpush1.msra.mxu1 %v2219_v24  ;;  %v2345_v22 = vld [vmem:[#allocation13 + $0xb40] sm:$0xff]  ;;  %v1992_v23 = vld [vmem:[#allocation13 + $0x38] sm:$0xff] }
 0x4a6   :  { %2791 = vmatprep.subr.mxu0 %v2058_v32  ;;  %2874 = vmatprep.subr.mxu1 %v2214_v33  ;;  %v2340_v24 = vld [vmem:[#allocation13 + $0xb18] sm:$0xff]  ;;  %v1991_v32 = vld [vmem:[#allocation13 + $0x30] sm:$0xff] }
 0x4a7   :  { %2792 = vmatpush1.msra.mxu0 %v2057_v34  ;;  %2875 = vmatpush1.msra.mxu1 %v2213_v35  ;;  %v2339_v33 = vld [vmem:[#allocation13 + $0xb10] sm:$0xff]  ;;  %v1986_v34 = vld [vmem:[#allocation13 + $0x8] sm:$0xff] }
 0x4a8   :  { %2793 = vmatprep.subr.mxu0 %v2052_v36  ;;  %2876 = vmatprep.subr.mxu1 %v2208_v37  ;;  %v2334_v35 = vld [vmem:[#allocation13 + $0xae8] sm:$0xff]  ;;  %v1985_v36 = vld [vmem:[#allocation13] sm:$0xff] }
 0x4a9   :  { %2794 = vmatpush1.msra.mxu0 %v2051_v40  ;;  %2877 = vmatpush1.msra.mxu1 %v2207_v41  ;;  %v2333_v37 = vld [vmem:[#allocation13 + $0xae0] sm:$0xff]  ;;  %v2172_v40 = vld [vmem:[#allocation13 + $0x5d8] sm:$0xff] }
 0x4aa   :  { %2795 = vmatprep.subr.mxu0 %v2046_v42  ;;  %2878 = vmatprep.subr.mxu1 %v2202_v43  ;;  %v2328_v41 = vld [vmem:[#allocation13 + $0xab8] sm:$0xff]  ;;  %v2171_v42 = vld [vmem:[#allocation13 + $0x5d0] sm:$0xff] }
 0x4ab   :  { %2796 = vmatpush1.msra.mxu0 %v2045_v44  ;;  %2879 = vmatpush1.msra.mxu1 %v2201_v45  ;;  %v2327_v43 = vld [vmem:[#allocation13 + $0xab0] sm:$0xff]  ;;  %v2166_v44 = vld [vmem:[#allocation13 + $0x5a8] sm:$0xff] }
 0x4ac   :  { %2797 = vmatprep.subr.mxu0 %v2040_v48  ;;  %2880 = vmatprep.subr.mxu1 %v2196_v49  ;;  %v2322_v45 = vld [vmem:[#allocation13 + $0xa88] sm:$0xff]  ;;  %v2165_v48 = vld [vmem:[#allocation13 + $0x5a0] sm:$0xff] }
 0x4ad   :  { %2798 = vmatpush1.msra.mxu0 %v2039_v50  ;;  %2881 = vmatpush1.msra.mxu1 %v2195_v51  ;;  %v2321_v49 = vld [vmem:[#allocation13 + $0xa80] sm:$0xff]  ;;  %v2160_v50 = vld [vmem:[#allocation13 + $0x578] sm:$0xff]  ;;  %v2159_v51 = vld [vmem:[#allocation13 + $0x570] sm:$0xff] }
 0x4ae   :  { %2799 = vmatprep.subr.mxu0 %v2034_v52  ;;  %2882 = vmatprep.subr.mxu1 %v2190_v53  ;;  %v2154_v52 = vld [vmem:[#allocation13 + $0x548] sm:$0xff]  ;;  %v2153_v53 = vld [vmem:[#allocation13 + $0x540] sm:$0xff] }
 0x4af   :  { %2800 = vmatpush1.msra.mxu0 %v2033_v54  ;;  %2883 = vmatpush1.msra.mxu1 %v2189_v55  ;;  %v2148_v54 = vld [vmem:[#allocation13 + $0x518] sm:$0xff]  ;;  %v2147_v55 = vld [vmem:[#allocation13 + $0x510] sm:$0xff] }
 0x4b0   :  { %2801 = vmatprep.subr.mxu0 %v2028_v56  ;;  %2884 = vmatprep.subr.mxu1 %v2184_v59  ;;  %v2142_v56 = vld [vmem:[#allocation13 + $0x4e8] sm:$0xff]  ;;  %v2141_v59 = vld [vmem:[#allocation13 + $0x4e0] sm:$0xff] }
 0x4b1   :  { %2802 = vmatpush1.msra.mxu0 %v2027_v29  ;;  %2885 = vmatpush1.msra.mxu1 %v2183_v60  ;;  %v2136_v29 = vld [vmem:[#allocation13 + $0x4b8] sm:$0xff]  ;;  %v2135_v60 = vld [vmem:[#allocation13 + $0x4b0] sm:$0xff] }
 0x4b2   :  { %2803 = vmatprep.subr.mxu0 %v2022_v61  ;;  %2886 = vmatprep.subr.mxu1 %v2178_v1  ;;  %v2130_v61 = vld [vmem:[#allocation13 + $0x488] sm:$0xff]  ;;  %v2129_v1 = vld [vmem:[#allocation13 + $0x480] sm:$0xff] }
 0x4b3   :  { %2804 = vmatpush1.msra.mxu0 %v2021_v2  ;;  %2887 = vmatpush1.msra.mxu1 %v2177_v3  ;;  %v2124_v2 = vld [vmem:[#allocation13 + $0x458] sm:$0xff]  ;;  %v2123_v3 = vld [vmem:[#allocation13 + $0x450] sm:$0xff] }
 0x4b4   :  { %2805 = vmatprep.subr.mxu0 %v2016_v4  ;;  %2888 = vmatprep.subr.mxu1 %v2364_v5  ;;  %v2118_v4 = vld [vmem:[#allocation13 + $0x428] sm:$0xff]  ;;  %v2117_v5 = vld [vmem:[#allocation13 + $0x420] sm:$0xff] }
 0x4b5   :  { %2806 = vmatpush1.msra.mxu0 %v2015_v6  ;;  %2889 = vmatpush2.msra.mxu1 %v2363_v7  ;;  %v2316_v6 = vld [vmem:[#allocation13 + $0xa58] sm:$0xff] }
 0x4b6   :  { %2807 = vmatprep.subr.mxu0 %v2010_v9  ;;  %2890 = vmatprep.subr.mxu1 %v2358_v10  ;;  %v2112_v7 = vld [vmem:[#allocation13 + $0x3f8] sm:$0xff]  ;;  %v2315_v9 = vld [vmem:[#allocation13 + $0xa50] sm:$0xff] }
 0x4b7   :  { %2808 = vmatpush1.msra.mxu0 %v2009_v11  ;;  %2891 = vmatpush2.msra.mxu1 %v2357_v12  ;;  %v2111_v10 = vld [vmem:[#allocation13 + $0x3f0] sm:$0xff]  ;;  %v2310_v11 = vld [vmem:[#allocation13 + $0xa28] sm:$0xff] }
 0x4b8   :  { %2809 = vmatprep.subr.mxu0 %v2004_v13  ;;  %2892 = vmatprep.subr.mxu1 %v2352_v14  ;;  %v2106_v12 = vld [vmem:[#allocation13 + $0x3c8] sm:$0xff]  ;;  %v2309_v13 = vld [vmem:[#allocation13 + $0xa20] sm:$0xff] }
 0x4b9   :  { %2810 = vmatpush1.msra.mxu0 %v2003_v15  ;;  %2893 = vmatpush2.msra.mxu1 %v2351_v16  ;;  %v2105_v14 = vld [vmem:[#allocation13 + $0x3c0] sm:$0xff]  ;;  %v2304_v15 = vld [vmem:[#allocation13 + $0x9f8] sm:$0xff] }
 0x4ba   :  { %2811 = vmatprep.subr.mxu0 %v1998_v18  ;;  %2894 = vmatprep.subr.mxu1 %v2346_v19  ;;  %v2100_v16 = vld [vmem:[#allocation13 + $0x398] sm:$0xff]  ;;  %v2303_v18 = vld [vmem:[#allocation13 + $0x9f0] sm:$0xff] }
 0x4bb   :  { %2812 = vmatpush1.msra.mxu0 %v1997_v20  ;;  %2895 = vmatpush2.msra.mxu1 %v2345_v22  ;;  %v2099_v19 = vld [vmem:[#allocation13 + $0x390] sm:$0xff]  ;;  %v2298_v20 = vld [vmem:[#allocation13 + $0x9c8] sm:$0xff] }
 0x4bc   :  { %2813 = vmatprep.subr.mxu0 %v1992_v23  ;;  %2896 = vmatprep.subr.mxu1 %v2340_v24  ;;  %v2094_v22 = vld [vmem:[#allocation13 + $0x368] sm:$0xff]  ;;  %v2297_v23 = vld [vmem:[#allocation13 + $0x9c0] sm:$0xff] }
 0x4bd   :  { %2814 = vmatpush1.msra.mxu0 %v1991_v32  ;;  %2897 = vmatpush2.msra.mxu1 %v2339_v33  ;;  %v2093_v24 = vld [vmem:[#allocation13 + $0x360] sm:$0xff]  ;;  %v2292_v32 = vld [vmem:[#allocation13 + $0x998] sm:$0xff] }
 0x4be   :  { %2815 = vmatprep.subr.mxu0 %v1986_v34  ;;  %2898 = vmatprep.subr.mxu1 %v2334_v35  ;;  %v2088_v33 = vld [vmem:[#allocation13 + $0x338] sm:$0xff]  ;;  %v2291_v34 = vld [vmem:[#allocation13 + $0x990] sm:$0xff] }
 0x4bf   :  { %2816 = vmatpush1.msra.mxu0 %v1985_v36  ;;  %2899 = vmatpush2.msra.mxu1 %v2333_v37  ;;  %v2087_v35 = vld [vmem:[#allocation13 + $0x330] sm:$0xff]  ;;  %v2286_v36 = vld [vmem:[#allocation13 + $0x968] sm:$0xff] }
 0x4c0   :  { %2817 = vmatprep.subr.mxu0 %v2172_v40  ;;  %2900 = vmatprep.subr.mxu1 %v2328_v41  ;;  %v2082_v37 = vld [vmem:[#allocation13 + $0x308] sm:$0xff]  ;;  %v2285_v40 = vld [vmem:[#allocation13 + $0x960] sm:$0xff] }
 0x4c1   :  { %2818 = vmatpush2.msra.mxu0 %v2171_v42  ;;  %2901 = vmatpush2.msra.mxu1 %v2327_v43  ;;  %v2081_v41 = vld [vmem:[#allocation13 + $0x300] sm:$0xff]  ;;  %v2280_v42 = vld [vmem:[#allocation13 + $0x938] sm:$0xff] }
 0x4c2   :  { %2819 = vmatprep.subr.mxu0 %v2166_v44  ;;  %2902 = vmatprep.subr.mxu1 %v2322_v45  ;;  %v2460_v43 = vld [vmem:[#allocation13 + $0xed8] sm:$0xff]  ;;  %v2279_v44 = vld [vmem:[#allocation13 + $0x930] sm:$0xff]  ;;  %v2274_v45 = vld [vmem:[#allocation13 + $0x908] sm:$0xff] }
 0x4c3   :  { %2820 = vmatpush2.msra.mxu0 %v2165_v48  ;;  %2903 = vmatpush2.msra.mxu1 %v2321_v49  ;;  %v2273_v48 = vld [vmem:[#allocation13 + $0x900] sm:$0xff]  ;;  %v2652_v49 = vld [vmem:[#allocation13 + $0x14d8] sm:$0xff] }
 0x4c4   :  { %2821 = vmatprep.subr.mxu0 %v2160_v50  ;;  %2904 = vmatprep.subr.mxu1 %v2316_v6 }
 0x4c5   :  { %2822 = vmatpush2.msra.mxu0 %v2159_v51  ;;  %2905 = vmatpush2.msra.mxu1 %v2315_v9  ;;  %v2448_v9 = vld [vmem:[#allocation13 + $0xe78] sm:$0xff] }
 0x4c6   :  { %2823 = vmatprep.subr.mxu0 %v2154_v52  ;;  %2906 = vmatprep.subr.mxu1 %v2310_v11  ;;  %v2447_v11 = vld [vmem:[#allocation13 + $0xe70] sm:$0xff] }
 0x4c7   :  { %2824 = vmatpush2.msra.mxu0 %v2153_v53  ;;  %2907 = vmatpush2.msra.mxu1 %v2309_v13 }
 0x4c8   :  { %2825 = vmatprep.subr.mxu0 %v2148_v54  ;;  %2908 = vmatprep.subr.mxu1 %v2304_v15 }
 0x4c9   :  { %2826 = vmatpush2.msra.mxu0 %v2147_v55  ;;  %2909 = vmatpush2.msra.mxu1 %v2303_v18  ;;  %v2441_v18 = vld [vmem:[#allocation13 + $0xe40] sm:$0xff] }
 0x4ca   :  { %2827 = vmatprep.subr.mxu0 %v2142_v56  ;;  %2910 = vmatprep.subr.mxu1 %v2298_v20  ;;  %v2436_v20 = vld [vmem:[#allocation13 + $0xe18] sm:$0xff] }
 0x4cb   :  { %2828 = vmatpush2.msra.mxu0 %v2141_v59  ;;  %2911 = vmatpush2.msra.mxu1 %v2297_v23 }
 0x4cc   :  { %2829 = vmatprep.subr.mxu0 %v2136_v29  ;;  %2912 = vmatprep.subr.mxu1 %v2292_v32 }
 0x4cd   :  { %2830 = vmatpush2.msra.mxu0 %v2135_v60  ;;  %2913 = vmatpush2.msra.mxu1 %v2291_v34  ;;  %v2430_v34 = vld [vmem:[#allocation13 + $0xde8] sm:$0xff] }
 0x4ce   :  { %2831 = vmatprep.subr.mxu0 %v2130_v61  ;;  %2914 = vmatprep.subr.mxu1 %v2286_v36 }
 0x4cf   :  { %2832 = vmatpush2.msra.mxu0 %v2129_v1  ;;  %2915 = vmatpush2.msra.mxu1 %v2285_v40  ;;  %v2640_v40 = vld [vmem:[#allocation13 + $0x1478] sm:$0xff] }
 0x4d0   :  { %2833 = vmatprep.subr.mxu0 %v2124_v2  ;;  %2916 = vmatprep.subr.mxu1 %v2280_v42  ;;  %v2639_v42 = vld [vmem:[#allocation13 + $0x1470] sm:$0xff] }
 0x4d1   :  { %2834 = vmatpush2.msra.mxu0 %v2123_v3  ;;  %2917 = vmatpush2.msra.mxu1 %v2279_v44  ;;  %v2459_v3 = vld [vmem:[#allocation13 + $0xed0] sm:$0xff] }
 0x4d2   :  { %2835 = vmatprep.subr.mxu0 %v2118_v4  ;;  %2918 = vmatprep.subr.mxu1 %v2274_v45  ;;  %v2423_v45 = vld [vmem:[#allocation13 + $0xdb0] sm:$0xff] }
 0x4d3   :  { %2836 = vmatpush2.msra.mxu0 %v2117_v5  ;;  %2919 = vmatpush2.msra.mxu1 %v2273_v48  ;;  %v2454_v5 = vld [vmem:[#allocation13 + $0xea8] sm:$0xff] }
 0x4d4   :  { %2837 = vmatprep.subr.mxu0 %v2112_v7  ;;  %2998 = vmatprep.subr.mxu1 %v2652_v49  ;;  %v2634_v48 = vld [vmem:[#allocation13 + $0x1448] sm:$0xff] }
 0x4d5   :  { %2838 = vmatpush2.msra.mxu0 %v2111_v10  ;;  %v2418_v49 = vld [vmem:[#allocation13 + $0xd88] sm:$0xff] }
 0x4d6   :  { %2839 = vmatprep.subr.mxu0 %v2106_v12 }
 0x4d7   :  { %2840 = vmatpush2.msra.mxu0 %v2105_v14  ;;  %v2442_v14 = vld [vmem:[#allocation13 + $0xe48] sm:$0xff] }
 0x4d8   :  { %2841 = vmatprep.subr.mxu0 %v2100_v16 }
 0x4d9   :  { %2842 = vmatpush2.msra.mxu0 %v2099_v19 }
 0x4da   :  { %2843 = vmatprep.subr.mxu0 %v2094_v22 }
 0x4db   :  { %2844 = vmatpush2.msra.mxu0 %v2093_v24  ;;  %v2435_v24 = vld [vmem:[#allocation13 + $0xe10] sm:$0xff] }
 0x4dc   :  { %2845 = vmatprep.subr.mxu0 %v2088_v33 }
 0x4dd   :  { %2846 = vmatpush2.msra.mxu0 %v2087_v35  ;;  %v2645_v35 = vld [vmem:[#allocation13 + $0x14a0] sm:$0xff] }
 0x4de   :  { %2847 = vmatprep.subr.mxu0 %v2082_v37  ;;  %v2429_v37 = vld [vmem:[#allocation13 + $0xde0] sm:$0xff] }
 0x4df   :  { %2848 = vmatpush2.msra.mxu0 %v2081_v41  ;;  %v2424_v41 = vld [vmem:[#allocation13 + $0xdb8] sm:$0xff] }
 0x4e0   :  { %2927 = vmatprep.subr.mxu0 %v2460_v43 }
 0x550   :  { %v1687_v50 = vpop.f32.mrf.mxu0  ;;  %v6983_v53 = vpop.f32.mrf.mxu1 }
 0x551   :  { %v1908_v51 = vrot.slane %v1687_v50, %v6688_v27  ;;  %v1948_v29 = vrot.slane %v1687_v50, %v6694_v30  ;;  %v2633_v50 = vld [vmem:[#allocation13 + $0x1440] sm:$0xff] }
 0x552   :  { %v1689_v52 = vpop.f32.mrf.mxu0  ;;  %v1902_v61 = vpop.f32.mrf.mxu1 }
 0x553   :  { %v1912_v54 = vrot.slane %v1689_v52, %v6688_v27  ;;  %v1937_v55 = vmul.f32 %v1908_v51, %v6707_v38  ;;  %v1952_v59 = vrot.slane %v1689_v52, %v6694_v30  ;;  %v1936_v38 = vrot.slane %v1902_v61, %v6688_v27  ;;  %v2417_v52 = vld [vmem:[#allocation13 + $0xd80] sm:$0xff] }
 0x555   :  { %v1938_v56 = vmul.f32 %v1912_v54, %v6717_v46  ;;  %v6992_v1 = vadd.f32 %v1948_v29, %v1937_v55  ;;  %v2453_v46 = vld [vmem:[#allocation13 + $0xea0] sm:$0xff]  ;;  %v1944_v15 = vmul.f32 %v1936_v38, %v6746_v58  ;;  %v2646_v58 = vld [vmem:[#allocation13 + $0x14a8] sm:$0xff]  ;;  %v2628_v54 = vld [vmem:[#allocation13 + $0x1418] sm:$0xff] }
 0x556   :  { %v2412_v55 = vld [vmem:[#allocation13 + $0xd58] sm:$0xff]  ;;  %v2406_v29 = vld [vmem:[#allocation13 + $0xd28] sm:$0xff]  ;;  %v2399_v38 = vld [vmem:[#allocation13 + $0xcf0] sm:$0xff] }
 0x557   :  { %v6990_v60 = vadd.f32 %v1952_v59, %v1938_v56  ;;  %v2411_v56 = vld [vmem:[#allocation13 + $0xd50] sm:$0xff]  ;;  %v2622_v59 = vld [vmem:[#allocation13 + $0x13e8] sm:$0xff] }
 0x558   :  { %v1758_v2 = vpop.f32.mrf.mxu0 }
 0x559   :  { %v1916_v4 = vrot.slane %v1758_v2, %v6688_v27  ;;  %2849 = vmatprep.mubr.f32.mxu0 %v6990_v60  ;;  %v1956_v16 = vrot.slane %v1758_v2, %v6694_v30  ;;  %v2405_v2 = vld [vmem:[#allocation13 + $0xd20] sm:$0xff] }
 0x55a   :  { %v1760_v6 = vpop.f32.mrf.mxu0  ;;  %2850 = vmatmul.mubr.f32.vlgmr.msra.gmra.mxu0 %v6992_v1 }
 0x55b   :  { %v1920_v7 = vrot.slane %v1760_v6, %v6688_v27  ;;  %2928 = vmatpush1.msra.mxu0 %v2459_v3  ;;  %v1939_v10 = vmul.f32 %v1916_v4, %v6709_v39  ;;  %v1960_v13 = vrot.slane %v1760_v6, %v6694_v30  ;;  %v1976_v39 = vrot.slane %v1902_v61, %v6694_v30  ;;  %v2621_v61 = vld [vmem:[#allocation13 + $0x13e0] sm:$0xff]  ;;  %v2616_v3 = vld [vmem:[#allocation13 + $0x13b8] sm:$0xff]  ;;  %v2610_v6 = vld [vmem:[#allocation13 + $0x1388] sm:$0xff] }
 0x55c   :  { %2929 = vmatprep.subr.mxu0 %v2454_v5  ;;  %v2400_v4 = vld [vmem:[#allocation13 + $0xcf8] sm:$0xff]  ;;  %v2615_v5 = vld [vmem:[#allocation13 + $0x13b0] sm:$0xff] }
 0x55d   :  { %v1940_v12 = vmul.f32 %v1920_v7, %v6719_v47  ;;  %2930 = vmatpush1.msra.mxu0 %v2453_v46  ;;  %v7007_v22 = vadd.f32 %v1956_v16, %v1939_v10  ;;  %v2651_v47 = vld [vmem:[#allocation13 + $0x14d0] sm:$0xff]  ;;  %v7012_v32 = vadd.f32 %v1976_v39, %v1944_v15  ;;  %v2394_v46 = vld [vmem:[#allocation13 + $0xcc8] sm:$0xff]  ;;  %v2609_v7 = vld [vmem:[#allocation13 + $0x1380] sm:$0xff] }
 0x55e   :  { %2931 = vmatprep.subr.mxu0 %v2448_v9  ;;  %v2393_v9 = vld [vmem:[#allocation13 + $0xcc0] sm:$0xff]  ;;  %v2604_v10 = vld [vmem:[#allocation13 + $0x1358] sm:$0xff]  ;;  %v2382_v15 = vld [vmem:[#allocation13 + $0xc68] sm:$0xff] }
 0x55f   :  { %v7004_v19 = vadd.f32 %v1960_v13, %v1940_v12  ;;  %2932 = vmatpush1.msra.mxu0 %v2447_v11  ;;  %v2388_v11 = vld [vmem:[#allocation13 + $0xc98] sm:$0xff]  ;;  %v2603_v12 = vld [vmem:[#allocation13 + $0x1350] sm:$0xff]  ;;  %v2597_v16 = vld [vmem:[#allocation13 + $0x1320] sm:$0xff] }
 0x560   :  { %v7009_v23 = vpop.f32.mrf.mxu0  ;;  %2933 = vmatprep.subr.mxu0 %v2442_v14  ;;  %v2387_v13 = vld [vmem:[#allocation13 + $0xc90] sm:$0xff]  ;;  %v2598_v14 = vld [vmem:[#allocation13 + $0x1328] sm:$0xff]  ;;  %v2376_v39 = vld [vmem:[#allocation13 + $0xc38] sm:$0xff] }
 0x561   :  { %2920 = vmatprep.mubr.f32.mxu1 %v7004_v19  ;;  %2934 = vmatpush1.msra.mxu0 %v2441_v18  ;;  %v2381_v18 = vld [vmem:[#allocation13 + $0xc60] sm:$0xff] }
 0x562   :  { %v1831_v33 = vpop.f32.mrf.mxu0  ;;  %2921 = vmatmul.mubr.f32.vlgmr.msra.gmra.mxu1 %v7007_v22  ;;  %2935 = vmatprep.subr.mxu0 %v2436_v20  ;;  %v2592_v20 = vld [vmem:[#allocation13 + $0x12f8] sm:$0xff] }
 0x563   :  { %v1928_v36 = vrot.slane %v1831_v33, %v6688_v27  ;;  %2999 = vmatpush1.msra.mxu1 %v2651_v47  ;;  %2936 = vmatpush1.msra.mxu0 %v2435_v24  ;;  %v1968_v44 = vrot.slane %v1831_v33, %v6694_v30  ;;  %v2591_v47 = vld [vmem:[#allocation13 + $0x12f0] sm:$0xff]  ;;  %v2370_v33 = vld [vmem:[#allocation13 + $0xc08] sm:$0xff] }
 0x564   :  { %3000 = vmatprep.subr.mxu1 %v2646_v58  ;;  %3062 = vmatprep.mubr.f32.mxu1 %v7012_v32  ;;  %v2375_v24 = vld [vmem:[#allocation13 + $0xc30] sm:$0xff]  ;;  %v2586_v58 = vld [vmem:[#allocation13 + $0x12c8] sm:$0xff] }
 0x565   :  { %v1942_v43 = vmul.f32 %v1928_v36, %v6744_v57  ;;  %2937 = vmatprep.subr.mxu0 %v2430_v34  ;;  %3001 = vmatpush1.msra.mxu1 %v2645_v35  ;;  %v2627_v57 = vld [vmem:[#allocation13 + $0x1410] sm:$0xff]  ;;  %v2585_v34 = vld [vmem:[#allocation13 + $0x12c0] sm:$0xff]  ;;  %v2580_v36 = vld [vmem:[#allocation13 + $0x1298] sm:$0xff] }
 0x566   :  { %2938 = vmatpush1.msra.mxu0 %v2429_v37  ;;  %3002 = vmatprep.subr.mxu1 %v2640_v40  ;;  %v2369_v35 = vld [vmem:[#allocation13 + $0xc00] sm:$0xff]  ;;  %v2556_v37 = vld [vmem:[#allocation13 + $0x11d8] sm:$0xff]  ;;  %v2579_v40 = vld [vmem:[#allocation13 + $0x1290] sm:$0xff] }
 0x567   :  { %v7019_v51 = vadd.f32 %v1968_v44, %v1942_v43  ;;  %2939 = vmatprep.subr.mxu0 %v2424_v41  ;;  %3003 = vmatpush1.msra.mxu1 %v2639_v42  ;;  %v2555_v41 = vld [vmem:[#allocation13 + $0x11d0] sm:$0xff]  ;;  %v2574_v42 = vld [vmem:[#allocation13 + $0x1268] sm:$0xff]  ;;  %v2573_v44 = vld [vmem:[#allocation13 + $0x1260] sm:$0xff] }
 0x568   :  { %2940 = vmatpush1.msra.mxu0 %v2423_v45  ;;  %3004 = vmatprep.subr.mxu1 %v2634_v48  ;;  %v2550_v43 = vld [vmem:[#allocation13 + $0x11a8] sm:$0xff]  ;;  %v2549_v45 = vld [vmem:[#allocation13 + $0x11a0] sm:$0xff]  ;;  %v2568_v48 = vld [vmem:[#allocation13 + $0x1238] sm:$0xff] }
 0x569   :  { %2941 = vmatprep.subr.mxu0 %v2418_v49  ;;  %3005 = vmatpush1.msra.mxu1 %v2633_v50  ;;  %v2544_v49 = vld [vmem:[#allocation13 + $0x1178] sm:$0xff]  ;;  %v2567_v50 = vld [vmem:[#allocation13 + $0x1230] sm:$0xff] }
 0x56a   :  { %2942 = vmatpush1.msra.mxu0 %v2417_v52  ;;  %2991 = vmatprep.mubr.f32.mxu0 %v7019_v51  ;;  %v2543_v52 = vld [vmem:[#allocation13 + $0x1170] sm:$0xff] }
 0x56b   :  { %3006 = vmatprep.subr.mxu1 %v2628_v54  ;;  %2943 = vmatprep.subr.mxu0 %v2412_v55  ;;  %v2562_v54 = vld [vmem:[#allocation13 + $0x1208] sm:$0xff] }
 0x56c   :  { %3007 = vmatpush1.msra.mxu1 %v2627_v57  ;;  %2944 = vmatpush1.msra.mxu0 %v2411_v56  ;;  %v2538_v55 = vld [vmem:[#allocation13 + $0x1148] sm:$0xff]  ;;  %v2561_v57 = vld [vmem:[#allocation13 + $0x1200] sm:$0xff] }
 0x56d   :  { %3008 = vmatprep.subr.mxu1 %v2622_v59  ;;  %2945 = vmatprep.subr.mxu0 %v2406_v29  ;;  %v2537_v56 = vld [vmem:[#allocation13 + $0x1140] sm:$0xff]  ;;  %v2748_v59 = vld [vmem:[#allocation13 + $0x17d8] sm:$0xff] }
 0x56e   :  { %3009 = vmatpush1.msra.mxu1 %v2621_v61  ;;  %2946 = vmatpush1.msra.mxu0 %v2405_v2  ;;  %v2532_v29 = vld [vmem:[#allocation13 + $0x1118] sm:$0xff]  ;;  %v2747_v61 = vld [vmem:[#allocation13 + $0x17d0] sm:$0xff] }
 0x56f   :  { %3010 = vmatprep.subr.mxu1 %v2616_v3  ;;  %2947 = vmatprep.subr.mxu0 %v2400_v4  ;;  %v2531_v2 = vld [vmem:[#allocation13 + $0x1110] sm:$0xff]  ;;  %v2742_v3 = vld [vmem:[#allocation13 + $0x17a8] sm:$0xff] }
 0x570   :  { %3011 = vmatpush1.msra.mxu1 %v2615_v5  ;;  %2948 = vmatpush1.msra.mxu0 %v2399_v38  ;;  %v2526_v4 = vld [vmem:[#allocation13 + $0x10e8] sm:$0xff]  ;;  %v2741_v5 = vld [vmem:[#allocation13 + $0x17a0] sm:$0xff] }
 0x571   :  { %3012 = vmatprep.subr.mxu1 %v2610_v6  ;;  %2949 = vmatprep.subr.mxu0 %v2394_v46  ;;  %v2525_v38 = vld [vmem:[#allocation13 + $0x10e0] sm:$0xff]  ;;  %v2736_v6 = vld [vmem:[#allocation13 + $0x1778] sm:$0xff] }
 0x572   :  { %3013 = vmatpush1.msra.mxu1 %v2609_v7  ;;  %2950 = vmatpush1.msra.mxu0 %v2393_v9  ;;  %v2520_v46 = vld [vmem:[#allocation13 + $0x10b8] sm:$0xff]  ;;  %v2735_v7 = vld [vmem:[#allocation13 + $0x1770] sm:$0xff] }
 0x573   :  { %3014 = vmatprep.subr.mxu1 %v2604_v10  ;;  %2951 = vmatprep.subr.mxu0 %v2388_v11  ;;  %v2519_v9 = vld [vmem:[#allocation13 + $0x10b0] sm:$0xff]  ;;  %v2730_v10 = vld [vmem:[#allocation13 + $0x1748] sm:$0xff] }
 0x574   :  { %3015 = vmatpush1.msra.mxu1 %v2603_v12  ;;  %2952 = vmatpush1.msra.mxu0 %v2387_v13  ;;  %v2514_v11 = vld [vmem:[#allocation13 + $0x1088] sm:$0xff]  ;;  %v2729_v12 = vld [vmem:[#allocation13 + $0x1740] sm:$0xff] }
 0x575   :  { %3016 = vmatprep.subr.mxu1 %v2598_v14  ;;  %2953 = vmatprep.subr.mxu0 %v2382_v15  ;;  %v2513_v13 = vld [vmem:[#allocation13 + $0x1080] sm:$0xff]  ;;  %v2724_v14 = vld [vmem:[#allocation13 + $0x1718] sm:$0xff] }
 0x576   :  { %3017 = vmatpush1.msra.mxu1 %v2597_v16  ;;  %2954 = vmatpush1.msra.mxu0 %v2381_v18  ;;  %v2508_v15 = vld [vmem:[#allocation13 + $0x1058] sm:$0xff]  ;;  %v2723_v16 = vld [vmem:[#allocation13 + $0x1710] sm:$0xff] }
 0x577   :  { %3018 = vmatprep.subr.mxu1 %v2592_v20  ;;  %2955 = vmatprep.subr.mxu0 %v2376_v39  ;;  %v2507_v18 = vld [vmem:[#allocation13 + $0x1050] sm:$0xff]  ;;  %v2718_v20 = vld [vmem:[#allocation13 + $0x16e8] sm:$0xff] }
 0x578   :  { %3019 = vmatpush1.msra.mxu1 %v2591_v47  ;;  %2956 = vmatpush1.msra.mxu0 %v2375_v24  ;;  %v2502_v39 = vld [vmem:[#allocation13 + $0x1028] sm:$0xff]  ;;  %v2717_v47 = vld [vmem:[#allocation13 + $0x16e0] sm:$0xff] }
 0x579   :  { %3020 = vmatprep.subr.mxu1 %v2586_v58  ;;  %2957 = vmatprep.subr.mxu0 %v2370_v33  ;;  %v2501_v24 = vld [vmem:[#allocation13 + $0x1020] sm:$0xff]  ;;  %v2712_v58 = vld [vmem:[#allocation13 + $0x16b8] sm:$0xff] }
 0x57a   :  { %3021 = vmatpush1.msra.mxu1 %v2585_v34  ;;  %2958 = vmatpush1.msra.mxu0 %v2369_v35  ;;  %v2496_v33 = vld [vmem:[#allocation13 + $0xff8] sm:$0xff]  ;;  %v2711_v34 = vld [vmem:[#allocation13 + $0x16b0] sm:$0xff] }
 0x57b   :  { %3022 = vmatprep.subr.mxu1 %v2580_v36  ;;  %2959 = vmatprep.subr.mxu0 %v2556_v37  ;;  %v2495_v35 = vld [vmem:[#allocation13 + $0xff0] sm:$0xff]  ;;  %v2706_v36 = vld [vmem:[#allocation13 + $0x1688] sm:$0xff] }
 0x57c   :  { %3023 = vmatpush1.msra.mxu1 %v2579_v40  ;;  %2960 = vmatpush2.msra.mxu0 %v2555_v41  ;;  %v2490_v37 = vld [vmem:[#allocation13 + $0xfc8] sm:$0xff]  ;;  %v2705_v40 = vld [vmem:[#allocation13 + $0x1680] sm:$0xff] }
 0x57d   :  { %3024 = vmatprep.subr.mxu1 %v2574_v42  ;;  %2961 = vmatprep.subr.mxu0 %v2550_v43  ;;  %v2489_v41 = vld [vmem:[#allocation13 + $0xfc0] sm:$0xff]  ;;  %v2700_v42 = vld [vmem:[#allocation13 + $0x1658] sm:$0xff] }
 0x57e   :  { %3025 = vmatpush1.msra.mxu1 %v2573_v44  ;;  %2962 = vmatpush2.msra.mxu0 %v2549_v45  ;;  %v2484_v43 = vld [vmem:[#allocation13 + $0xf98] sm:$0xff]  ;;  %v1924_v44 = vrot.slane %v7009_v23, %v6688_v27  ;;  %v2699_v45 = vld [vmem:[#allocation13 + $0x1650] sm:$0xff] }
 0x57f   :  { %3026 = vmatprep.subr.mxu1 %v2568_v48  ;;  %2963 = vmatprep.subr.mxu0 %v2544_v49  ;;  %v2483_v48 = vld [vmem:[#allocation13 + $0xf90] sm:$0xff]  ;;  %v2694_v49 = vld [vmem:[#allocation13 + $0x1628] sm:$0xff] }
 0x580   :  { %3027 = vmatpush1.msra.mxu1 %v2567_v50  ;;  %2964 = vmatpush2.msra.mxu0 %v2543_v52  ;;  %v2478_v50 = vld [vmem:[#allocation13 + $0xf68] sm:$0xff]  ;;  %v2693_v52 = vld [vmem:[#allocation13 + $0x1620] sm:$0xff] }
 0x581   :  { %3028 = vmatprep.subr.mxu1 %v2562_v54  ;;  %2965 = vmatprep.subr.mxu0 %v2538_v55  ;;  %v2477_v54 = vld [vmem:[#allocation13 + $0xf60] sm:$0xff]  ;;  %v2688_v55 = vld [vmem:[#allocation13 + $0x15f8] sm:$0xff] }
 0x582   :  { %3029 = vmatpush1.msra.mxu1 %v2561_v57  ;;  %2966 = vmatpush2.msra.mxu0 %v2537_v56  ;;  %v2472_v57 = vld [vmem:[#allocation13 + $0xf38] sm:$0xff]  ;;  %v1941_v56 = vmul.f32 %v1924_v44, %v6756_v62  ;;  %v1932_v62 = vrot.slane %v6983_v53, %v6688_v27  ;;  %v2257_v44 = vld [vmem:[#allocation13 + $0x880] sm:$0xff] }
 0x583   :  { %3030 = vmatprep.subr.mxu1 %v2748_v59  ;;  %2967 = vmatprep.subr.mxu0 %v2532_v29  ;;  %v2687_v59 = vld [vmem:[#allocation13 + $0x15f0] sm:$0xff] }
 0x584   :  { %3031 = vmatpush2.msra.mxu1 %v2747_v61  ;;  %2968 = vmatpush2.msra.mxu0 %v2531_v2  ;;  %v2471_v29 = vld [vmem:[#allocation13 + $0xf30] sm:$0xff]  ;;  %v2682_v61 = vld [vmem:[#allocation13 + $0x15c8] sm:$0xff] }
 0x585   :  { %3032 = vmatprep.subr.mxu1 %v2742_v3  ;;  %2969 = vmatprep.subr.mxu0 %v2526_v4  ;;  %v2466_v2 = vld [vmem:[#allocation13 + $0xf08] sm:$0xff]  ;;  %v1964_v3 = vrot.slane %v7009_v23, %v6694_v30  ;;  %v2681_v4 = vld [vmem:[#allocation13 + $0x15c0] sm:$0xff] }
 0x586   :  { %3033 = vmatpush2.msra.mxu1 %v2741_v5  ;;  %2970 = vmatpush2.msra.mxu0 %v2525_v38  ;;  %v2465_v5 = vld [vmem:[#allocation13 + $0xf00] sm:$0xff]  ;;  %v2676_v38 = vld [vmem:[#allocation13 + $0x1598] sm:$0xff] }
 0x587   :  { %3034 = vmatprep.subr.mxu1 %v2736_v6  ;;  %2971 = vmatprep.subr.mxu0 %v2520_v46  ;;  %v7029_v6 = vadd.f32 %v1964_v3, %v1941_v56  ;;  %v2675_v46 = vld [vmem:[#allocation13 + $0x1590] sm:$0xff]  ;;  %v2077_v23 = vld [vmem:[#allocation13 + $0x2e0] sm:$0xff]  ;;  %v2234_v3 = vld [vmem:[#allocation13 + $0x7c8] sm:$0xff] }
 0x588   :  { %3035 = vmatpush2.msra.mxu1 %v2735_v7  ;;  %2972 = vmatpush2.msra.mxu0 %v2519_v9  ;;  %v2078_v7 = vld [vmem:[#allocation13 + $0x2e8] sm:$0xff]  ;;  %v2029_v56 = vld [vmem:[#allocation13 + $0x160] sm:$0xff] }
 0x589   :  { %3036 = vmatprep.subr.mxu1 %v2730_v10  ;;  %2973 = vmatprep.subr.mxu0 %v2514_v11  ;;  %v2670_v9 = vld [vmem:[#allocation13 + $0x1568] sm:$0xff]  ;;  %v2669_v10 = vld [vmem:[#allocation13 + $0x1560] sm:$0xff]  ;;  %v2072_v11 = vld [vmem:[#allocation13 + $0x2b8] sm:$0xff] }
 0x58a   :  { %3037 = vmatpush2.msra.mxu1 %v2729_v12  ;;  %2974 = vmatpush2.msra.mxu0 %v2513_v13  ;;  %v2664_v12 = vld [vmem:[#allocation13 + $0x1538] sm:$0xff]  ;;  %v1943_v13 = vmul.f32 %v1932_v62, %v6758_v63 }
 0x58b   :  { %3038 = vmatprep.subr.mxu1 %v2724_v14  ;;  %2975 = vmatprep.subr.mxu0 %v2508_v15  ;;  %v2071_v14 = vld [vmem:[#allocation13 + $0x2b0] sm:$0xff]  ;;  %v2228_v62 = vld [vmem:[#allocation13 + $0x798] sm:$0xff] }
 0x58c   :  { %3039 = vmatpush2.msra.mxu1 %v2723_v16  ;;  %2976 = vmatpush2.msra.mxu0 %v2507_v18  ;;  %v2663_v15 = vld [vmem:[#allocation13 + $0x1530] sm:$0xff]  ;;  %v2066_v16 = vld [vmem:[#allocation13 + $0x288] sm:$0xff] }
 0x58d   :  { %3040 = vmatprep.subr.mxu1 %v2718_v20  ;;  %2977 = vmatprep.subr.mxu0 %v2502_v39  ;;  %v2658_v18 = vld [vmem:[#allocation13 + $0x1508] sm:$0xff]  ;;  %v1972_v20 = vrot.slane %v6983_v53, %v6694_v30  ;;  %v2065_v39 = vld [vmem:[#allocation13 + $0x280] sm:$0xff] }
 0x58e   :  { %3041 = vmatpush2.msra.mxu1 %v2717_v47  ;;  %2978 = vmatpush2.msra.mxu0 %v2501_v24  ;;  %v2657_v47 = vld [vmem:[#allocation13 + $0x1500] sm:$0xff]  ;;  %v2060_v24 = vld [vmem:[#allocation13 + $0x258] sm:$0xff] }
 0x58f   :  { %3042 = vmatprep.subr.mxu1 %v2712_v58  ;;  %2979 = vmatprep.subr.mxu0 %v2496_v33  ;;  %v7036_v63 = vadd.f32 %v1972_v20, %v1943_v13  ;;  %v2059_v58 = vld [vmem:[#allocation13 + $0x250] sm:$0xff]  ;;  %v2270_v33 = vld [vmem:[#allocation13 + $0x8e8] sm:$0xff]  ;;  %v2053_v53 = vld [vmem:[#allocation13 + $0x220] sm:$0xff] }
 0x590   :  { %3043 = vmatpush2.msra.mxu1 %v2711_v34  ;;  %2980 = vmatpush2.msra.mxu0 %v2495_v35  ;;  %v2054_v34 = vld [vmem:[#allocation13 + $0x228] sm:$0xff]  ;;  %v2269_v35 = vld [vmem:[#allocation13 + $0x8e0] sm:$0xff]  ;;  %v2216_v13 = vld [vmem:[#allocation13 + $0x738] sm:$0xff] }
 0x591   :  { %3044 = vmatprep.subr.mxu1 %v2706_v36  ;;  %2981 = vmatprep.subr.mxu0 %v2490_v37  ;;  %v2264_v36 = vld [vmem:[#allocation13 + $0x8b8] sm:$0xff]  ;;  %v1994_v20 = vld [vmem:[#allocation13 + $0x48] sm:$0xff] }
 0x592   :  { %3045 = vmatpush2.msra.mxu1 %v2705_v40  ;;  %2982 = vmatpush2.msra.mxu0 %v2489_v41  ;;  %v2048_v37 = vld [vmem:[#allocation13 + $0x1f8] sm:$0xff]  ;;  %v2263_v40 = vld [vmem:[#allocation13 + $0x8b0] sm:$0xff] }
 0x593   :  { %3046 = vmatprep.subr.mxu1 %v2700_v42  ;;  %2983 = vmatprep.subr.mxu0 %v2484_v43  ;;  %v2047_v41 = vld [vmem:[#allocation13 + $0x1f0] sm:$0xff]  ;;  %v2258_v42 = vld [vmem:[#allocation13 + $0x888] sm:$0xff] }
 0x594   :  { %3047 = vmatpush2.msra.mxu1 %v2699_v45  ;;  %2984 = vmatpush2.msra.mxu0 %v2483_v48  ;;  %v2042_v43 = vld [vmem:[#allocation13 + $0x1c8] sm:$0xff]  ;;  %v2041_v45 = vld [vmem:[#allocation13 + $0x1c0] sm:$0xff]  ;;  %v2252_v48 = vld [vmem:[#allocation13 + $0x858] sm:$0xff] }
 0x595   :  { %3048 = vmatprep.subr.mxu1 %v2694_v49  ;;  %2985 = vmatprep.subr.mxu0 %v2478_v50  ;;  %v2036_v49 = vld [vmem:[#allocation13 + $0x198] sm:$0xff]  ;;  %v2251_v50 = vld [vmem:[#allocation13 + $0x850] sm:$0xff] }
 0x596   :  { %3049 = vmatpush2.msra.mxu1 %v2693_v52  ;;  %2986 = vmatpush2.msra.mxu0 %v2477_v54  ;;  %v2035_v52 = vld [vmem:[#allocation13 + $0x190] sm:$0xff]  ;;  %v2246_v54 = vld [vmem:[#allocation13 + $0x828] sm:$0xff] }
 0x597   :  { %3050 = vmatprep.subr.mxu1 %v2688_v55  ;;  %2987 = vmatprep.subr.mxu0 %v2472_v57  ;;  %v2030_v55 = vld [vmem:[#allocation13 + $0x168] sm:$0xff]  ;;  %v2245_v57 = vld [vmem:[#allocation13 + $0x820] sm:$0xff] }
 0x598   :  { %3051 = vmatpush2.msra.mxu1 %v2687_v59  ;;  %2988 = vmatpush2.msra.mxu0 %v2471_v29  ;;  %v2240_v59 = vld [vmem:[#allocation13 + $0x7f8] sm:$0xff] }
 0x599   :  { %3052 = vmatprep.subr.mxu1 %v2682_v61  ;;  %2989 = vmatprep.subr.mxu0 %v2466_v2  ;;  %v2024_v29 = vld [vmem:[#allocation13 + $0x138] sm:$0xff]  ;;  %v2239_v61 = vld [vmem:[#allocation13 + $0x7f0] sm:$0xff] }
 0x59a   :  { %3053 = vmatpush2.msra.mxu1 %v2681_v4  ;;  %2990 = vmatpush2.msra.mxu0 %v2465_v5  ;;  %v2023_v2 = vld [vmem:[#allocation13 + $0x130] sm:$0xff]  ;;  %v2018_v4 = vld [vmem:[#allocation13 + $0x108] sm:$0xff]  ;;  %v2233_v5 = vld [vmem:[#allocation13 + $0x7c0] sm:$0xff] }
 0x59b   :  { %3054 = vmatprep.subr.mxu1 %v2676_v38  ;;  %2992 = vmatmul.mubr.f32.vlgmr.msra.gmra.mxu0 %v7029_v6  ;;  %v2017_v38 = vld [vmem:[#allocation13 + $0x100] sm:$0xff] }
 0x59c   :  { %3055 = vmatpush2.msra.mxu1 %v2675_v46  ;;  %3069 = vmatprep.subr.mxu0 %v2078_v7  ;;  %v2012_v46 = vld [vmem:[#allocation13 + $0xd8] sm:$0xff]  ;;  %v2227_v7 = vld [vmem:[#allocation13 + $0x790] sm:$0xff] }
 0x59d   :  { %3056 = vmatprep.subr.mxu1 %v2670_v9  ;;  %3070 = vmatpush1.msra.mxu0 %v2077_v23  ;;  %v2011_v9 = vld [vmem:[#allocation13 + $0xd0] sm:$0xff]  ;;  %v2222_v23 = vld [vmem:[#allocation13 + $0x768] sm:$0xff] }
 0x59e   :  { %3133 = vmatprep.mubr.f32.mxu0 %v6990_v60  ;;  %3057 = vmatpush2.msra.mxu1 %v2669_v10  ;;  %v2006_v10 = vld [vmem:[#allocation13 + $0xa8] sm:$0xff] }
 0x59f   :  { %3071 = vmatprep.subr.mxu0 %v2072_v11  ;;  %3058 = vmatprep.subr.mxu1 %v2664_v12  ;;  %v2221_v11 = vld [vmem:[#allocation13 + $0x760] sm:$0xff] }
 0x5a0   :  { %3072 = vmatpush1.msra.mxu0 %v2071_v14  ;;  %3059 = vmatpush2.msra.mxu1 %v2663_v15  ;;  %v2005_v12 = vld [vmem:[#allocation13 + $0xa0] sm:$0xff]  ;;  %v2000_v14 = vld [vmem:[#allocation13 + $0x78] sm:$0xff]  ;;  %v2215_v15 = vld [vmem:[#allocation13 + $0x730] sm:$0xff] }
 0x5a1   :  { %3073 = vmatprep.subr.mxu0 %v2066_v16  ;;  %3060 = vmatprep.subr.mxu1 %v2658_v18  ;;  %v1999_v16 = vld [vmem:[#allocation13 + $0x70] sm:$0xff]  ;;  %v2210_v18 = vld [vmem:[#allocation13 + $0x708] sm:$0xff] }
 0x5a2   :  { %3074 = vmatpush1.msra.mxu0 %v2065_v39  ;;  %3061 = vmatpush2.msra.mxu1 %v2657_v47  ;;  %v2209_v39 = vld [vmem:[#allocation13 + $0x700] sm:$0xff] }
 0x5a3   :  { %3075 = vmatprep.subr.mxu0 %v2060_v24  ;;  %3063 = vmatmul.mubr.f32.vlgmr.msra.gmra.mxu1 %v7036_v63  ;;  %v1993_v47 = vld [vmem:[#allocation13 + $0x40] sm:$0xff]  ;;  %v2204_v24 = vld [vmem:[#allocation13 + $0x6d8] sm:$0xff] }
 0x5a4   :  { %3076 = vmatpush1.msra.mxu0 %v2059_v58  ;;  %3140 = vmatprep.subr.mxu1 %v2270_v33  ;;  %v1988_v58 = vld [vmem:[#allocation13 + $0x18] sm:$0xff]  ;;  %v2203_v33 = vld [vmem:[#allocation13 + $0x6d0] sm:$0xff] }
 0x5a5   :  { %3077 = vmatprep.subr.mxu0 %v2054_v34  ;;  %3141 = vmatpush1.msra.mxu1 %v2269_v35  ;;  %v1987_v34 = vld [vmem:[#allocation13 + $0x10] sm:$0xff]  ;;  %v2198_v35 = vld [vmem:[#allocation13 + $0x6a8] sm:$0xff] }
 0x5a6   :  { %3204 = vmatprep.mubr.f32.mxu1 %v7004_v19  ;;  %3078 = vmatpush1.msra.mxu0 %v2053_v53  ;;  %v2174_v53 = vld [vmem:[#allocation13 + $0x5e8] sm:$0xff] }
 0x5a7   :  { %3142 = vmatprep.subr.mxu1 %v2264_v36  ;;  %3079 = vmatprep.subr.mxu0 %v2048_v37  ;;  %v2197_v36 = vld [vmem:[#allocation13 + $0x6a0] sm:$0xff] }
 0x5a8   :  { %3143 = vmatpush1.msra.mxu1 %v2263_v40  ;;  %3080 = vmatpush1.msra.mxu0 %v2047_v41  ;;  %v2173_v37 = vld [vmem:[#allocation13 + $0x5e0] sm:$0xff]  ;;  %v2192_v40 = vld [vmem:[#allocation13 + $0x678] sm:$0xff] }
 0x5a9   :  { %3144 = vmatprep.subr.mxu1 %v2258_v42  ;;  %3081 = vmatprep.subr.mxu0 %v2042_v43  ;;  %v2168_v41 = vld [vmem:[#allocation13 + $0x5b8] sm:$0xff]  ;;  %v2191_v42 = vld [vmem:[#allocation13 + $0x670] sm:$0xff] }
 0x5aa   :  { %3145 = vmatpush1.msra.mxu1 %v2257_v44  ;;  %3082 = vmatpush1.msra.mxu0 %v2041_v45  ;;  %v2167_v43 = vld [vmem:[#allocation13 + $0x5b0] sm:$0xff]  ;;  %v2186_v44 = vld [vmem:[#allocation13 + $0x648] sm:$0xff] }
 0x5ab   :  { %3146 = vmatprep.subr.mxu1 %v2252_v48  ;;  %3083 = vmatprep.subr.mxu0 %v2036_v49  ;;  %v2162_v45 = vld [vmem:[#allocation13 + $0x588] sm:$0xff]  ;;  %v2185_v48 = vld [vmem:[#allocation13 + $0x640] sm:$0xff] }
 0x5ac   :  { %3147 = vmatpush1.msra.mxu1 %v2251_v50  ;;  %3084 = vmatpush1.msra.mxu0 %v2035_v52  ;;  %v2161_v49 = vld [vmem:[#allocation13 + $0x580] sm:$0xff]  ;;  %v2180_v50 = vld [vmem:[#allocation13 + $0x618] sm:$0xff] }
 0x5ad   :  { %3148 = vmatprep.subr.mxu1 %v2246_v54  ;;  %3085 = vmatprep.subr.mxu0 %v2030_v55  ;;  %v2156_v52 = vld [vmem:[#allocation13 + $0x558] sm:$0xff]  ;;  %v2179_v54 = vld [vmem:[#allocation13 + $0x610] sm:$0xff] }
 0x5ae   :  { %3149 = vmatpush1.msra.mxu1 %v2245_v57  ;;  %3086 = vmatpush1.msra.mxu0 %v2029_v56  ;;  %v2155_v55 = vld [vmem:[#allocation13 + $0x550] sm:$0xff]  ;;  %v2366_v57 = vld [vmem:[#allocation13 + $0xbe8] sm:$0xff] }
 0x5af   :  { %3150 = vmatprep.subr.mxu1 %v2240_v59  ;;  %3087 = vmatprep.subr.mxu0 %v2024_v29  ;;  %v2150_v56 = vld [vmem:[#allocation13 + $0x528] sm:$0xff]  ;;  %v2365_v59 = vld [vmem:[#allocation13 + $0xbe0] sm:$0xff] }
 0x5b0   :  { %3151 = vmatpush1.msra.mxu1 %v2239_v61  ;;  %3088 = vmatpush1.msra.mxu0 %v2023_v2  ;;  %v2149_v29 = vld [vmem:[#allocation13 + $0x520] sm:$0xff]  ;;  %v2360_v61 = vld [vmem:[#allocation13 + $0xbb8] sm:$0xff] }
 0x5b1   :  { %3152 = vmatprep.subr.mxu1 %v2234_v3  ;;  %3089 = vmatprep.subr.mxu0 %v2018_v4  ;;  %v2144_v2 = vld [vmem:[#allocation13 + $0x4f8] sm:$0xff]  ;;  %v2359_v3 = vld [vmem:[#allocation13 + $0xbb0] sm:$0xff] }
 0x5b2   :  { %3153 = vmatpush1.msra.mxu1 %v2233_v5  ;;  %3090 = vmatpush1.msra.mxu0 %v2017_v38  ;;  %v2143_v4 = vld [vmem:[#allocation13 + $0x4f0] sm:$0xff]  ;;  %v2354_v5 = vld [vmem:[#allocation13 + $0xb88] sm:$0xff] }
 0x5b3   :  { %3154 = vmatprep.subr.mxu1 %v2228_v62  ;;  %3091 = vmatprep.subr.mxu0 %v2012_v46  ;;  %v2138_v38 = vld [vmem:[#allocation13 + $0x4c8] sm:$0xff]  ;;  %v2353_v62 = vld [vmem:[#allocation13 + $0xb80] sm:$0xff] }
 0x5b4   :  { %3155 = vmatpush1.msra.mxu1 %v2227_v7  ;;  %3092 = vmatpush1.msra.mxu0 %v2011_v9  ;;  %v2137_v46 = vld [vmem:[#allocation13 + $0x4c0] sm:$0xff]  ;;  %v2348_v7 = vld [vmem:[#allocation13 + $0xb58] sm:$0xff] }
 0x5b5   :  { %3156 = vmatprep.subr.mxu1 %v2222_v23  ;;  %3093 = vmatprep.subr.mxu0 %v2006_v10  ;;  %v2132_v9 = vld [vmem:[#allocation13 + $0x498] sm:$0xff]  ;;  %v2347_v23 = vld [vmem:[#allocation13 + $0xb50] sm:$0xff] }
 0x5b6   :  { %3157 = vmatpush1.msra.mxu1 %v2221_v11  ;;  %3094 = vmatpush1.msra.mxu0 %v2005_v12  ;;  %v2131_v10 = vld [vmem:[#allocation13 + $0x490] sm:$0xff]  ;;  %v2342_v11 = vld [vmem:[#allocation13 + $0xb28] sm:$0xff] }
 0x5b7   :  { %3158 = vmatprep.subr.mxu1 %v2216_v13  ;;  %3095 = vmatprep.subr.mxu0 %v2000_v14  ;;  %v2126_v12 = vld [vmem:[#allocation13 + $0x468] sm:$0xff]  ;;  %v2341_v13 = vld [vmem:[#allocation13 + $0xb20] sm:$0xff] }
 0x5b8   :  { %3159 = vmatpush1.msra.mxu1 %v2215_v15  ;;  %3096 = vmatpush1.msra.mxu0 %v1999_v16  ;;  %v2125_v14 = vld [vmem:[#allocation13 + $0x460] sm:$0xff]  ;;  %v2336_v15 = vld [vmem:[#allocation13 + $0xaf8] sm:$0xff] }
 0x5b9   :  { %3160 = vmatprep.subr.mxu1 %v2210_v18  ;;  %3097 = vmatprep.subr.mxu0 %v1994_v20  ;;  %v2120_v16 = vld [vmem:[#allocation13 + $0x438] sm:$0xff]  ;;  %v2335_v18 = vld [vmem:[#allocation13 + $0xaf0] sm:$0xff] }
 0x5ba   :  { %3161 = vmatpush1.msra.mxu1 %v2209_v39  ;;  %3098 = vmatpush1.msra.mxu0 %v1993_v47  ;;  %v2119_v20 = vld [vmem:[#allocation13 + $0x430] sm:$0xff]  ;;  %v2330_v39 = vld [vmem:[#allocation13 + $0xac8] sm:$0xff] }
 0x5bb   :  { %3162 = vmatprep.subr.mxu1 %v2204_v24  ;;  %3099 = vmatprep.subr.mxu0 %v1988_v58  ;;  %v2114_v47 = vld [vmem:[#allocation13 + $0x408] sm:$0xff]  ;;  %v2329_v24 = vld [vmem:[#allocation13 + $0xac0] sm:$0xff] }
 0x5bc   :  { %3163 = vmatpush1.msra.mxu1 %v2203_v33  ;;  %3100 = vmatpush1.msra.mxu0 %v1987_v34  ;;  %v2113_v58 = vld [vmem:[#allocation13 + $0x400] sm:$0xff]  ;;  %v2324_v33 = vld [vmem:[#allocation13 + $0xa98] sm:$0xff] }
 0x5bd   :  { %3164 = vmatprep.subr.mxu1 %v2198_v35  ;;  %3101 = vmatprep.subr.mxu0 %v2174_v53  ;;  %v2108_v34 = vld [vmem:[#allocation13 + $0x3d8] sm:$0xff]  ;;  %v2323_v35 = vld [vmem:[#allocation13 + $0xa90] sm:$0xff] }
 0x5be   :  { %3165 = vmatpush1.msra.mxu1 %v2197_v36  ;;  %3102 = vmatpush2.msra.mxu0 %v2173_v37  ;;  %v2107_v53 = vld [vmem:[#allocation13 + $0x3d0] sm:$0xff]  ;;  %v2318_v36 = vld [vmem:[#allocation13 + $0xa68] sm:$0xff] }
 0x5bf   :  { %3166 = vmatprep.subr.mxu1 %v2192_v40  ;;  %3103 = vmatprep.subr.mxu0 %v2168_v41  ;;  %v2102_v37 = vld [vmem:[#allocation13 + $0x3a8] sm:$0xff]  ;;  %v2317_v40 = vld [vmem:[#allocation13 + $0xa60] sm:$0xff] }
 0x5c0   :  { %3167 = vmatpush1.msra.mxu1 %v2191_v42  ;;  %3104 = vmatpush2.msra.mxu0 %v2167_v43  ;;  %v2101_v41 = vld [vmem:[#allocation13 + $0x3a0] sm:$0xff]  ;;  %v2312_v42 = vld [vmem:[#allocation13 + $0xa38] sm:$0xff] }
 0x5c1   :  { %3168 = vmatprep.subr.mxu1 %v2186_v44  ;;  %3105 = vmatprep.subr.mxu0 %v2162_v45  ;;  %v2096_v43 = vld [vmem:[#allocation13 + $0x378] sm:$0xff]  ;;  %v2311_v44 = vld [vmem:[#allocation13 + $0xa30] sm:$0xff] }
 0x5c2   :  { %3169 = vmatpush1.msra.mxu1 %v2185_v48  ;;  %3106 = vmatpush2.msra.mxu0 %v2161_v49  ;;  %v2095_v45 = vld [vmem:[#allocation13 + $0x370] sm:$0xff]  ;;  %v2306_v48 = vld [vmem:[#allocation13 + $0xa08] sm:$0xff] }
 0x5c3   :  { %3170 = vmatprep.subr.mxu1 %v2180_v50  ;;  %3107 = vmatprep.subr.mxu0 %v2156_v52  ;;  %v2090_v49 = vld [vmem:[#allocation13 + $0x348] sm:$0xff]  ;;  %v2305_v50 = vld [vmem:[#allocation13 + $0xa00] sm:$0xff] }
 0x5c4   :  { %3171 = vmatpush1.msra.mxu1 %v2179_v54  ;;  %3108 = vmatpush2.msra.mxu0 %v2155_v55  ;;  %v2089_v52 = vld [vmem:[#allocation13 + $0x340] sm:$0xff]  ;;  %v2300_v54 = vld [vmem:[#allocation13 + $0x9d8] sm:$0xff] }
 0x5c5   :  { %3172 = vmatprep.subr.mxu1 %v2366_v57  ;;  %3109 = vmatprep.subr.mxu0 %v2150_v56  ;;  %v2084_v55 = vld [vmem:[#allocation13 + $0x318] sm:$0xff]  ;;  %v2299_v57 = vld [vmem:[#allocation13 + $0x9d0] sm:$0xff] }
 0x5c6   :  { %3173 = vmatpush2.msra.mxu1 %v2365_v59  ;;  %3110 = vmatpush2.msra.mxu0 %v2149_v29  ;;  %v2083_v56 = vld [vmem:[#allocation13 + $0x310] sm:$0xff]  ;;  %v2294_v59 = vld [vmem:[#allocation13 + $0x9a8] sm:$0xff]  ;;  %v2293_v29 = vld [vmem:[#allocation13 + $0x9a0] sm:$0xff] }
 0x5c7   :  { %3174 = vmatprep.subr.mxu1 %v2360_v61  ;;  %3111 = vmatprep.subr.mxu0 %v2144_v2  ;;  %v2462_v61 = vld [vmem:[#allocation13 + $0xee8] sm:$0xff]  ;;  %v2288_v2 = vld [vmem:[#allocation13 + $0x978] sm:$0xff] }
 0x5c8   :  { %3175 = vmatpush2.msra.mxu1 %v2359_v3  ;;  %3112 = vmatpush2.msra.mxu0 %v2143_v4  ;;  %v2461_v3 = vld [vmem:[#allocation13 + $0xee0] sm:$0xff]  ;;  %v2287_v4 = vld [vmem:[#allocation13 + $0x970] sm:$0xff] }
 0x5c9   :  { %3176 = vmatprep.subr.mxu1 %v2354_v5  ;;  %3113 = vmatprep.subr.mxu0 %v2138_v38  ;;  %v2456_v5 = vld [vmem:[#allocation13 + $0xeb8] sm:$0xff]  ;;  %v2282_v38 = vld [vmem:[#allocation13 + $0x948] sm:$0xff] }
 0x5ca   :  { %3177 = vmatpush2.msra.mxu1 %v2353_v62  ;;  %3114 = vmatpush2.msra.mxu0 %v2137_v46  ;;  %v2455_v62 = vld [vmem:[#allocation13 + $0xeb0] sm:$0xff]  ;;  %v2281_v46 = vld [vmem:[#allocation13 + $0x940] sm:$0xff] }
 0x5cb   :  { %3178 = vmatprep.subr.mxu1 %v2348_v7  ;;  %3115 = vmatprep.subr.mxu0 %v2132_v9  ;;  %v2450_v7 = vld [vmem:[#allocation13 + $0xe88] sm:$0xff]  ;;  %v2276_v9 = vld [vmem:[#allocation13 + $0x918] sm:$0xff] }
 0x5cc   :  { %3179 = vmatpush2.msra.mxu1 %v2347_v23  ;;  %3116 = vmatpush2.msra.mxu0 %v2131_v10  ;;  %v2449_v23 = vld [vmem:[#allocation13 + $0xe80] sm:$0xff]  ;;  %v2275_v10 = vld [vmem:[#allocation13 + $0x910] sm:$0xff] }
 0x5cd   :  { %3180 = vmatprep.subr.mxu1 %v2342_v11  ;;  %3117 = vmatprep.subr.mxu0 %v2126_v12  ;;  %v2444_v11 = vld [vmem:[#allocation13 + $0xe58] sm:$0xff]  ;;  %v2443_v12 = vld [vmem:[#allocation13 + $0xe50] sm:$0xff] }
 0x5ce   :  { %3181 = vmatpush2.msra.mxu1 %v2341_v13  ;;  %3118 = vmatpush2.msra.mxu0 %v2125_v14  ;;  %v2654_v13 = vld [vmem:[#allocation13 + $0x14e8] sm:$0xff] }
 0x5cf   :  { %3182 = vmatprep.subr.mxu1 %v2336_v15  ;;  %3119 = vmatprep.subr.mxu0 %v2120_v16  ;;  %v2438_v14 = vld [vmem:[#allocation13 + $0xe28] sm:$0xff]  ;;  %v2653_v15 = vld [vmem:[#allocation13 + $0x14e0] sm:$0xff] }
 0x5d0   :  { %3183 = vmatpush2.msra.mxu1 %v2335_v18  ;;  %3120 = vmatpush2.msra.mxu0 %v2119_v20  ;;  %v2437_v16 = vld [vmem:[#allocation13 + $0xe20] sm:$0xff]  ;;  %v2648_v18 = vld [vmem:[#allocation13 + $0x14b8] sm:$0xff] }
 0x5d1   :  { %3184 = vmatprep.subr.mxu1 %v2330_v39  ;;  %3121 = vmatprep.subr.mxu0 %v2114_v47  ;;  %v2432_v20 = vld [vmem:[#allocation13 + $0xdf8] sm:$0xff]  ;;  %v2647_v39 = vld [vmem:[#allocation13 + $0x14b0] sm:$0xff] }
 0x5d2   :  { %3185 = vmatpush2.msra.mxu1 %v2329_v24  ;;  %3122 = vmatpush2.msra.mxu0 %v2113_v58  ;;  %v2431_v47 = vld [vmem:[#allocation13 + $0xdf0] sm:$0xff]  ;;  %v2642_v24 = vld [vmem:[#allocation13 + $0x1488] sm:$0xff] }
 0x5d3   :  { %3186 = vmatprep.subr.mxu1 %v2324_v33  ;;  %3123 = vmatprep.subr.mxu0 %v2108_v34  ;;  %v2426_v58 = vld [vmem:[#allocation13 + $0xdc8] sm:$0xff]  ;;  %v2641_v33 = vld [vmem:[#allocation13 + $0x1480] sm:$0xff] }
 0x5d4   :  { %3187 = vmatpush2.msra.mxu1 %v2323_v35  ;;  %3124 = vmatpush2.msra.mxu0 %v2107_v53  ;;  %v2425_v34 = vld [vmem:[#allocation13 + $0xdc0] sm:$0xff]  ;;  %v2636_v35 = vld [vmem:[#allocation13 + $0x1458] sm:$0xff] }
 0x5d5   :  { %3188 = vmatprep.subr.mxu1 %v2318_v36  ;;  %3125 = vmatprep.subr.mxu0 %v2102_v37  ;;  %v2420_v53 = vld [vmem:[#allocation13 + $0xd98] sm:$0xff]  ;;  %v2635_v36 = vld [vmem:[#allocation13 + $0x1450] sm:$0xff] }
 0x5d6   :  { %3189 = vmatpush2.msra.mxu1 %v2317_v40  ;;  %3126 = vmatpush2.msra.mxu0 %v2101_v41  ;;  %v2419_v37 = vld [vmem:[#allocation13 + $0xd90] sm:$0xff]  ;;  %v2630_v40 = vld [vmem:[#allocation13 + $0x1428] sm:$0xff] }
 0x5d7   :  { %3190 = vmatprep.subr.mxu1 %v2312_v42  ;;  %3127 = vmatprep.subr.mxu0 %v2096_v43  ;;  %v2414_v41 = vld [vmem:[#allocation13 + $0xd68] sm:$0xff]  ;;  %v2629_v42 = vld [vmem:[#allocation13 + $0x1420] sm:$0xff] }
 0x5d8   :  { %3191 = vmatpush2.msra.mxu1 %v2311_v44  ;;  %3128 = vmatpush2.msra.mxu0 %v2095_v45  ;;  %v2413_v43 = vld [vmem:[#allocation13 + $0xd60] sm:$0xff]  ;;  %v2624_v44 = vld [vmem:[#allocation13 + $0x13f8] sm:$0xff] }
 0x5d9   :  { %3192 = vmatprep.subr.mxu1 %v2306_v48  ;;  %3129 = vmatprep.subr.mxu0 %v2090_v49  ;;  %v2408_v45 = vld [vmem:[#allocation13 + $0xd38] sm:$0xff]  ;;  %v2623_v48 = vld [vmem:[#allocation13 + $0x13f0] sm:$0xff] }
 0x5da   :  { %3193 = vmatpush2.msra.mxu1 %v2305_v50  ;;  %3130 = vmatpush2.msra.mxu0 %v2089_v52  ;;  %v2407_v49 = vld [vmem:[#allocation13 + $0xd30] sm:$0xff]  ;;  %v2618_v50 = vld [vmem:[#allocation13 + $0x13c8] sm:$0xff] }
 0x5db   :  { %3194 = vmatprep.subr.mxu1 %v2300_v54  ;;  %3131 = vmatprep.subr.mxu0 %v2084_v55  ;;  %v2402_v52 = vld [vmem:[#allocation13 + $0xd08] sm:$0xff]  ;;  %v2617_v54 = vld [vmem:[#allocation13 + $0x13c0] sm:$0xff] }
 0x5dc   :  { %3195 = vmatpush2.msra.mxu1 %v2299_v57  ;;  %3132 = vmatpush2.msra.mxu0 %v2083_v56  ;;  %v2401_v55 = vld [vmem:[#allocation13 + $0xd00] sm:$0xff]  ;;  %v2612_v57 = vld [vmem:[#allocation13 + $0x1398] sm:$0xff] }
 0x5dd   :  { %3196 = vmatprep.subr.mxu1 %v2294_v59  ;;  %3134 = vmatmul.mubr.f32.vlgmr.msra.gmra.mxu0 %v6992_v1  ;;  %v2396_v56 = vld [vmem:[#allocation13 + $0xcd8] sm:$0xff]  ;;  %v2611_v59 = vld [vmem:[#allocation13 + $0x1390] sm:$0xff] }
 0x5de   :  { %3197 = vmatpush2.msra.mxu1 %v2293_v29  ;;  %3211 = vmatprep.subr.mxu0 %v2462_v61  ;;  %v2395_v29 = vld [vmem:[#allocation13 + $0xcd0] sm:$0xff]  ;;  %v2606_v61 = vld [vmem:[#allocation13 + $0x1368] sm:$0xff] }
 0x5df   :  { %3198 = vmatprep.subr.mxu1 %v2288_v2  ;;  %3212 = vmatpush1.msra.mxu0 %v2461_v3  ;;  %v2390_v2 = vld [vmem:[#allocation13 + $0xca8] sm:$0xff]  ;;  %v2605_v3 = vld [vmem:[#allocation13 + $0x1360] sm:$0xff] }
 0x5e0   :  { %3275 = vmatprep.mubr.f32.mxu0 %v7019_v51  ;;  %3199 = vmatpush2.msra.mxu1 %v2287_v4  ;;  %v2389_v4 = vld [vmem:[#allocation13 + $0xca0] sm:$0xff] }
 0x5e1   :  { %3213 = vmatprep.subr.mxu0 %v2456_v5  ;;  %3200 = vmatprep.subr.mxu1 %v2282_v38  ;;  %v2600_v5 = vld [vmem:[#allocation13 + $0x1338] sm:$0xff] }
 0x5e2   :  { %3214 = vmatpush1.msra.mxu0 %v2455_v62  ;;  %3201 = vmatpush2.msra.mxu1 %v2281_v46  ;;  %v2384_v38 = vld [vmem:[#allocation13 + $0xc78] sm:$0xff]  ;;  %v2599_v62 = vld [vmem:[#allocation13 + $0x1330] sm:$0xff] }
 0x5e3   :  { %3215 = vmatprep.subr.mxu0 %v2450_v7  ;;  %3202 = vmatprep.subr.mxu1 %v2276_v9  ;;  %v2383_v46 = vld [vmem:[#allocation13 + $0xc70] sm:$0xff]  ;;  %v2594_v7 = vld [vmem:[#allocation13 + $0x1308] sm:$0xff] }
 0x5e4   :  { %3216 = vmatpush1.msra.mxu0 %v2449_v23  ;;  %3203 = vmatpush2.msra.mxu1 %v2275_v10  ;;  %v2378_v9 = vld [vmem:[#allocation13 + $0xc48] sm:$0xff]  ;;  %v2593_v23 = vld [vmem:[#allocation13 + $0x1300] sm:$0xff] }
 0x5e5   :  { %3217 = vmatprep.subr.mxu0 %v2444_v11  ;;  %3205 = vmatmul.mubr.f32.vlgmr.msra.gmra.mxu1 %v7007_v22  ;;  %v2377_v10 = vld [vmem:[#allocation13 + $0xc40] sm:$0xff]  ;;  %v2588_v11 = vld [vmem:[#allocation13 + $0x12d8] sm:$0xff] }
 0x5e6   :  { %3218 = vmatpush1.msra.mxu0 %v2443_v12  ;;  %3282 = vmatprep.subr.mxu1 %v2654_v13  ;;  %v2372_v12 = vld [vmem:[#allocation13 + $0xc18] sm:$0xff]  ;;  %v2587_v13 = vld [vmem:[#allocation13 + $0x12d0] sm:$0xff] }
 0x5e7   :  { %3219 = vmatprep.subr.mxu0 %v2438_v14  ;;  %3283 = vmatpush1.msra.mxu1 %v2653_v15  ;;  %v2371_v14 = vld [vmem:[#allocation13 + $0xc10] sm:$0xff]  ;;  %v2582_v15 = vld [vmem:[#allocation13 + $0x12a8] sm:$0xff] }
 0x5e8   :  { %3346 = vmatprep.mubr.f32.mxu1 %v7012_v32  ;;  %3220 = vmatpush1.msra.mxu0 %v2437_v16  ;;  %v2558_v16 = vld [vmem:[#allocation13 + $0x11e8] sm:$0xff] }
 0x5e9   :  { %3284 = vmatprep.subr.mxu1 %v2648_v18  ;;  %3221 = vmatprep.subr.mxu0 %v2432_v20  ;;  %v2581_v18 = vld [vmem:[#allocation13 + $0x12a0] sm:$0xff] }
 0x5ea   :  { %3285 = vmatpush1.msra.mxu1 %v2647_v39  ;;  %3222 = vmatpush1.msra.mxu0 %v2431_v47  ;;  %v2557_v20 = vld [vmem:[#allocation13 + $0x11e0] sm:$0xff]  ;;  %v2576_v39 = vld [vmem:[#allocation13 + $0x1278] sm:$0xff] }
 0x5eb   :  { %3286 = vmatprep.subr.mxu1 %v2642_v24  ;;  %3223 = vmatprep.subr.mxu0 %v2426_v58  ;;  %v2552_v47 = vld [vmem:[#allocation13 + $0x11b8] sm:$0xff]  ;;  %v2575_v24 = vld [vmem:[#allocation13 + $0x1270] sm:$0xff] }
 0x5ec   :  { %3287 = vmatpush1.msra.mxu1 %v2641_v33  ;;  %3224 = vmatpush1.msra.mxu0 %v2425_v34  ;;  %v2551_v58 = vld [vmem:[#allocation13 + $0x11b0] sm:$0xff]  ;;  %v2570_v33 = vld [vmem:[#allocation13 + $0x1248] sm:$0xff] }
 0x5ed   :  { %3288 = vmatprep.subr.mxu1 %v2636_v35  ;;  %3225 = vmatprep.subr.mxu0 %v2420_v53  ;;  %v2546_v34 = vld [vmem:[#allocation13 + $0x1188] sm:$0xff]  ;;  %v2569_v35 = vld [vmem:[#allocation13 + $0x1240] sm:$0xff] }
 0x5ee   :  { %3289 = vmatpush1.msra.mxu1 %v2635_v36  ;;  %3226 = vmatpush1.msra.mxu0 %v2419_v37  ;;  %v2545_v53 = vld [vmem:[#allocation13 + $0x1180] sm:$0xff]  ;;  %v2564_v36 = vld [vmem:[#allocation13 + $0x1218] sm:$0xff] }
 0x5ef   :  { %3290 = vmatprep.subr.mxu1 %v2630_v40  ;;  %3227 = vmatprep.subr.mxu0 %v2414_v41  ;;  %v2540_v37 = vld [vmem:[#allocation13 + $0x1158] sm:$0xff]  ;;  %v2563_v40 = vld [vmem:[#allocation13 + $0x1210] sm:$0xff] }
 0x5f0   :  { %3291 = vmatpush1.msra.mxu1 %v2629_v42  ;;  %3228 = vmatpush1.msra.mxu0 %v2413_v43  ;;  %v2539_v41 = vld [vmem:[#allocation13 + $0x1150] sm:$0xff]  ;;  %v2750_v42 = vld [vmem:[#allocation13 + $0x17e8] sm:$0xff] }
 0x5f1   :  { %3292 = vmatprep.subr.mxu1 %v2624_v44  ;;  %3229 = vmatprep.subr.mxu0 %v2408_v45  ;;  %v2534_v43 = vld [vmem:[#allocation13 + $0x1128] sm:$0xff]  ;;  %v2749_v44 = vld [vmem:[#allocation13 + $0x17e0] sm:$0xff] }
 0x5f2   :  { %3293 = vmatpush1.msra.mxu1 %v2623_v48  ;;  %3230 = vmatpush1.msra.mxu0 %v2407_v49  ;;  %v2533_v45 = vld [vmem:[#allocation13 + $0x1120] sm:$0xff]  ;;  %v2744_v48 = vld [vmem:[#allocation13 + $0x17b8] sm:$0xff] }
 0x5f3   :  { %3294 = vmatprep.subr.mxu1 %v2618_v50  ;;  %3231 = vmatprep.subr.mxu0 %v2402_v52  ;;  %v2528_v49 = vld [vmem:[#allocation13 + $0x10f8] sm:$0xff]  ;;  %v2743_v50 = vld [vmem:[#allocation13 + $0x17b0] sm:$0xff] }
 0x5f4   :  { %3295 = vmatpush1.msra.mxu1 %v2617_v54  ;;  %3232 = vmatpush1.msra.mxu0 %v2401_v55  ;;  %v2527_v52 = vld [vmem:[#allocation13 + $0x10f0] sm:$0xff]  ;;  %v2738_v54 = vld [vmem:[#allocation13 + $0x1788] sm:$0xff] }
 0x5f5   :  { %3296 = vmatprep.subr.mxu1 %v2612_v57  ;;  %3233 = vmatprep.subr.mxu0 %v2396_v56  ;;  %v2522_v55 = vld [vmem:[#allocation13 + $0x10c8] sm:$0xff]  ;;  %v2737_v57 = vld [vmem:[#allocation13 + $0x1780] sm:$0xff] }
 0x5f6   :  { %3297 = vmatpush1.msra.mxu1 %v2611_v59  ;;  %3234 = vmatpush1.msra.mxu0 %v2395_v29  ;;  %v2521_v56 = vld [vmem:[#allocation13 + $0x10c0] sm:$0xff]  ;;  %v2732_v59 = vld [vmem:[#allocation13 + $0x1758] sm:$0xff] }
 0x5f7   :  { %3298 = vmatprep.subr.mxu1 %v2606_v61  ;;  %3235 = vmatprep.subr.mxu0 %v2390_v2  ;;  %v2516_v29 = vld [vmem:[#allocation13 + $0x1098] sm:$0xff]  ;;  %v2731_v61 = vld [vmem:[#allocation13 + $0x1750] sm:$0xff] }
 0x5f8   :  { %3299 = vmatpush1.msra.mxu1 %v2605_v3  ;;  %3236 = vmatpush1.msra.mxu0 %v2389_v4  ;;  %v2515_v2 = vld [vmem:[#allocation13 + $0x1090] sm:$0xff]  ;;  %v2726_v3 = vld [vmem:[#allocation13 + $0x1728] sm:$0xff] }
 0x5f9   :  { %3300 = vmatprep.subr.mxu1 %v2600_v5  ;;  %3237 = vmatprep.subr.mxu0 %v2384_v38  ;;  %v2510_v4 = vld [vmem:[#allocation13 + $0x1068] sm:$0xff]  ;;  %v2725_v5 = vld [vmem:[#allocation13 + $0x1720] sm:$0xff] }
 0x5fa   :  { %3301 = vmatpush1.msra.mxu1 %v2599_v62  ;;  %3238 = vmatpush1.msra.mxu0 %v2383_v46  ;;  %v2509_v38 = vld [vmem:[#allocation13 + $0x1060] sm:$0xff]  ;;  %v2720_v62 = vld [vmem:[#allocation13 + $0x16f8] sm:$0xff] }
 0x5fb   :  { %3302 = vmatprep.subr.mxu1 %v2594_v7  ;;  %3239 = vmatprep.subr.mxu0 %v2378_v9  ;;  %v2504_v46 = vld [vmem:[#allocation13 + $0x1038] sm:$0xff]  ;;  %v2719_v7 = vld [vmem:[#allocation13 + $0x16f0] sm:$0xff] }
 0x5fc   :  { %3303 = vmatpush1.msra.mxu1 %v2593_v23  ;;  %3240 = vmatpush1.msra.mxu0 %v2377_v10  ;;  %v2503_v9 = vld [vmem:[#allocation13 + $0x1030] sm:$0xff]  ;;  %v2714_v23 = vld [vmem:[#allocation13 + $0x16c8] sm:$0xff] }
 0x5fd   :  { %3304 = vmatprep.subr.mxu1 %v2588_v11  ;;  %3241 = vmatprep.subr.mxu0 %v2372_v12  ;;  %v2498_v10 = vld [vmem:[#allocation13 + $0x1008] sm:$0xff]  ;;  %v2713_v11 = vld [vmem:[#allocation13 + $0x16c0] sm:$0xff] }
 0x5fe   :  { %3305 = vmatpush1.msra.mxu1 %v2587_v13  ;;  %3242 = vmatpush1.msra.mxu0 %v2371_v14  ;;  %v2497_v12 = vld [vmem:[#allocation13 + $0x1000] sm:$0xff]  ;;  %v2708_v13 = vld [vmem:[#allocation13 + $0x1698] sm:$0xff] }
 0x5ff   :  { %3306 = vmatprep.subr.mxu1 %v2582_v15  ;;  %3243 = vmatprep.subr.mxu0 %v2558_v16  ;;  %v2492_v14 = vld [vmem:[#allocation13 + $0xfd8] sm:$0xff]  ;;  %v2707_v15 = vld [vmem:[#allocation13 + $0x1690] sm:$0xff] }
 0x600   :  { %3307 = vmatpush1.msra.mxu1 %v2581_v18  ;;  %3244 = vmatpush2.msra.mxu0 %v2557_v20  ;;  %v2491_v16 = vld [vmem:[#allocation13 + $0xfd0] sm:$0xff]  ;;  %v2702_v18 = vld [vmem:[#allocation13 + $0x1668] sm:$0xff] }
 0x601   :  { %3308 = vmatprep.subr.mxu1 %v2576_v39  ;;  %3245 = vmatprep.subr.mxu0 %v2552_v47  ;;  %v2486_v20 = vld [vmem:[#allocation13 + $0xfa8] sm:$0xff]  ;;  %v2701_v39 = vld [vmem:[#allocation13 + $0x1660] sm:$0xff] }
 0x602   :  { %3309 = vmatpush1.msra.mxu1 %v2575_v24  ;;  %3246 = vmatpush2.msra.mxu0 %v2551_v58  ;;  %v2485_v47 = vld [vmem:[#allocation13 + $0xfa0] sm:$0xff]  ;;  %v2696_v24 = vld [vmem:[#allocation13 + $0x1638] sm:$0xff] }
 0x603   :  { %3310 = vmatprep.subr.mxu1 %v2570_v33  ;;  %3247 = vmatprep.subr.mxu0 %v2546_v34  ;;  %v2480_v58 = vld [vmem:[#allocation13 + $0xf78] sm:$0xff]  ;;  %v2695_v33 = vld [vmem:[#allocation13 + $0x1630] sm:$0xff] }
 0x604   :  { %3311 = vmatpush1.msra.mxu1 %v2569_v35  ;;  %3248 = vmatpush2.msra.mxu0 %v2545_v53  ;;  %v2479_v34 = vld [vmem:[#allocation13 + $0xf70] sm:$0xff]  ;;  %v2690_v35 = vld [vmem:[#allocation13 + $0x1608] sm:$0xff] }
 0x605   :  { %3312 = vmatprep.subr.mxu1 %v2564_v36  ;;  %3249 = vmatprep.subr.mxu0 %v2540_v37  ;;  %v2474_v53 = vld [vmem:[#allocation13 + $0xf48] sm:$0xff]  ;;  %v2689_v36 = vld [vmem:[#allocation13 + $0x1600] sm:$0xff] }
 0x606   :  { %3313 = vmatpush1.msra.mxu1 %v2563_v40  ;;  %3250 = vmatpush2.msra.mxu0 %v2539_v41  ;;  %v2473_v37 = vld [vmem:[#allocation13 + $0xf40] sm:$0xff]  ;;  %v2684_v40 = vld [vmem:[#allocation13 + $0x15d8] sm:$0xff] }
 0x607   :  { %3314 = vmatprep.subr.mxu1 %v2750_v42  ;;  %3251 = vmatprep.subr.mxu0 %v2534_v43  ;;  %v2468_v41 = vld [vmem:[#allocation13 + $0xf18] sm:$0xff]  ;;  %v2683_v42 = vld [vmem:[#allocation13 + $0x15d0] sm:$0xff] }
 0x608   :  { %3315 = vmatpush2.msra.mxu1 %v2749_v44  ;;  %3252 = vmatpush2.msra.mxu0 %v2533_v45  ;;  %v2467_v43 = vld [vmem:[#allocation13 + $0xf10] sm:$0xff]  ;;  %v2678_v44 = vld [vmem:[#allocation13 + $0x15a8] sm:$0xff]  ;;  %v2677_v45 = vld [vmem:[#allocation13 + $0x15a0] sm:$0xff] }
 0x609   :  { %3316 = vmatprep.subr.mxu1 %v2744_v48  ;;  %3253 = vmatprep.subr.mxu0 %v2528_v49  ;;  %v2080_v48 = vld [vmem:[#allocation13 + $0x2f8] sm:$0xff] }
 0x60a   :  { %3317 = vmatpush2.msra.mxu1 %v2743_v50  ;;  %3254 = vmatpush2.msra.mxu0 %v2527_v52  ;;  %v2672_v49 = vld [vmem:[#allocation13 + $0x1578] sm:$0xff]  ;;  %v2079_v50 = vld [vmem:[#allocation13 + $0x2f0] sm:$0xff] }
 0x60b   :  { %3318 = vmatprep.subr.mxu1 %v2738_v54  ;;  %3255 = vmatprep.subr.mxu0 %v2522_v55  ;;  %v2671_v52 = vld [vmem:[#allocation13 + $0x1570] sm:$0xff]  ;;  %v2074_v54 = vld [vmem:[#allocation13 + $0x2c8] sm:$0xff] }
 0x60c   :  { %3319 = vmatpush2.msra.mxu1 %v2737_v57  ;;  %3256 = vmatpush2.msra.mxu0 %v2521_v56  ;;  %v2666_v55 = vld [vmem:[#allocation13 + $0x1548] sm:$0xff]  ;;  %v2073_v57 = vld [vmem:[#allocation13 + $0x2c0] sm:$0xff] }
 0x60d   :  { %3320 = vmatprep.subr.mxu1 %v2732_v59  ;;  %3257 = vmatprep.subr.mxu0 %v2516_v29  ;;  %v2665_v56 = vld [vmem:[#allocation13 + $0x1540] sm:$0xff]  ;;  %v2068_v59 = vld [vmem:[#allocation13 + $0x298] sm:$0xff] }
 0x60e   :  { %3321 = vmatpush2.msra.mxu1 %v2731_v61  ;;  %3258 = vmatpush2.msra.mxu0 %v2515_v2  ;;  %v2660_v29 = vld [vmem:[#allocation13 + $0x1518] sm:$0xff]  ;;  %v2067_v61 = vld [vmem:[#allocation13 + $0x290] sm:$0xff] }
 0x60f   :  { %3322 = vmatprep.subr.mxu1 %v2726_v3  ;;  %3259 = vmatprep.subr.mxu0 %v2510_v4  ;;  %v2659_v2 = vld [vmem:[#allocation13 + $0x1510] sm:$0xff]  ;;  %v2062_v3 = vld [vmem:[#allocation13 + $0x268] sm:$0xff]  ;;  %v2061_v4 = vld [vmem:[#allocation13 + $0x260] sm:$0xff] }
 0x610   :  { %3323 = vmatpush2.msra.mxu1 %v2725_v5  ;;  %3260 = vmatpush2.msra.mxu0 %v2509_v38  ;;  %v2272_v5 = vld [vmem:[#allocation13 + $0x8f8] sm:$0xff] }
 0x611   :  { %3324 = vmatprep.subr.mxu1 %v2720_v62  ;;  %3261 = vmatprep.subr.mxu0 %v2504_v46  ;;  %v2056_v38 = vld [vmem:[#allocation13 + $0x238] sm:$0xff]  ;;  %v2271_v62 = vld [vmem:[#allocation13 + $0x8f0] sm:$0xff]  ;;  %v2266_v46 = vld [vmem:[#allocation13 + $0x8c8] sm:$0xff] }
 0x612   :  { %3325 = vmatpush2.msra.mxu1 %v2719_v7  ;;  %3262 = vmatpush2.msra.mxu0 %v2503_v9  ;;  %v2050_v7 = vld [vmem:[#allocation13 + $0x208] sm:$0xff]  ;;  %v2265_v9 = vld [vmem:[#allocation13 + $0x8c0] sm:$0xff] }
 0x613   :  { %3326 = vmatprep.subr.mxu1 %v2714_v23  ;;  %3263 = vmatprep.subr.mxu0 %v2498_v10  ;;  %v2049_v23 = vld [vmem:[#allocation13 + $0x200] sm:$0xff]  ;;  %v2260_v10 = vld [vmem:[#allocation13 + $0x898] sm:$0xff] }
 0x614   :  { %3327 = vmatpush2.msra.mxu1 %v2713_v11  ;;  %3264 = vmatpush2.msra.mxu0 %v2497_v12  ;;  %v2044_v11 = vld [vmem:[#allocation13 + $0x1d8] sm:$0xff]  ;;  %v2259_v12 = vld [vmem:[#allocation13 + $0x890] sm:$0xff] }
 0x615   :  { %3328 = vmatprep.subr.mxu1 %v2708_v13  ;;  %3265 = vmatprep.subr.mxu0 %v2492_v14  ;;  %v2043_v13 = vld [vmem:[#allocation13 + $0x1d0] sm:$0xff]  ;;  %v2254_v14 = vld [vmem:[#allocation13 + $0x868] sm:$0xff] }
 0x616   :  { %3329 = vmatpush2.msra.mxu1 %v2707_v15  ;;  %3266 = vmatpush2.msra.mxu0 %v2491_v16  ;;  %v2038_v15 = vld [vmem:[#allocation13 + $0x1a8] sm:$0xff]  ;;  %v2253_v16 = vld [vmem:[#allocation13 + $0x860] sm:$0xff] }
 0x617   :  { %3330 = vmatprep.subr.mxu1 %v2702_v18  ;;  %3267 = vmatprep.subr.mxu0 %v2486_v20  ;;  %v2037_v18 = vld [vmem:[#allocation13 + $0x1a0] sm:$0xff]  ;;  %v2248_v20 = vld [vmem:[#allocation13 + $0x838] sm:$0xff] }
 0x618   :  { %3331 = vmatpush2.msra.mxu1 %v2701_v39  ;;  %3268 = vmatpush2.msra.mxu0 %v2485_v47  ;;  %v2032_v39 = vld [vmem:[#allocation13 + $0x178] sm:$0xff]  ;;  %v2031_v47 = vld [vmem:[#allocation13 + $0x170] sm:$0xff] }
 0x619   :  { %3332 = vmatprep.subr.mxu1 %v2696_v24  ;;  %3269 = vmatprep.subr.mxu0 %v2480_v58  ;;  %v2242_v24 = vld [vmem:[#allocation13 + $0x808] sm:$0xff] }
 0x61a   :  { %3333 = vmatpush2.msra.mxu1 %v2695_v33  ;;  %3270 = vmatpush2.msra.mxu0 %v2479_v34  ;;  %v2026_v58 = vld [vmem:[#allocation13 + $0x148] sm:$0xff]  ;;  %v2241_v33 = vld [vmem:[#allocation13 + $0x800] sm:$0xff] }
 0x61b   :  { %3334 = vmatprep.subr.mxu1 %v2690_v35  ;;  %3271 = vmatprep.subr.mxu0 %v2474_v53  ;;  %v2025_v34 = vld [vmem:[#allocation13 + $0x140] sm:$0xff]  ;;  %v2236_v35 = vld [vmem:[#allocation13 + $0x7d8] sm:$0xff] }
 0x61c   :  { %3335 = vmatpush2.msra.mxu1 %v2689_v36  ;;  %3272 = vmatpush2.msra.mxu0 %v2473_v37  ;;  %v2020_v53 = vld [vmem:[#allocation13 + $0x118] sm:$0xff]  ;;  %v2235_v36 = vld [vmem:[#allocation13 + $0x7d0] sm:$0xff] }
 0x61d   :  { %3336 = vmatprep.subr.mxu1 %v2684_v40  ;;  %3273 = vmatprep.subr.mxu0 %v2468_v41  ;;  %v2019_v37 = vld [vmem:[#allocation13 + $0x110] sm:$0xff]  ;;  %v2230_v40 = vld [vmem:[#allocation13 + $0x7a8] sm:$0xff] }
 0x61e   :  { %3337 = vmatpush2.msra.mxu1 %v2683_v42  ;;  %3274 = vmatpush2.msra.mxu0 %v2467_v43  ;;  %v2014_v41 = vld [vmem:[#allocation13 + $0xe8] sm:$0xff]  ;;  %v2229_v42 = vld [vmem:[#allocation13 + $0x7a0] sm:$0xff] }
 0x61f   :  { %3338 = vmatprep.subr.mxu1 %v2678_v44  ;;  %3276 = vmatmul.mubr.f32.vlgmr.msra.gmra.mxu0 %v7029_v6  ;;  %v2013_v43 = vld [vmem:[#allocation13 + $0xe0] sm:$0xff]  ;;  %v2224_v44 = vld [vmem:[#allocation13 + $0x778] sm:$0xff] }
 0x620   :  { %3339 = vmatpush2.msra.mxu1 %v2677_v45  ;;  %3353 = vmatprep.subr.mxu0 %v2080_v48  ;;  %v2008_v45 = vld [vmem:[#allocation13 + $0xb8] sm:$0xff]  ;;  %v2223_v48 = vld [vmem:[#allocation13 + $0x770] sm:$0xff] }
 0x621   :  { %3340 = vmatprep.subr.mxu1 %v2672_v49  ;;  %3354 = vmatpush1.msra.mxu0 %v2079_v50  ;;  %v2007_v49 = vld [vmem:[#allocation13 + $0xb0] sm:$0xff]  ;;  %v2218_v50 = vld [vmem:[#allocation13 + $0x748] sm:$0xff] }
 0x622   :  { %3417 = vmatprep.mubr.f32.mxu0 %v6990_v60  ;;  %3341 = vmatpush2.msra.mxu1 %v2671_v52  ;;  %v2055_v60 = vld [vmem:[#allocation13 + $0x230] sm:$0xff]  ;;  %v2002_v52 = vld [vmem:[#allocation13 + $0x88] sm:$0xff] }
 0x623   :  { %3355 = vmatprep.subr.mxu0 %v2074_v54  ;;  %3342 = vmatprep.subr.mxu1 %v2666_v55  ;;  %v2217_v54 = vld [vmem:[#allocation13 + $0x740] sm:$0xff] }
 0x624   :  { %3356 = vmatpush1.msra.mxu0 %v2073_v57  ;;  %3343 = vmatpush2.msra.mxu1 %v2665_v56  ;;  %v2001_v55 = vld [vmem:[#allocation13 + $0x80] sm:$0xff]  ;;  %v2212_v57 = vld [vmem:[#allocation13 + $0x718] sm:$0xff] }
 0x625   :  { %3357 = vmatprep.subr.mxu0 %v2068_v59  ;;  %3344 = vmatprep.subr.mxu1 %v2660_v29  ;;  %v1996_v56 = vld [vmem:[#allocation13 + $0x58] sm:$0xff]  ;;  %v2211_v59 = vld [vmem:[#allocation13 + $0x710] sm:$0xff] }
 0x626   :  { %3358 = vmatpush1.msra.mxu0 %v2067_v61  ;;  %3345 = vmatpush2.msra.mxu1 %v2659_v2  ;;  %v1995_v29 = vld [vmem:[#allocation13 + $0x50] sm:$0xff]  ;;  %v2206_v61 = vld [vmem:[#allocation13 + $0x6e8] sm:$0xff] }
 0x627   :  { %3359 = vmatprep.subr.mxu0 %v2062_v3  ;;  %3347 = vmatmul.mubr.f32.vlgmr.msra.gmra.mxu1 %v7036_v63  ;;  %v1990_v2 = vld [vmem:[#allocation13 + $0x28] sm:$0xff]  ;;  %v2205_v3 = vld [vmem:[#allocation13 + $0x6e0] sm:$0xff] }
 0x628   :  { %3360 = vmatpush1.msra.mxu0 %v2061_v4  ;;  %3424 = vmatprep.subr.mxu1 %v2272_v5  ;;  %v1989_v4 = vld [vmem:[#allocation13 + $0x20] sm:$0xff]  ;;  %v2200_v5 = vld [vmem:[#allocation13 + $0x6b8] sm:$0xff] }
 0x629   :  { %3361 = vmatprep.subr.mxu0 %v2056_v38  ;;  %3425 = vmatpush1.msra.mxu1 %v2271_v62  ;;  %v2176_v38 = vld [vmem:[#allocation13 + $0x5f8] sm:$0xff]  ;;  %v2199_v62 = vld [vmem:[#allocation13 + $0x6b0] sm:$0xff] }
 0x62a   :  { %3488 = vmatprep.mubr.f32.mxu1 %v7004_v19  ;;  %3362 = vmatpush1.msra.mxu0 %v2055_v60  ;;  %v2247_v19 = vld [vmem:[#allocation13 + $0x830] sm:$0xff] }
 0x62b   :  { %3426 = vmatprep.subr.mxu1 %v2266_v46  ;;  %3363 = vmatprep.subr.mxu0 %v2050_v7  ;;  %v2175_v60 = vld [vmem:[#allocation13 + $0x5f0] sm:$0xff]  ;;  %v2194_v46 = vld [vmem:[#allocation13 + $0x688] sm:$0xff] }
 0x62c   :  { %3427 = vmatpush1.msra.mxu1 %v2265_v9  ;;  %3364 = vmatpush1.msra.mxu0 %v2049_v23  ;;  %v2170_v7 = vld [vmem:[#allocation13 + $0x5c8] sm:$0xff]  ;;  %v2193_v9 = vld [vmem:[#allocation13 + $0x680] sm:$0xff] }
 0x62d   :  { %3428 = vmatprep.subr.mxu1 %v2260_v10  ;;  %3365 = vmatprep.subr.mxu0 %v2044_v11  ;;  %v2169_v23 = vld [vmem:[#allocation13 + $0x5c0] sm:$0xff]  ;;  %v2188_v10 = vld [vmem:[#allocation13 + $0x658] sm:$0xff] }
 0x62e   :  { %3429 = vmatpush1.msra.mxu1 %v2259_v12  ;;  %3366 = vmatpush1.msra.mxu0 %v2043_v13  ;;  %v2164_v11 = vld [vmem:[#allocation13 + $0x598] sm:$0xff]  ;;  %v2187_v12 = vld [vmem:[#allocation13 + $0x650] sm:$0xff] }
 0x62f   :  { %3430 = vmatprep.subr.mxu1 %v2254_v14  ;;  %3367 = vmatprep.subr.mxu0 %v2038_v15  ;;  %v2163_v13 = vld [vmem:[#allocation13 + $0x590] sm:$0xff]  ;;  %v2182_v14 = vld [vmem:[#allocation13 + $0x628] sm:$0xff] }
 0x630   :  { %3431 = vmatpush1.msra.mxu1 %v2253_v16  ;;  %3368 = vmatpush1.msra.mxu0 %v2037_v18  ;;  %v2158_v15 = vld [vmem:[#allocation13 + $0x568] sm:$0xff]  ;;  %v2181_v16 = vld [vmem:[#allocation13 + $0x620] sm:$0xff] }
 0x631   :  { %3432 = vmatprep.subr.mxu1 %v2248_v20  ;;  %3369 = vmatprep.subr.mxu0 %v2032_v39  ;;  %v2157_v18 = vld [vmem:[#allocation13 + $0x560] sm:$0xff]  ;;  %v2368_v20 = vld [vmem:[#allocation13 + $0xbf8] sm:$0xff] }
 0x632   :  { %3433 = vmatpush1.msra.mxu1 %v2247_v19  ;;  %3370 = vmatpush1.msra.mxu0 %v2031_v47  ;;  %v2152_v39 = vld [vmem:[#allocation13 + $0x538] sm:$0xff]  ;;  %v2367_v19 = vld [vmem:[#allocation13 + $0xbf0] sm:$0xff] }
 0x633   :  { %3434 = vmatprep.subr.mxu1 %v2242_v24  ;;  %3371 = vmatprep.subr.mxu0 %v2026_v58  ;;  %v2151_v47 = vld [vmem:[#allocation13 + $0x530] sm:$0xff]  ;;  %v2362_v24 = vld [vmem:[#allocation13 + $0xbc8] sm:$0xff] }
 0x634   :  { %3435 = vmatpush1.msra.mxu1 %v2241_v33  ;;  %3372 = vmatpush1.msra.mxu0 %v2025_v34  ;;  %v2146_v58 = vld [vmem:[#allocation13 + $0x508] sm:$0xff]  ;;  %v2361_v33 = vld [vmem:[#allocation13 + $0xbc0] sm:$0xff] }
 0x635   :  { %3436 = vmatprep.subr.mxu1 %v2236_v35  ;;  %3373 = vmatprep.subr.mxu0 %v2020_v53  ;;  %v2145_v34 = vld [vmem:[#allocation13 + $0x500] sm:$0xff]  ;;  %v2356_v35 = vld [vmem:[#allocation13 + $0xb98] sm:$0xff] }
 0x636   :  { %3437 = vmatpush1.msra.mxu1 %v2235_v36  ;;  %3374 = vmatpush1.msra.mxu0 %v2019_v37  ;;  %v2140_v53 = vld [vmem:[#allocation13 + $0x4d8] sm:$0xff]  ;;  %v2355_v36 = vld [vmem:[#allocation13 + $0xb90] sm:$0xff] }
 0x637   :  { %3438 = vmatprep.subr.mxu1 %v2230_v40  ;;  %3375 = vmatprep.subr.mxu0 %v2014_v41  ;;  %v2139_v37 = vld [vmem:[#allocation13 + $0x4d0] sm:$0xff]  ;;  %v2350_v40 = vld [vmem:[#allocation13 + $0xb68] sm:$0xff] }
 0x638   :  { %3439 = vmatpush1.msra.mxu1 %v2229_v42  ;;  %3376 = vmatpush1.msra.mxu0 %v2013_v43  ;;  %v2134_v41 = vld [vmem:[#allocation13 + $0x4a8] sm:$0xff]  ;;  %v2349_v42 = vld [vmem:[#allocation13 + $0xb60] sm:$0xff] }
 0x639   :  { %3440 = vmatprep.subr.mxu1 %v2224_v44  ;;  %3377 = vmatprep.subr.mxu0 %v2008_v45  ;;  %v2133_v43 = vld [vmem:[#allocation13 + $0x4a0] sm:$0xff]  ;;  %v2344_v44 = vld [vmem:[#allocation13 + $0xb38] sm:$0xff] }
 0x63a   :  { %3441 = vmatpush1.msra.mxu1 %v2223_v48  ;;  %3378 = vmatpush1.msra.mxu0 %v2007_v49  ;;  %v2128_v45 = vld [vmem:[#allocation13 + $0x478] sm:$0xff]  ;;  %v2343_v48 = vld [vmem:[#allocation13 + $0xb30] sm:$0xff] }
 0x63b   :  { %3442 = vmatprep.subr.mxu1 %v2218_v50  ;;  %3379 = vmatprep.subr.mxu0 %v2002_v52  ;;  %v2127_v49 = vld [vmem:[#allocation13 + $0x470] sm:$0xff]  ;;  %v2338_v50 = vld [vmem:[#allocation13 + $0xb08] sm:$0xff] }
 0x63c   :  { %3443 = vmatpush1.msra.mxu1 %v2217_v54  ;;  %3380 = vmatpush1.msra.mxu0 %v2001_v55  ;;  %v2122_v52 = vld [vmem:[#allocation13 + $0x448] sm:$0xff]  ;;  %v2337_v54 = vld [vmem:[#allocation13 + $0xb00] sm:$0xff] }
 0x63d   :  { %3444 = vmatprep.subr.mxu1 %v2212_v57  ;;  %3381 = vmatprep.subr.mxu0 %v1996_v56  ;;  %v2121_v55 = vld [vmem:[#allocation13 + $0x440] sm:$0xff]  ;;  %v2332_v57 = vld [vmem:[#allocation13 + $0xad8] sm:$0xff] }
 0x63e   :  { %3445 = vmatpush1.msra.mxu1 %v2211_v59  ;;  %3382 = vmatpush1.msra.mxu0 %v1995_v29  ;;  %v2116_v56 = vld [vmem:[#allocation13 + $0x418] sm:$0xff]  ;;  %v2331_v59 = vld [vmem:[#allocation13 + $0xad0] sm:$0xff] }
 0x63f   :  { %3446 = vmatprep.subr.mxu1 %v2206_v61  ;;  %3383 = vmatprep.subr.mxu0 %v1990_v2  ;;  %v2115_v29 = vld [vmem:[#allocation13 + $0x410] sm:$0xff]  ;;  %v2326_v61 = vld [vmem:[#allocation13 + $0xaa8] sm:$0xff] }
 0x640   :  { %3447 = vmatpush1.msra.mxu1 %v2205_v3  ;;  %3384 = vmatpush1.msra.mxu0 %v1989_v4  ;;  %v2110_v2 = vld [vmem:[#allocation13 + $0x3e8] sm:$0xff]  ;;  %v2325_v3 = vld [vmem:[#allocation13 + $0xaa0] sm:$0xff] }
 0x641   :  { %3448 = vmatprep.subr.mxu1 %v2200_v5  ;;  %3385 = vmatprep.subr.mxu0 %v2176_v38  ;;  %v2109_v4 = vld [vmem:[#allocation13 + $0x3e0] sm:$0xff]  ;;  %v2320_v5 = vld [vmem:[#allocation13 + $0xa78] sm:$0xff] }
 0x642   :  { %3449 = vmatpush1.msra.mxu1 %v2199_v62  ;;  %3386 = vmatpush2.msra.mxu0 %v2175_v60  ;;  %v2104_v38 = vld [vmem:[#allocation13 + $0x3b8] sm:$0xff]  ;;  %v2319_v62 = vld [vmem:[#allocation13 + $0xa70] sm:$0xff] }
 0x643   :  { %3450 = vmatprep.subr.mxu1 %v2194_v46  ;;  %3387 = vmatprep.subr.mxu0 %v2170_v7  ;;  %v2103_v60 = vld [vmem:[#allocation13 + $0x3b0] sm:$0xff]  ;;  %v2314_v46 = vld [vmem:[#allocation13 + $0xa48] sm:$0xff] }
 0x644   :  { %3451 = vmatpush1.msra.mxu1 %v2193_v9  ;;  %3388 = vmatpush2.msra.mxu0 %v2169_v23  ;;  %v2098_v7 = vld [vmem:[#allocation13 + $0x388] sm:$0xff]  ;;  %v2313_v9 = vld [vmem:[#allocation13 + $0xa40] sm:$0xff] }
 0x645   :  { %3452 = vmatprep.subr.mxu1 %v2188_v10  ;;  %3389 = vmatprep.subr.mxu0 %v2164_v11  ;;  %v2097_v23 = vld [vmem:[#allocation13 + $0x380] sm:$0xff]  ;;  %v2308_v10 = vld [vmem:[#allocation13 + $0xa18] sm:$0xff] }
 0x646   :  { %3453 = vmatpush1.msra.mxu1 %v2187_v12  ;;  %3390 = vmatpush2.msra.mxu0 %v2163_v13  ;;  %v2092_v11 = vld [vmem:[#allocation13 + $0x358] sm:$0xff]  ;;  %v2307_v12 = vld [vmem:[#allocation13 + $0xa10] sm:$0xff] }
 0x647   :  { %3454 = vmatprep.subr.mxu1 %v2182_v14  ;;  %3391 = vmatprep.subr.mxu0 %v2158_v15  ;;  %v2091_v13 = vld [vmem:[#allocation13 + $0x350] sm:$0xff]  ;;  %v2302_v14 = vld [vmem:[#allocation13 + $0x9e8] sm:$0xff] }
 0x648   :  { %3455 = vmatpush1.msra.mxu1 %v2181_v16  ;;  %3392 = vmatpush2.msra.mxu0 %v2157_v18  ;;  %v2086_v15 = vld [vmem:[#allocation13 + $0x328] sm:$0xff]  ;;  %v2301_v16 = vld [vmem:[#allocation13 + $0x9e0] sm:$0xff] }
 0x649   :  { %3456 = vmatprep.subr.mxu1 %v2368_v20  ;;  %3393 = vmatprep.subr.mxu0 %v2152_v39  ;;  %v2085_v18 = vld [vmem:[#allocation13 + $0x320] sm:$0xff]  ;;  %v2296_v20 = vld [vmem:[#allocation13 + $0x9b8] sm:$0xff]  ;;  %v2295_v39 = vld [vmem:[#allocation13 + $0x9b0] sm:$0xff] }
 0x64a   :  { %3457 = vmatpush2.msra.mxu1 %v2367_v19  ;;  %3394 = vmatpush2.msra.mxu0 %v2151_v47  ;;  %v2464_v19 = vld [vmem:[#allocation13 + $0xef8] sm:$0xff]  ;;  %v2290_v47 = vld [vmem:[#allocation13 + $0x988] sm:$0xff] }
 0x64b   :  { %3458 = vmatprep.subr.mxu1 %v2362_v24  ;;  %3395 = vmatprep.subr.mxu0 %v2146_v58  ;;  %v2463_v24 = vld [vmem:[#allocation13 + $0xef0] sm:$0xff]  ;;  %v2289_v58 = vld [vmem:[#allocation13 + $0x980] sm:$0xff] }
 0x64c   :  { %3459 = vmatpush2.msra.mxu1 %v2361_v33  ;;  %3396 = vmatpush2.msra.mxu0 %v2145_v34  ;;  %v2458_v33 = vld [vmem:[#allocation13 + $0xec8] sm:$0xff]  ;;  %v2284_v34 = vld [vmem:[#allocation13 + $0x958] sm:$0xff] }
 0x64d   :  { %3460 = vmatprep.subr.mxu1 %v2356_v35  ;;  %3397 = vmatprep.subr.mxu0 %v2140_v53  ;;  %v2457_v35 = vld [vmem:[#allocation13 + $0xec0] sm:$0xff]  ;;  %v2283_v53 = vld [vmem:[#allocation13 + $0x950] sm:$0xff] }
 0x64e   :  { %3461 = vmatpush2.msra.mxu1 %v2355_v36  ;;  %3398 = vmatpush2.msra.mxu0 %v2139_v37  ;;  %v2452_v36 = vld [vmem:[#allocation13 + $0xe98] sm:$0xff]  ;;  %v2278_v37 = vld [vmem:[#allocation13 + $0x928] sm:$0xff] }
 0x64f   :  { %3462 = vmatprep.subr.mxu1 %v2350_v40  ;;  %3399 = vmatprep.subr.mxu0 %v2134_v41  ;;  %v2451_v40 = vld [vmem:[#allocation13 + $0xe90] sm:$0xff]  ;;  %v2277_v41 = vld [vmem:[#allocation13 + $0x920] sm:$0xff] }
 0x650   :  { %3463 = vmatpush2.msra.mxu1 %v2349_v42  ;;  %3400 = vmatpush2.msra.mxu0 %v2133_v43  ;;  %v2445_v42 = vld [vmem:[#allocation13 + $0xe60] sm:$0xff]  ;;  %v2656_v43 = vld [vmem:[#allocation13 + $0x14f8] sm:$0xff] }
 0x651   :  { %3464 = vmatprep.subr.mxu1 %v2344_v44  ;;  %3401 = vmatprep.subr.mxu0 %v2128_v45  ;;  %v2440_v44 = vld [vmem:[#allocation13 + $0xe38] sm:$0xff]  ;;  %v2655_v45 = vld [vmem:[#allocation13 + $0x14f0] sm:$0xff] }
 0x652   :  { %3465 = vmatpush2.msra.mxu1 %v2343_v48  ;;  %3402 = vmatpush2.msra.mxu0 %v2127_v49  ;;  %v2650_v48 = vld [vmem:[#allocation13 + $0x14c8] sm:$0xff] }
 0x653   :  { %3466 = vmatprep.subr.mxu1 %v2338_v50  ;;  %3403 = vmatprep.subr.mxu0 %v2122_v52  ;;  %v2434_v49 = vld [vmem:[#allocation13 + $0xe08] sm:$0xff]  ;;  %v2649_v50 = vld [vmem:[#allocation13 + $0x14c0] sm:$0xff] }
 0x654   :  { %3467 = vmatpush2.msra.mxu1 %v2337_v54  ;;  %3404 = vmatpush2.msra.mxu0 %v2121_v55  ;;  %v2433_v52 = vld [vmem:[#allocation13 + $0xe00] sm:$0xff]  ;;  %v2644_v54 = vld [vmem:[#allocation13 + $0x1498] sm:$0xff] }
 0x655   :  { %3468 = vmatprep.subr.mxu1 %v2332_v57  ;;  %3405 = vmatprep.subr.mxu0 %v2116_v56  ;;  %v2428_v55 = vld [vmem:[#allocation13 + $0xdd8] sm:$0xff]  ;;  %v2643_v57 = vld [vmem:[#allocation13 + $0x1490] sm:$0xff] }
 0x656   :  { %3469 = vmatpush2.msra.mxu1 %v2331_v59  ;;  %3406 = vmatpush2.msra.mxu0 %v2115_v29  ;;  %v2427_v56 = vld [vmem:[#allocation13 + $0xdd0] sm:$0xff]  ;;  %v2422_v59 = vld [vmem:[#allocation13 + $0xda8] sm:$0xff]  ;;  %v2637_v29 = vld [vmem:[#allocation13 + $0x1460] sm:$0xff] }
 0x657   :  { %3470 = vmatprep.subr.mxu1 %v2326_v61  ;;  %3407 = vmatprep.subr.mxu0 %v2110_v2  ;;  %v2421_v61 = vld [vmem:[#allocation13 + $0xda0] sm:$0xff]  ;;  %v2632_v2 = vld [vmem:[#allocation13 + $0x1438] sm:$0xff] }
 0x658   :  { %3471 = vmatpush2.msra.mxu1 %v2325_v3  ;;  %3408 = vmatpush2.msra.mxu0 %v2109_v4  ;;  %v2416_v3 = vld [vmem:[#allocation13 + $0xd78] sm:$0xff]  ;;  %v2415_v4 = vld [vmem:[#allocation13 + $0xd70] sm:$0xff] }
 0x659   :  { %3472 = vmatprep.subr.mxu1 %v2320_v5  ;;  %3409 = vmatprep.subr.mxu0 %v2104_v38  ;;  %v2626_v5 = vld [vmem:[#allocation13 + $0x1408] sm:$0xff] }
 0x65a   :  { %3473 = vmatpush2.msra.mxu1 %v2319_v62  ;;  %3410 = vmatpush2.msra.mxu0 %v2103_v60  ;;  %v2410_v38 = vld [vmem:[#allocation13 + $0xd48] sm:$0xff]  ;;  %v2625_v62 = vld [vmem:[#allocation13 + $0x1400] sm:$0xff] }
 0x65b   :  { %3474 = vmatprep.subr.mxu1 %v2314_v46  ;;  %3411 = vmatprep.subr.mxu0 %v2098_v7  ;;  %v2409_v60 = vld [vmem:[#allocation13 + $0xd40] sm:$0xff]  ;;  %v2620_v46 = vld [vmem:[#allocation13 + $0x13d8] sm:$0xff] }
 0x65c   :  { %3475 = vmatpush2.msra.mxu1 %v2313_v9  ;;  %3412 = vmatpush2.msra.mxu0 %v2097_v23  ;;  %v2404_v7 = vld [vmem:[#allocation13 + $0xd18] sm:$0xff]  ;;  %v2619_v9 = vld [vmem:[#allocation13 + $0x13d0] sm:$0xff] }
 0x65d   :  { %3476 = vmatprep.subr.mxu1 %v2308_v10  ;;  %3413 = vmatprep.subr.mxu0 %v2092_v11  ;;  %v2403_v23 = vld [vmem:[#allocation13 + $0xd10] sm:$0xff]  ;;  %v7052_v10 = vpop.f32.mrf.mxu0  ;;  %v2614_v11 = vld [vmem:[#allocation13 + $0x13a8] sm:$0xff] }
 0x65e   :  { %3477 = vmatpush2.msra.mxu1 %v2307_v12  ;;  %3414 = vmatpush2.msra.mxu0 %v2091_v13  ;;  %v2398_v12 = vld [vmem:[#allocation13 + $0xce8] sm:$0xff]  ;;  %v2613_v13 = vld [vmem:[#allocation13 + $0x13a0] sm:$0xff] }
 0x65f   :  { %3478 = vmatprep.subr.mxu1 %v2302_v14  ;;  %3415 = vmatprep.subr.mxu0 %v2086_v15  ;;  %v2397_v14 = vld [vmem:[#allocation13 + $0xce0] sm:$0xff]  ;;  %v7054_v15 = vpop.f32.mrf.mxu1 }
 0x660   :  { %3479 = vmatpush2.msra.mxu1 %v2301_v16  ;;  %3416 = vmatpush2.msra.mxu0 %v2085_v18  ;;  %v2608_v16 = vld [vmem:[#allocation13 + $0x1378] sm:$0xff] }
 0x661   :  { %3480 = vmatprep.subr.mxu1 %v2296_v20  ;;  %3418 = vmatmul.mubr.f32.vlgmr.msra.gmra.mxu0 %v6992_v1  ;;  %v2446_v1 = vld [vmem:[#allocation13 + $0xe68] sm:$0xff]  ;;  %v2392_v18 = vld [vmem:[#allocation13 + $0xcb8] sm:$0xff]  ;;  %v2607_v20 = vld [vmem:[#allocation13 + $0x1370] sm:$0xff] }
 0x662   :  { %3481 = vmatpush2.msra.mxu1 %v2295_v39  ;;  %3495 = vmatprep.subr.mxu0 %v2464_v19  ;;  %v2391_v39 = vld [vmem:[#allocation13 + $0xcb0] sm:$0xff]  ;;  %v7056_v19 = vld [vmem:[#allocation15] sm:$0x3f] }
 0x663   :  { %3482 = vmatprep.subr.mxu1 %v2290_v47  ;;  %3496 = vmatpush1.msra.mxu0 %v2463_v24  ;;  %v2853_v47 = vpop.f32.mrf.mxu0  ;;  %v2602_v24 = vld [vmem:[#allocation13 + $0x1348] sm:$0xff] }
 0x664   :  { %3559 = vmatprep.mubr.f32.mxu0 %v7019_v51  ;;  %3483 = vmatpush2.msra.mxu1 %v2289_v58  ;;  %v2439_v51 = vld [vmem:[#allocation13 + $0xe30] sm:$0xff]  ;;  %v2386_v58 = vld [vmem:[#allocation13 + $0xc88] sm:$0xff] }
 0x665   :  { %3497 = vmatprep.subr.mxu0 %v2458_v33  ;;  %3484 = vmatprep.subr.mxu1 %v2284_v34  ;;  %v2762_v33 = vrot.slane %v7056_v19, %v6694_v30  ;;  %v2601_v34 = vld [vmem:[#allocation13 + $0x1340] sm:$0xff] }
 0x666   :  { %3498 = vmatpush1.msra.mxu0 %v2457_v35  ;;  %3485 = vmatpush2.msra.mxu1 %v2283_v53  ;;  %v2385_v35 = vld [vmem:[#allocation13 + $0xc80] sm:$0xff]  ;;  %v2924_v53 = vpop.f32.mrf.mxu1 }
 0x667   :  { %3499 = vmatprep.subr.mxu0 %v2452_v36  ;;  %3486 = vmatprep.subr.mxu1 %v2278_v37  ;;  %v7060_v36 = vpop.f32.mrf.mxu0  ;;  %v2596_v37 = vld [vmem:[#allocation13 + $0x1318] sm:$0xff] }
 0x668   :  { %3500 = vmatpush1.msra.mxu0 %v2451_v40  ;;  %3487 = vmatpush2.msra.mxu1 %v2277_v41  ;;  %v2380_v40 = vld [vmem:[#allocation13 + $0xc58] sm:$0xff]  ;;  %v2595_v41 = vld [vmem:[#allocation13 + $0x1310] sm:$0xff] }
 0x669   :  { %3501 = vmatprep.subr.mxu0 %v2446_v1  ;;  %3489 = vmatmul.mubr.f32.vlgmr.msra.gmra.mxu1 %v7007_v22  ;;  %v2638_v22 = vld [vmem:[#allocation13 + $0x1468] sm:$0xff]  ;;  %v2379_v1 = vld [vmem:[#allocation13 + $0xc50] sm:$0xff] }
 0x66a   :  { %3502 = vmatpush1.msra.mxu0 %v2445_v42  ;;  %3566 = vmatprep.subr.mxu1 %v2656_v43  ;;  %v7062_v42 = vpop.f32.mrf.mxu1  ;;  %v2590_v43 = vld [vmem:[#allocation13 + $0x12e8] sm:$0xff] }
 0x66b   :  { %3503 = vmatprep.subr.mxu0 %v2440_v44  ;;  %3567 = vmatpush1.msra.mxu1 %v2655_v45  ;;  %v2374_v44 = vld [vmem:[#allocation13 + $0xc28] sm:$0xff]  ;;  %v2854_v45 = vadd.f32 %v2853_v47, %v2762_v33  ;;  %v2524_v47 = vld [vmem:[#allocation13 + $0x10d8] sm:$0xff]  ;;  %v2523_v33 = vld [vmem:[#allocation13 + $0x10d0] sm:$0xff] }
 0x66c   :  { %3630 = vmatprep.mubr.f32.mxu1 %v7012_v32  ;;  %3504 = vmatpush1.msra.mxu0 %v2439_v51  ;;  %v2631_v32 = vld [vmem:[#allocation13 + $0x1430] sm:$0xff]  ;;  %v2589_v51 = vld [vmem:[#allocation13 + $0x12e0] sm:$0xff] }
 0x66d   :  { %3568 = vmatprep.subr.mxu1 %v2650_v48  ;;  %3505 = vmatprep.subr.mxu0 %v2434_v49  ;;  %v2373_v48 = vld [vmem:[#allocation13 + $0xc20] sm:$0xff]  ;;  %v2995_v49 = vpop.f32.mrf.mxu0 }
 0x66e   :  { %3569 = vmatpush1.msra.mxu1 %v2649_v50  ;;  %3506 = vmatpush1.msra.mxu0 %v2433_v52  ;;  %v2584_v50 = vld [vmem:[#allocation13 + $0x12b8] sm:$0xff] }
 0x66f   :  { %3570 = vmatprep.subr.mxu1 %v2644_v54  ;;  %3507 = vmatprep.subr.mxu0 %v2428_v55  ;;  %v2560_v52 = vld [vmem:[#allocation13 + $0x11f8] sm:$0xff]  ;;  %v2925_v54 = vadd.f32 %v2924_v53, %v2854_v45  ;;  %v2583_v55 = vld [vmem:[#allocation13 + $0x12b0] sm:$0xff] }
 0x670   :  { %3571 = vmatpush1.msra.mxu1 %v2643_v57  ;;  %3508 = vmatpush1.msra.mxu0 %v2427_v56  ;;  %v2559_v57 = vld [vmem:[#allocation13 + $0x11f0] sm:$0xff]  ;;  %v3066_v56 = vpop.f32.mrf.mxu1 }
 0x671   :  { %3572 = vmatprep.subr.mxu1 %v2638_v22  ;;  %3509 = vmatprep.subr.mxu0 %v2422_v59  ;;  %v2578_v22 = vld [vmem:[#allocation13 + $0x1288] sm:$0xff] }
 0x672   :  { %3573 = vmatpush1.msra.mxu1 %v2637_v29  ;;  %3510 = vmatpush1.msra.mxu0 %v2421_v61  ;;  %v2554_v59 = vld [vmem:[#allocation13 + $0x11c8] sm:$0xff]  ;;  %v2996_v29 = vadd.f32 %v2995_v49, %v2925_v54  ;;  %v2577_v61 = vld [vmem:[#allocation13 + $0x1280] sm:$0xff]  ;;  %v2716_v54 = vld [vmem:[#allocation13 + $0x16d8] sm:$0xff] }
 0x673   :  { %3574 = vmatprep.subr.mxu1 %v2632_v2  ;;  %3511 = vmatprep.subr.mxu0 %v2416_v3  ;;  %v2553_v2 = vld [vmem:[#allocation13 + $0x11c0] sm:$0xff]  ;;  %v2572_v3 = vld [vmem:[#allocation13 + $0x1258] sm:$0xff] }
 0x674   :  { %3575 = vmatpush1.msra.mxu1 %v2631_v32  ;;  %3512 = vmatpush1.msra.mxu0 %v2415_v4  ;;  %v2548_v32 = vld [vmem:[#allocation13 + $0x1198] sm:$0xff]  ;;  %v7064_v4 = vadd.f32 %v3066_v56, %v2996_v29  ;;  %v2499_v56 = vld [vmem:[#allocation13 + $0x1010] sm:$0xff]  ;;  %v2494_v29 = vld [vmem:[#allocation13 + $0xfe8] sm:$0xff] }
 0x675   :  { %3576 = vmatprep.subr.mxu1 %v2626_v5  ;;  %3513 = vmatprep.subr.mxu0 %v2410_v38  ;;  %v2571_v5 = vld [vmem:[#allocation13 + $0x1250] sm:$0xff] }
 0x676   :  { %3577 = vmatpush1.msra.mxu1 %v2625_v62  ;;  %3514 = vmatpush1.msra.mxu0 %v2409_v60  ;;  %v2547_v38 = vld [vmem:[#allocation13 + $0x1190] sm:$0xff]  ;;  %v2566_v62 = vld [vmem:[#allocation13 + $0x1228] sm:$0xff]  ;;  %v3765_v53 = vrot.slane %v7064_v4, 4 }
 0x677   :  { %3578 = vmatprep.subr.mxu1 %v2620_v46  ;;  %3515 = vmatprep.subr.mxu0 %v2404_v7  ;;  %v2542_v60 = vld [vmem:[#allocation13 + $0x1168] sm:$0xff]  ;;  %v2565_v46 = vld [vmem:[#allocation13 + $0x1220] sm:$0xff] }
 0x678   :  { %3579 = vmatpush1.msra.mxu1 %v2619_v9  ;;  %3516 = vmatpush1.msra.mxu0 %v2403_v23  ;;  %v2541_v7 = vld [vmem:[#allocation13 + $0x1160] sm:$0xff]  ;;  %v2752_v9 = vld [vmem:[#allocation13 + $0x17f8] sm:$0xff]  ;;  %v3766_v49 = vadd.f32 %v3765_v53, %v7064_v4 }
 0x679   :  { %3580 = vmatprep.subr.mxu1 %v2614_v11  ;;  %3517 = vmatprep.subr.mxu0 %v2398_v12  ;;  %v2536_v23 = vld [vmem:[#allocation13 + $0x1138] sm:$0xff]  ;;  %v3796_v11 = vmul.f32 %v7064_v4, %v7064_v4  ;;  %v2751_v12 = vld [vmem:[#allocation13 + $0x17f0] sm:$0xff] }
 0x67a   :  { %3581 = vmatpush1.msra.mxu1 %v2613_v13  ;;  %3518 = vmatpush1.msra.mxu0 %v2397_v14  ;;  %v2535_v13 = vld [vmem:[#allocation13 + $0x1130] sm:$0xff]  ;;  %v2746_v14 = vld [vmem:[#allocation13 + $0x17c8] sm:$0xff]  ;;  %v2680_v53 = vld [vmem:[#allocation13 + $0x15b8] sm:$0xff] }
 0x67b   :  { %3582 = vmatprep.subr.mxu1 %v2608_v16  ;;  %3519 = vmatprep.subr.mxu0 %v2392_v18  ;;  %v2530_v16 = vld [vmem:[#allocation13 + $0x1108] sm:$0xff]  ;;  %v2745_v18 = vld [vmem:[#allocation13 + $0x17c0] sm:$0xff] }
 0x67c   :  { %3583 = vmatpush1.msra.mxu1 %v2607_v20  ;;  %3520 = vmatpush1.msra.mxu0 %v2391_v39  ;;  %v2529_v20 = vld [vmem:[#allocation13 + $0x1100] sm:$0xff]  ;;  %v2740_v39 = vld [vmem:[#allocation13 + $0x1798] sm:$0xff] }
 0x67d   :  { %3584 = vmatprep.subr.mxu1 %v2602_v24  ;;  %3521 = vmatprep.subr.mxu0 %v2386_v58  ;;  %v3807_v24 = vrot.slane %v3796_v11, 4  ;;  %v2739_v58 = vld [vmem:[#allocation13 + $0x1790] sm:$0xff] }
 0x67e   :  { %3585 = vmatpush1.msra.mxu1 %v2601_v34  ;;  %3522 = vmatpush1.msra.mxu0 %v2385_v35  ;;  %v2734_v34 = vld [vmem:[#allocation13 + $0x1768] sm:$0xff] }
 0x67f   :  { %3586 = vmatprep.subr.mxu1 %v2596_v37  ;;  %3523 = vmatprep.subr.mxu0 %v2380_v40  ;;  %v2518_v35 = vld [vmem:[#allocation13 + $0x10a8] sm:$0xff]  ;;  %v2733_v37 = vld [vmem:[#allocation13 + $0x1760] sm:$0xff]  ;;  %v3808_v45 = vadd.f32 %v3807_v24, %v3796_v11 }
 0x680   :  { %3587 = vmatpush1.msra.mxu1 %v2595_v41  ;;  %3524 = vmatpush1.msra.mxu0 %v2379_v1  ;;  %v2517_v40 = vld [vmem:[#allocation13 + $0x10a0] sm:$0xff]  ;;  %v2728_v41 = vld [vmem:[#allocation13 + $0x1738] sm:$0xff]  ;;  %v2470_v24 = vld [vmem:[#allocation13 + $0xf28] sm:$0xff] }
 0x681   :  { %3588 = vmatprep.subr.mxu1 %v2590_v43  ;;  %3525 = vmatprep.subr.mxu0 %v2374_v44  ;;  %v2512_v1 = vld [vmem:[#allocation13 + $0x1078] sm:$0xff]  ;;  %v2727_v43 = vld [vmem:[#allocation13 + $0x1730] sm:$0xff]  ;;  %v2481_v11 = vld [vmem:[#allocation13 + $0xf80] sm:$0xff] }
 0x682   :  { %3589 = vmatpush1.msra.mxu1 %v2589_v51  ;;  %3526 = vmatpush1.msra.mxu0 %v2373_v48  ;;  %v2511_v44 = vld [vmem:[#allocation13 + $0x1070] sm:$0xff]  ;;  %v2722_v51 = vld [vmem:[#allocation13 + $0x1708] sm:$0xff] }
 0x683   :  { %3590 = vmatprep.subr.mxu1 %v2584_v50  ;;  %3527 = vmatprep.subr.mxu0 %v2560_v52  ;;  %v2506_v48 = vld [vmem:[#allocation13 + $0x1048] sm:$0xff]  ;;  %v2721_v50 = vld [vmem:[#allocation13 + $0x1700] sm:$0xff] }
 0x684   :  { %3591 = vmatpush1.msra.mxu1 %v2583_v55  ;;  %3528 = vmatpush2.msra.mxu0 %v2559_v57  ;;  %v2505_v52 = vld [vmem:[#allocation13 + $0x1040] sm:$0xff]  ;;  %v2500_v55 = vld [vmem:[#allocation13 + $0x1018] sm:$0xff]  ;;  %v2715_v57 = vld [vmem:[#allocation13 + $0x16d0] sm:$0xff] }
 0x685   :  { %3592 = vmatprep.subr.mxu1 %v2578_v22  ;;  %3529 = vmatprep.subr.mxu0 %v2554_v59  ;;  %v3809_v22 = vrot.slane %v3808_v45, 2  ;;  %v2710_v59 = vld [vmem:[#allocation13 + $0x16a8] sm:$0xff] }
 0x686   :  { %3593 = vmatpush1.msra.mxu1 %v2577_v61  ;;  %3530 = vmatpush2.msra.mxu0 %v2553_v2  ;;  %v2709_v61 = vld [vmem:[#allocation13 + $0x16a0] sm:$0xff] }
 0x687   :  { %3594 = vmatprep.subr.mxu1 %v2572_v3  ;;  %3531 = vmatprep.subr.mxu0 %v2548_v32  ;;  %v2493_v2 = vld [vmem:[#allocation13 + $0xfe0] sm:$0xff]  ;;  %v3767_v3 = vrot.slane %v3766_v49, 2  ;;  %v2704_v32 = vld [vmem:[#allocation13 + $0x1678] sm:$0xff] }
 0x688   :  { %3595 = vmatpush1.msra.mxu1 %v2571_v5  ;;  %3532 = vmatpush2.msra.mxu0 %v2547_v38  ;;  %v2488_v5 = vld [vmem:[#allocation13 + $0xfb8] sm:$0xff]  ;;  %v2703_v38 = vld [vmem:[#allocation13 + $0x1670] sm:$0xff] }
 0x689   :  { %3596 = vmatprep.subr.mxu1 %v2566_v62  ;;  %3533 = vmatprep.subr.mxu0 %v2542_v60  ;;  %v2487_v62 = vld [vmem:[#allocation13 + $0xfb0] sm:$0xff]  ;;  %v3810_v60 = vadd.f32 %v3809_v22, %v3808_v45  ;;  %v3700_v22 = vld [vmem:[%s7659_s11 + $0x1f8] sm:$0xff] }
 0x68a   :  { %3597 = vmatpush1.msra.mxu1 %v2565_v46  ;;  %3534 = vmatpush2.msra.mxu0 %v2541_v7  ;;  %v2758_v46 = vrot.slane %v7056_v19, %v6688_v27  ;;  %v2698_v7 = vld [vmem:[#allocation13 + $0x1648] sm:$0xff] }
 0x68b   :  { %3598 = vmatprep.subr.mxu1 %v2752_v9  ;;  %3535 = vmatprep.subr.mxu0 %v2536_v23  ;;  %v2482_v9 = vld [vmem:[#allocation13 + $0xf88] sm:$0xff]  ;;  %v2697_v23 = vld [vmem:[#allocation13 + $0x1640] sm:$0xff] }
 0x68c   :  { %3599 = vmatpush2.msra.mxu1 %v2751_v12  ;;  %3536 = vmatpush2.msra.mxu0 %v2535_v13  ;;  %v3768_v12 = vadd.f32 %v3767_v3, %v3766_v49  ;;  %v2692_v13 = vld [vmem:[#allocation13 + $0x1618] sm:$0xff]  ;;  %v2667_v49 = vld [vmem:[#allocation13 + $0x1550] sm:$0xff] }
 0x68d   :  { %3600 = vmatprep.subr.mxu1 %v2746_v14  ;;  %3537 = vmatprep.subr.mxu0 %v2530_v16  ;;  %v2476_v14 = vld [vmem:[#allocation13 + $0xf58] sm:$0xff]  ;;  %v2691_v16 = vld [vmem:[#allocation13 + $0x1610] sm:$0xff] }
 0x68e   :  { %3601 = vmatpush2.msra.mxu1 %v2745_v18  ;;  %3538 = vmatpush2.msra.mxu0 %v2529_v20  ;;  %v2475_v18 = vld [vmem:[#allocation13 + $0xf50] sm:$0xff]  ;;  %v3811_v20 = vrot.slane %v3810_v60, 1 }
 0x68f   :  { %3602 = vmatprep.subr.mxu1 %v2740_v39  ;;  %3539 = vmatprep.subr.mxu0 %v2524_v47  ;;  %v2852_v39 = vadd.f32 %v7052_v10, %v2758_v46  ;;  %v2686_v47 = vld [vmem:[#allocation13 + $0x15e8] sm:$0xff]  ;;  %v3682_v46 = vld [vmem:[%s7659_s11 + $0x168] sm:$0xff] }
 0x690   :  { %3603 = vmatpush2.msra.mxu1 %v2739_v58  ;;  %3540 = vmatpush2.msra.mxu0 %v2523_v33  ;;  %v2685_v58 = vld [vmem:[#allocation13 + $0x15e0] sm:$0xff] }
 0x691   :  { %3604 = vmatprep.subr.mxu1 %v2734_v34  ;;  %3541 = vmatprep.subr.mxu0 %v2518_v35  ;;  %v2469_v33 = vld [vmem:[#allocation13 + $0xf20] sm:$0xff]  ;;  %v3769_v34 = vrot.slane %v3768_v12, 1  ;;  %v2923_v35 = vadd.f32 %v7054_v15, %v2852_v39 }
 0x692   :  { %3605 = vmatpush2.msra.mxu1 %v2733_v37  ;;  %3542 = vmatpush2.msra.mxu0 %v2517_v40  ;;  %v2679_v37 = vld [vmem:[#allocation13 + $0x15b0] sm:$0xff]  ;;  %v3668_v10 = vld [vmem:[%s7659_s11 + $0xf8] sm:$0xff]  ;;  %v3812_v40 = vadd.f32 %v3811_v20, %v3810_v60 }
 0x693   :  { %3606 = vmatprep.subr.mxu1 %v2728_v41  ;;  %3543 = vmatprep.subr.mxu0 %v2512_v1  ;;  %v2994_v41 = vadd.f32 %v7060_v36, %v2923_v35  ;;  %v2674_v1 = vld [vmem:[#allocation13 + $0x1588] sm:$0xff]  ;;  %v3667_v36 = vld [vmem:[%s7659_s11 + $0xf0] sm:$0xff]  ;;  %v3662_v60 = vld [vmem:[%s7659_s11 + $0xc8] sm:$0xff] }
 0x694   :  { %3607 = vmatpush2.msra.mxu1 %v2727_v43  ;;  %3544 = vmatpush2.msra.mxu0 %v2511_v44  ;;  %v3652_v15 = vld [vmem:[%s7659_s11 + $0x78] sm:$0xff]  ;;  %v3770_v43 = vadd.f32 %v3769_v34, %v3768_v12  ;;  %v3681_v12 = vld [vmem:[%s7659_s11 + $0x160] sm:$0xff]  ;;  %v3643_v34 = vld [vmem:[%s7659_s11 + $0x30] sm:$0xff] }
 0x695   :  { %3608 = vmatprep.subr.mxu1 %v2722_v51  ;;  %3545 = vmatprep.subr.mxu0 %v2506_v48  ;;  %v2673_v44 = vld [vmem:[#allocation13 + $0x1580] sm:$0xff]  ;;  %v7083_v45 = vadd.f32 %v7062_v42, %v2994_v41  ;;  %v2668_v51 = vld [vmem:[#allocation13 + $0x1558] sm:$0xff]  ;;  %v3693_v41 = vld [vmem:[%s7659_s11 + $0x1c0] sm:$0xff] }
 0x696   :  { %3609 = vmatpush2.msra.mxu1 %v2721_v50  ;;  %3546 = vmatpush2.msra.mxu0 %v2505_v52  ;;  %v3838_v48 = vsel %vm1292_vm5, %v3770_v43, %v3812_v40  ;;  %v3666_v42 = vld [vmem:[%s7659_s11 + $0xe8] sm:$0xff]  ;;  %v2662_v50 = vld [vmem:[#allocation13 + $0x1528] sm:$0xff] }
 0x697   :  { %3610 = vmatprep.subr.mxu1 %v2716_v54  ;;  %3547 = vmatprep.subr.mxu0 %v2500_v55  ;;  %v3650_v52 = vld [vmem:[%s7659_s11 + $0x68] sm:$0xff]  ;;  %v2661_v54 = vld [vmem:[#allocation13 + $0x1520] sm:$0xff]  ;;  %v3795_v55 = vmul.f32 %v7083_v45, %v7083_v45  ;;  %v3677_v43 = vld [vmem:[%s7659_s11 + $0x140] sm:$0xff] }
 0x698   :  { %3611 = vmatpush2.msra.mxu1 %v2715_v57  ;;  %3548 = vmatpush2.msra.mxu0 %v2499_v56  ;;  %v3665_v57 = vld [vmem:[%s7659_s11 + $0xe0] sm:$0xff]  ;;  %v3680_v20 = vld [vmem:[%s7659_s11 + $0x158] sm:$0xff]  ;;  %v3694_v35 = vld [vmem:[%s7659_s11 + $0x1c8] sm:$0xff] }
 0x699   :  { %3612 = vmatprep.subr.mxu1 %v2710_v59  ;;  %3549 = vmatprep.subr.mxu0 %v2494_v29  ;;  %v3649_v56 = vld [vmem:[%s7659_s11 + $0x60] sm:$0xff]  ;;  %v3664_v59 = vld [vmem:[%s7659_s11 + $0xd8] sm:$0xff]  ;;  %v3801_v3 = vrot.slane %v3795_v55, 4  ;;  %v3642_v40 = vld [vmem:[%s7659_s11 + $0x28] sm:$0xff] }
 0x69a   :  { %3613 = vmatpush2.msra.mxu1 %v2709_v61  ;;  %3550 = vmatpush2.msra.mxu0 %v2493_v2  ;;  %v3684_v29 = vld [vmem:[%s7659_s11 + $0x178] sm:$0xff]  ;;  %v3699_v2 = vld [vmem:[%s7659_s11 + $0x1f0] sm:$0xff] }
 0x69b   :  { %3614 = vmatprep.subr.mxu1 %v2704_v32  ;;  %3551 = vmatprep.subr.mxu0 %v2488_v5  ;;  %v3648_v61 = vld [vmem:[%s7659_s11 + $0x58] sm:$0xff]  ;;  %v3663_v32 = vld [vmem:[%s7659_s11 + $0xd0] sm:$0xff] }
 0x69c   :  { %3615 = vmatpush2.msra.mxu1 %v2703_v38  ;;  %3552 = vmatpush2.msra.mxu0 %v2487_v62  ;;  %v3683_v5 = vld [vmem:[%s7659_s11 + $0x170] sm:$0xff]  ;;  %v3698_v38 = vld [vmem:[%s7659_s11 + $0x1e8] sm:$0xff]  ;;  %v3759_v62 = vrot.slane %v7083_v45, 4  ;;  %v3644_v39 = vld [vmem:[%s7659_s11 + $0x38] sm:$0xff] }
 0x69d   :  { %3616 = vmatprep.subr.mxu1 %v2698_v7  ;;  %3553 = vmatprep.subr.mxu0 %v2482_v9  ;;  %v3646_v7 = vld [vmem:[%s7659_s11 + $0x48] sm:$0xff]  ;;  %v3697_v9 = vld [vmem:[%s7659_s11 + $0x1e0] sm:$0xff] }
 0x69e   :  { %3617 = vmatpush2.msra.mxu1 %v2697_v23  ;;  %3554 = vmatpush2.msra.mxu0 %v2481_v11  ;;  %v3802_v23 = vadd.f32 %v3801_v3, %v3795_v55  ;;  %v3661_v11 = vld [vmem:[%s7659_s11 + $0xc0] sm:$0xff]  ;;  %v3639_v55 = vld [vmem:[%s7659_s11 + $0x10] sm:$0xff] }
 0x69f   :  { %3618 = vmatprep.subr.mxu1 %v2692_v13  ;;  %3555 = vmatprep.subr.mxu0 %v2476_v14  ;;  %v3645_v13 = vld [vmem:[%s7659_s11 + $0x40] sm:$0xff]  ;;  %v3696_v14 = vld [vmem:[%s7659_s11 + $0x1d8] sm:$0xff] }
 0x6a0   :  { %3619 = vmatpush2.msra.mxu1 %v2691_v16  ;;  %3556 = vmatpush2.msra.mxu0 %v2475_v18  ;;  %v3760_v16 = vadd.f32 %v3759_v62, %v7083_v45  ;;  %v3660_v18 = vld [vmem:[%s7659_s11 + $0xb8] sm:$0xff] }
 0x6a1   :  { %3620 = vmatprep.subr.mxu1 %v2686_v47  ;;  %3557 = vmatprep.subr.mxu0 %v2470_v24  ;;  %v3695_v47 = vld [vmem:[%s7659_s11 + $0x1d0] sm:$0xff]  ;;  %v3672_v62 = vld [vmem:[%s7659_s11 + $0x118] sm:$0xff] }
 0x6a2   :  { %3621 = vmatpush2.msra.mxu1 %v2685_v58  ;;  %3558 = vmatpush2.msra.mxu0 %v2469_v33  ;;  %v3659_v24 = vld [vmem:[%s7659_s11 + $0xb0] sm:$0xff]  ;;  %v3803_v58 = vrot.slane %v3802_v23, 2 }
 0x6a3   :  { %3622 = vmatprep.subr.mxu1 %v2680_v53  ;;  %3560 = vmatmul.mubr.f32.vlgmr.msra.gmra.mxu0 %v7029_v6  ;;  %v3651_v6 = vld [vmem:[%s7659_s11 + $0x70] sm:$0xff]  ;;  %v3761_v53 = vrot.slane %v3760_v16, 2 }
 0x6a4   :  { %3623 = vmatpush2.msra.mxu1 %v2679_v37  ;;  %5499 = vmatprep.subr.mxu0 %v3668_v10  ;;  %v3679_v33 = vld [vmem:[%s7659_s11 + $0x150] sm:$0xff]  ;;  %v3658_v37 = vld [vmem:[%s7659_s11 + $0xa8] sm:$0xff] }
 0x6a5   :  { %3624 = vmatprep.subr.mxu1 %v2674_v1  ;;  %5500 = vmatpush3.msra.mxu0 %v3652_v15  ;;  %v3678_v10 = vld [vmem:[%s7659_s11 + $0x148] sm:$0xff]  ;;  %v3657_v1 = vld [vmem:[%s7659_s11 + $0xa0] sm:$0xff]  ;;  %v3804_v15 = vadd.f32 %v3803_v58, %v3802_v23  ;;  %v3716_v23 = vld [vmem:[%s7659_s11 + $0x278] sm:$0xff]  ;;  %v2770_v58 = vrot.slane %v7056_v19, %v712_v31 }
 0x6a6   :  { %3907 = vmatprep.mubr.f32.mxu0 %v3838_v48  ;;  %3625 = vmatpush2.msra.mxu1 %v2673_v44  ;;  %v3641_v44 = vld [vmem:[%s7659_s11 + $0x20] sm:$0xff]  ;;  %v3762_v48 = vadd.f32 %v3761_v53, %v3760_v16 }
 0x6a7   :  { %5501 = vmatprep.subr.mxu0 %v3667_v36  ;;  %3626 = vmatprep.subr.mxu1 %v2668_v51  ;;  %v3692_v36 = vld [vmem:[%s7659_s11 + $0x1b8] sm:$0xff]  ;;  %v3685_v16 = vld [vmem:[%s7659_s11 + $0x180] sm:$0xff] }
 0x6a8   :  { %5502 = vmatpush3.msra.mxu0 %v3651_v6  ;;  %3627 = vmatpush2.msra.mxu1 %v2667_v49  ;;  %v3656_v51 = vld [vmem:[%s7659_s11 + $0x98] sm:$0xff]  ;;  %v3729_v31 = vld [vmem:[%s7659_s11 + $0x2e0] sm:$0xff] }
 0x6a9   :  { %5503 = vmatprep.subr.mxu0 %v3666_v42  ;;  %3628 = vmatprep.subr.mxu1 %v2662_v50  ;;  %v3676_v6 = vld [vmem:[%s7659_s11 + $0x138] sm:$0xff]  ;;  %v3691_v42 = vld [vmem:[%s7659_s11 + $0x1b0] sm:$0xff] }
 0x6aa   :  { %5504 = vmatpush3.msra.mxu0 %v3650_v52  ;;  %3629 = vmatpush2.msra.mxu1 %v2661_v54  ;;  %v3640_v49 = vld [vmem:[%s7659_s11 + $0x18] sm:$0xff]  ;;  %v3655_v50 = vld [vmem:[%s7659_s11 + $0x90] sm:$0xff]  ;;  %v3805_v52 = vrot.slane %v3804_v15, 1 }
 0x6ab   :  { %5505 = vmatprep.subr.mxu0 %v3665_v57  ;;  %3631 = vmatmul.mubr.f32.vlgmr.msra.gmra.mxu1 %v7036_v63  ;;  %v3647_v63 = vld [vmem:[%s7659_s11 + $0x50] sm:$0xff]  ;;  %v3690_v57 = vld [vmem:[%s7659_s11 + $0x1a8] sm:$0xff] }
 0x6ac   :  { %5506 = vmatpush3.msra.mxu0 %v3649_v56  ;;  %5534 = vmatprep.subr.mxu1 %v3700_v22  ;;  %v3675_v54 = vld [vmem:[%s7659_s11 + $0x130] sm:$0xff]  ;;  %v3654_v56 = vld [vmem:[%s7659_s11 + $0x88] sm:$0xff]  ;;  %v3763_v22 = vrot.slane %v3762_v48, 1  ;;  %v3806_v3 = vadd.f32 %v3805_v52, %v3804_v15  ;;  %v3713_v15 = vld [vmem:[%s7659_s11 + $0x260] sm:$0xff] }
 0x6ad   :  { %5507 = vmatprep.subr.mxu0 %v3664_v59  ;;  %5535 = vmatpush3.msra.mxu1 %v3684_v29  ;;  %v3674_v59 = vld [vmem:[%s7659_s11 + $0x128] sm:$0xff] }
 0x6ae   :  { %5508 = vmatpush3.msra.mxu0 %v3648_v61  ;;  %5536 = vmatprep.subr.mxu1 %v3699_v2  ;;  %v3638_v29 = vld [vmem:[%s7659_s11 + $0x8] sm:$0xff]  ;;  %v3689_v61 = vld [vmem:[%s7659_s11 + $0x1a0] sm:$0xff] }
 0x6af   :  { %5509 = vmatprep.subr.mxu0 %v3663_v32  ;;  %5537 = vmatpush3.msra.mxu1 %v3683_v5  ;;  %v3653_v2 = vld [vmem:[%s7659_s11 + $0x80] sm:$0xff] }
 0x6b0   :  { %5510 = vmatpush3.msra.mxu0 %v3647_v63  ;;  %5538 = vmatprep.subr.mxu1 %v3698_v38  ;;  %v3673_v32 = vld [vmem:[%s7659_s11 + $0x120] sm:$0xff]  ;;  %v3688_v63 = vld [vmem:[%s7659_s11 + $0x198] sm:$0xff]  ;;  %v3764_v38 = vadd.f32 %v3763_v22, %v3762_v48 }
 0x6b1   :  { %5511 = vmatprep.subr.mxu0 %v3662_v60  ;;  %5539 = vmatpush3.msra.mxu1 %v3682_v46  ;;  %v3637_v5 = vld [vmem:[%s7659_s11] sm:$0xff]  ;;  %v3687_v60 = vld [vmem:[%s7659_s11 + $0x190] sm:$0xff]  ;;  %v3732_v46 = vld [vmem:[%s7659_s11 + $0x2f8] sm:$0xff] }
 0x6b2   :  { %5512 = vmatpush3.msra.mxu0 %v3646_v7  ;;  %5540 = vmatprep.subr.mxu1 %v3697_v9  ;;  %v3837_v7 = vsel %vm1292_vm5, %v3764_v38, %v3806_v3  ;;  %v3671_v9 = vld [vmem:[%s7659_s11 + $0x110] sm:$0xff] }
 0x6b3   :  { %5513 = vmatprep.subr.mxu0 %v3661_v11  ;;  %5541 = vmatpush3.msra.mxu1 %v3681_v12  ;;  %v3686_v11 = vld [vmem:[%s7659_s11 + $0x188] sm:$0xff]  ;;  %v3731_v12 = vld [vmem:[%s7659_s11 + $0x2f0] sm:$0xff] }
 0x6b4   :  { %5514 = vmatpush3.msra.mxu0 %v3645_v13  ;;  %5542 = vmatprep.subr.mxu1 %v3696_v14  ;;  %v3670_v13 = vld [vmem:[%s7659_s11 + $0x108] sm:$0xff]  ;;  %v3715_v14 = vld [vmem:[%s7659_s11 + $0x270] sm:$0xff] }
 0x6b5   :  { %5515 = vmatprep.subr.mxu0 %v3660_v18  ;;  %5543 = vmatpush3.msra.mxu1 %v3680_v20  ;;  %v3669_v18 = vld [vmem:[%s7659_s11 + $0x100] sm:$0xff]  ;;  %v3135_v20 = vpop.f32.mrf.mxu0 }
 0x6b6   :  { %5516 = vmatpush3.msra.mxu0 %v3644_v39  ;;  %5544 = vmatprep.subr.mxu1 %v3695_v47  ;;  %v2766_v39 = vrot.slane %v7056_v19, %v708_v28 }
 0x6b7   :  { %5517 = vmatprep.subr.mxu0 %v3659_v24  ;;  %5545 = vmatpush3.msra.mxu1 %v3679_v33  ;;  %v3137_v47 = vpop.f32.mrf.mxu0  ;;  %v3206_v24 = vpop.f32.mrf.mxu1 }
 0x6b8   :  { %5518 = vmatpush3.msra.mxu0 %v3643_v34  ;;  %5546 = vmatprep.subr.mxu1 %v3694_v35  ;;  %v3136_v34 = vadd.f32 %v3135_v20, %v2766_v39  ;;  %v3138_v53 = vadd.f32 %v3137_v47, %v2770_v58 }
 0x6b9   :  { %5519 = vmatprep.subr.mxu0 %v3658_v37  ;;  %5547 = vmatpush3.msra.mxu1 %v3678_v10  ;;  %v3208_v35 = vpop.f32.mrf.mxu1  ;;  %v3730_v10 = vld [vmem:[%s7659_s11 + $0x2e8] sm:$0xff] }
 0x6ba   :  { %5520 = vmatpush3.msra.mxu0 %v3642_v40  ;;  %5548 = vmatprep.subr.mxu1 %v3693_v41  ;;  %v3207_v37 = vadd.f32 %v3206_v24, %v3136_v34  ;;  %v3714_v40 = vld [vmem:[%s7659_s11 + $0x268] sm:$0xff]  ;;  %v3209_v41 = vadd.f32 %v3208_v35, %v3138_v53  ;;  %v3721_v24 = vld [vmem:[%s7659_s11 + $0x2a0] sm:$0xff]  ;;  %v3720_v35 = vld [vmem:[%s7659_s11 + $0x298] sm:$0xff] }
 0x6bb   :  { %5521 = vmatprep.subr.mxu0 %v3657_v1  ;;  %5549 = vmatpush3.msra.mxu1 %v3677_v43  ;;  %v3728_v43 = vld [vmem:[%s7659_s11 + $0x2d8] sm:$0xff] }
 0x6bc   :  { %5522 = vmatpush3.msra.mxu0 %v3641_v44  ;;  %5550 = vmatprep.subr.mxu1 %v3692_v36  ;;  %v3712_v36 = vld [vmem:[%s7659_s11 + $0x258] sm:$0xff] }
 0x6bd   :  { %5523 = vmatprep.subr.mxu0 %v3656_v51  ;;  %5551 = vmatpush3.msra.mxu1 %v3676_v6  ;;  %v3727_v6 = vld [vmem:[%s7659_s11 + $0x2d0] sm:$0xff] }
 0x6be   :  { %5524 = vmatpush3.msra.mxu0 %v3640_v49  ;;  %5552 = vmatprep.subr.mxu1 %v3691_v42 }
 0x6bf   :  { %5525 = vmatprep.subr.mxu0 %v3655_v50  ;;  %5553 = vmatpush3.msra.mxu1 %v3675_v54  ;;  %v3711_v54 = vld [vmem:[%s7659_s11 + $0x250] sm:$0xff] }
 0x6c0   :  { %5526 = vmatpush3.msra.mxu0 %v3639_v55  ;;  %5554 = vmatprep.subr.mxu1 %v3690_v57 }
 0x6c1   :  { %5527 = vmatprep.subr.mxu0 %v3654_v56  ;;  %5555 = vmatpush3.msra.mxu1 %v3674_v59  ;;  %v3726_v59 = vld [vmem:[%s7659_s11 + $0x2c8] sm:$0xff] }
 0x6c2   :  { %5528 = vmatpush3.msra.mxu0 %v3638_v29  ;;  %5556 = vmatprep.subr.mxu1 %v3689_v61  ;;  %v3710_v29 = vld [vmem:[%s7659_s11 + $0x248] sm:$0xff] }
 0x6c3   :  { %5529 = vmatprep.subr.mxu0 %v3653_v2  ;;  %5557 = vmatpush3.msra.mxu1 %v3673_v32 }
 0x6c4   :  { %5530 = vmatpush3.msra.mxu0 %v3637_v5  ;;  %5558 = vmatprep.subr.mxu1 %v3688_v63  ;;  %v3725_v5 = vld [vmem:[%s7659_s11 + $0x2c0] sm:$0xff] }
 0x6c5   :  { %3908 = vmatmul.mubr.f32.vlgmr.msra.gmra.mxu0 %v3837_v7  ;;  %5559 = vmatpush3.msra.mxu1 %v3672_v62  ;;  %v3709_v63 = vld [vmem:[%s7659_s11 + $0x240] sm:$0xff] }
 0x6c6   :  { %5560 = vmatprep.subr.mxu1 %v3687_v60  ;;  %5569 = vmatprep.subr.mxu0 %v3732_v46  ;;  %v3724_v46 = vld [vmem:[%s7659_s11 + $0x2b8] sm:$0xff] }
 0x6c7   :  { %5561 = vmatpush3.msra.mxu1 %v3671_v9  ;;  %5570 = vmatpush3.msra.mxu0 %v3716_v23  ;;  %v3708_v9 = vld [vmem:[%s7659_s11 + $0x238] sm:$0xff] }
 0x6c8   :  { %5562 = vmatprep.subr.mxu1 %v3686_v11  ;;  %5571 = vmatprep.subr.mxu0 %v3731_v12 }
 0x6c9   :  { %5563 = vmatpush3.msra.mxu1 %v3670_v13  ;;  %5572 = vmatpush3.msra.mxu0 %v3715_v14  ;;  %v3723_v13 = vld [vmem:[%s7659_s11 + $0x2b0] sm:$0xff] }
 0x6ca   :  { %5564 = vmatprep.subr.mxu1 %v3685_v16  ;;  %5573 = vmatprep.subr.mxu0 %v3730_v10  ;;  %v3707_v14 = vld [vmem:[%s7659_s11 + $0x230] sm:$0xff]  ;;  %v3722_v16 = vld [vmem:[%s7659_s11 + $0x2a8] sm:$0xff] }
 0x6cb   :  { %5565 = vmatpush3.msra.mxu1 %v3669_v18  ;;  %5574 = vmatpush3.msra.mxu0 %v3714_v40  ;;  %v3706_v18 = vld [vmem:[%s7659_s11 + $0x228] sm:$0xff] }
 0x6cc   :  { %5575 = vmatprep.subr.mxu0 %v3729_v31 }
 0x6cd   :  { %5576 = vmatpush3.msra.mxu0 %v3713_v15  ;;  %v3718_v15 = vld [vmem:[%s7659_s11 + $0x288] sm:$0xff] }
 0x6ce   :  { %5577 = vmatprep.subr.mxu0 %v3728_v43 }
 0x6cf   :  { %5578 = vmatpush3.msra.mxu0 %v3712_v36  ;;  %v3717_v36 = vld [vmem:[%s7659_s11 + $0x280] sm:$0xff] }
 0x6d0   :  { %5579 = vmatprep.subr.mxu0 %v3727_v6 }
 0x6d1   :  { %5580 = vmatpush3.msra.mxu0 %v3711_v54  ;;  %v2778_v54 = vrot.slane %v7056_v19, %v720_v17 }
 0x6d2   :  { %5581 = vmatprep.subr.mxu0 %v3726_v59 }
 0x6d3   :  { %5582 = vmatpush3.msra.mxu0 %v3710_v29 }
 0x6d4   :  { %5583 = vmatprep.subr.mxu0 %v3725_v5 }
 0x6d5   :  { %5584 = vmatpush3.msra.mxu0 %v3709_v63 }
 0x6d6   :  { %5585 = vmatprep.subr.mxu0 %v3724_v46 }
 0x6d7   :  { %5586 = vmatpush3.msra.mxu0 %v3708_v9 }
 0x6d8   :  { %5587 = vmatprep.subr.mxu0 %v3723_v13 }
 0x6d9   :  { %5588 = vmatpush3.msra.mxu0 %v3707_v14 }
 0x6da   :  { %5589 = vmatprep.subr.mxu0 %v3722_v16 }
 0x6db   :  { %5590 = vmatpush3.msra.mxu0 %v3706_v18 }
 0x6dc   :  { %5591 = vmatprep.subr.mxu0 %v3721_v24 }
 0x6df   :  { %v3277_v33 = vpop.f32.mrf.mxu0 }
 0x6e0   :  { %v3278_v1 = vadd.f32 %v3277_v33, %v3207_v37  ;;  %v3705_v33 = vld [vmem:[%s7659_s11 + $0x220] sm:$0xff]  ;;  %v3704_v37 = vld [vmem:[%s7659_s11 + $0x218] sm:$0xff] }
 0x6e1   :  { %v3279_v28 = vpop.f32.mrf.mxu0  ;;  %5592 = vmatpush3.msra.mxu0 %v3705_v33 }
 0x6e2   :  { %v3280_v51 = vadd.f32 %v3279_v28, %v3209_v41  ;;  %v3719_v28 = vld [vmem:[%s7659_s11 + $0x290] sm:$0xff]  ;;  %5593 = vmatprep.subr.mxu0 %v3720_v35 }
 0x6e3   :  { %5594 = vmatpush3.msra.mxu0 %v3704_v37 }
 0x6e4   :  { %5595 = vmatprep.subr.mxu0 %v3719_v28  ;;  %v3752_v28 = vld [vmem:[#allocation16 + $0x98] sm:$0xff] }
 0x6e5   :  { %4116 = vmatprep.subr.mxu1 %v3752_v28  ;;  %v4480_v28 = vld [vmem:[#allocation21 + $0x398] sm:$0xff] }
 0x6e7   :  { %v3348_v44 = vpop.f32.mrf.mxu1 }
 0x6e8   :  { %v7314_v48 = vadd.f32 %v3348_v44, %v3278_v1  ;;  %v3703_v1 = vld [vmem:[%s7659_s11 + $0x210] sm:$0xff]  ;;  %v3702_v44 = vld [vmem:[%s7659_s11 + $0x208] sm:$0xff] }
 0x6e9   :  { %v3350_v49 = vpop.f32.mrf.mxu1  ;;  %5596 = vmatpush3.msra.mxu0 %v3703_v1  ;;  %v3746_v1 = vld [vmem:[#allocation16 + $0x68] sm:$0xff] }
 0x6ea   :  { %v3771_v42 = vrot.slane %v7314_v48, 4  ;;  %v3797_v50 = vmul.f32 %v7314_v48, %v7314_v48  ;;  %v7322_v52 = vadd.f32 %v3350_v49, %v3280_v51  ;;  %5597 = vmatprep.subr.mxu0 %v3718_v15  ;;  %v3701_v51 = vld [vmem:[%s7659_s11 + $0x200] sm:$0xff]  ;;  %v2774_v49 = vrot.slane %v7056_v19, %v716_v8  ;;  %v3740_v15 = vld [vmem:[#allocation16 + $0x38] sm:$0xff] }
 0x6eb   :  { %5598 = vmatpush3.msra.mxu0 %v3702_v44  ;;  %v3734_v44 = vld [vmem:[#allocation16 + $0x8] sm:$0xff] }
 0x6ec   :  { %v3772_v55 = vadd.f32 %v3771_v42, %v7314_v48  ;;  %v3813_v57 = vrot.slane %v3797_v50, 4  ;;  %v3777_v56 = vrot.slane %v7322_v52, 4  ;;  %v3798_v22 = vmul.f32 %v7322_v52, %v7322_v52  ;;  %5599 = vmatprep.subr.mxu0 %v3717_v36  ;;  %v3733_v36 = vld [vmem:[#allocation16] sm:$0xff] }
 0x6ed   :  { %5600 = vmatpush3.msra.mxu0 %v3701_v51  ;;  %v3754_v51 = vld [vmem:[#allocation16 + $0xa8] sm:$0xff] }
 0x6ee   :  { %v3773_v61 = vrot.slane %v3772_v55, 2  ;;  %v3814_v2 = vadd.f32 %v3813_v57, %v3797_v50  ;;  %v3778_v3 = vadd.f32 %v3777_v56, %v7322_v52  ;;  %v3819_v32 = vrot.slane %v3798_v22, 4 }
 0x6f0   :  { %v3779_v38 = vrot.slane %v3778_v3, 2  ;;  %v3820_v62 = vadd.f32 %v3819_v32, %v3798_v22  ;;  %v3815_v60 = vrot.slane %v3814_v2, 2  ;;  %v3774_v7 = vadd.f32 %v3773_v61, %v3772_v55 }
 0x6f2   :  { %v3780_v23 = vadd.f32 %v3779_v38, %v3778_v3  ;;  %v3821_v11 = vrot.slane %v3820_v62, 2  ;;  %v3816_v12 = vadd.f32 %v3815_v60, %v3814_v2  ;;  %v3775_v58 = vrot.slane %v3774_v7, 1 }
 0x6f4   :  { %v3781_v20 = vrot.slane %v3780_v23, 1  ;;  %v3822_v39 = vadd.f32 %v3821_v11, %v3820_v62  ;;  %v3817_v47 = vrot.slane %v3816_v12, 1  ;;  %v3776_v41 = vadd.f32 %v3775_v58, %v3774_v7 }
 0x6f6   :  { %v3823_v34 = vrot.slane %v3822_v39, 1  ;;  %v3818_v53 = vadd.f32 %v3817_v47, %v3816_v12  ;;  %v3782_v10 = vadd.f32 %v3781_v20, %v3780_v23 }
 0x6f8   :  { %v3824_v40 = vadd.f32 %v3823_v34, %v3822_v39  ;;  %v3839_v43 = vsel %vm1292_vm5, %v3776_v41, %v3818_v53  ;;  %v3751_v41 = vld [vmem:[#allocation16 + $0x90] sm:$0xff] }
 0x6fa   :  { %v3840_v31 = vsel %vm1292_vm5, %v3782_v10, %v3824_v40 }
 0x6fb   :  { %3977 = vmatprep.mubr.f32.mxu1 %v3840_v31  ;;  %v3745_v31 = vld [vmem:[#allocation16 + $0x60] sm:$0xff] }
 0x6fc   :  { %3978 = vmatmul.mubr.f32.vlgmr.msra.gmra.mxu1 %v3839_v43  ;;  %v3739_v43 = vld [vmem:[#allocation16 + $0x30] sm:$0xff] }
 0x6fd   :  { %4156 = vmatprep.mubr.f32.mxu1 %v6253_v0  ;;  %4117 = vmatpush1.msra.mxu1 %v3751_v41  ;;  %v4479_v41 = vld [vmem:[#allocation21 + $0x390] sm:$0xff] }
 0x6fe   :  { %4118 = vmatprep.subr.mxu1 %v3746_v1  ;;  %v4478_v1 = vld [vmem:[#allocation21 + $0x388] sm:$0xff] }
 0x6ff   :  { %4119 = vmatpush1.msra.mxu1 %v3745_v31 }
 0x700   :  { %4120 = vmatprep.subr.mxu1 %v3740_v15 }
 0x701   :  { %4121 = vmatpush1.msra.mxu1 %v3739_v43 }
 0x702   :  { %4122 = vmatprep.subr.mxu1 %v3734_v44 }
 0x703   :  { %4123 = vmatpush1.msra.mxu1 %v3733_v36 }
 0x704   :  { %4187 = vmatprep.subr.mxu1 %v3754_v51 }
 0x721   :  { %v3419_v6 = vpop.f32.mrf.mxu0 }
 0x722   :  { %v3420_v57 = vadd.f32 %v3419_v6, %v2774_v49  ;;  %v4460_v6 = vld [vmem:[#allocation21 + $0x2f8] sm:$0xff]  ;;  %v4459_v49 = vld [vmem:[#allocation21 + $0x2f0] sm:$0xff] }
 0x723   :  { %v3421_v42 = vpop.f32.mrf.mxu0  ;;  %4640 = vmatprep.subr.mxu0 %v4460_v6 }
 0x724   :  { %v3422_v22 = vadd.f32 %v3421_v42, %v2778_v54  ;;  %v4458_v42 = vld [vmem:[#allocation21 + $0x2e8] sm:$0xff]  ;;  %v4456_v54 = vld [vmem:[#allocation21 + $0x2d8] sm:$0xff] }
 0x729   :  { %v3490_v50 = vpop.f32.mrf.mxu1 }
 0x72a   :  { %v3491_v59 = vadd.f32 %v3490_v50, %v3420_v57  ;;  %v4457_v50 = vld [vmem:[#allocation21 + $0x2e0] sm:$0xff]  ;;  %v4454_v57 = vld [vmem:[#allocation21 + $0x2c8] sm:$0xff] }
 0x72b   :  { %v3492_v56 = vpop.f32.mrf.mxu1 }
 0x72c   :  { %v3493_v61 = vadd.f32 %v3492_v56, %v3422_v22  ;;  %v4453_v56 = vld [vmem:[#allocation21 + $0x2c0] sm:$0xff]  ;;  %v4452_v22 = vld [vmem:[#allocation21 + $0x2b8] sm:$0xff] }
 0x763   :  { %v3561_v55 = vpop.f32.mrf.mxu0 }
 0x764   :  { %v3562_v2 = vadd.f32 %v3561_v55, %v3491_v59  ;;  %v4455_v55 = vld [vmem:[#allocation21 + $0x2d0] sm:$0xff] }
 0x765   :  { %v3563_v29 = vpop.f32.mrf.mxu0  ;;  %v4451_v59 = vld [vmem:[#allocation21 + $0x2b0] sm:$0xff] }
 0x766   :  { %v3564_v32 = vadd.f32 %v3563_v29, %v3493_v61  ;;  %v4450_v29 = vld [vmem:[#allocation21 + $0x2a8] sm:$0xff]  ;;  %v4449_v61 = vld [vmem:[#allocation21 + $0x2a0] sm:$0xff] }
 0x76b   :  { %v3632_v3 = vpop.f32.mrf.mxu1 }
 0x76c   :  { %v7401_v5 = vadd.f32 %v3632_v3, %v3562_v2  ;;  %v4448_v2 = vld [vmem:[#allocation21 + $0x298] sm:$0xff]  ;;  %v4447_v3 = vld [vmem:[#allocation21 + $0x290] sm:$0xff] }
 0x76d   :  { %v3634_v63 = vpop.f32.mrf.mxu1 }
 0x76e   :  { %v3783_v8 = vrot.slane %v7401_v5, 4  ;;  %v3799_v26 = vmul.f32 %v7401_v5, %v7401_v5  ;;  %v7406_v38 = vadd.f32 %v3634_v63, %v3564_v32  ;;  %v4446_v32 = vld [vmem:[#allocation21 + $0x288] sm:$0xff]  ;;  %v4445_v63 = vld [vmem:[#allocation21 + $0x280] sm:$0xff] }
 0x770   :  { %v3784_v17 = vadd.f32 %v3783_v8, %v7401_v5  ;;  %v3825_v19 = vrot.slane %v3799_v26, 4  ;;  %v3789_v62 = vrot.slane %v7406_v38, 4  ;;  %v3800_v60 = vmul.f32 %v7406_v38, %v7406_v38  ;;  %v4444_v8 = vld [vmem:[#allocation21 + $0x278] sm:$0xff] }
 0x772   :  { %v3785_v46 = vrot.slane %v3784_v17, 2  ;;  %v3826_v7 = vadd.f32 %v3825_v19, %v3799_v26  ;;  %v3790_v9 = vadd.f32 %v3789_v62, %v7406_v38  ;;  %v3831_v23 = vrot.slane %v3800_v60, 4  ;;  %v4443_v26 = vld [vmem:[#allocation21 + $0x270] sm:$0xff]  ;;  %v4441_v19 = vld [vmem:[#allocation21 + $0x260] sm:$0xff]  ;;  %v4440_v62 = vld [vmem:[#allocation21 + $0x258] sm:$0xff] }
 0x774   :  { %v3791_v11 = vrot.slane %v3790_v9, 2  ;;  %v3832_v12 = vadd.f32 %v3831_v23, %v3800_v60  ;;  %v3827_v13 = vrot.slane %v3826_v7, 2  ;;  %v3786_v14 = vadd.f32 %v3785_v46, %v3784_v17  ;;  %v4442_v17 = vld [vmem:[#allocation21 + $0x268] sm:$0xff]  ;;  %v4439_v60 = vld [vmem:[#allocation21 + $0x250] sm:$0xff] }
 0x775   :  { %v4438_v46 = vld [vmem:[#allocation21 + $0x248] sm:$0xff]  ;;  %v4435_v23 = vld [vmem:[#allocation21 + $0x230] sm:$0xff] }
 0x776   :  { %v3792_v16 = vadd.f32 %v3791_v11, %v3790_v9  ;;  %v3833_v18 = vrot.slane %v3832_v12, 2  ;;  %v3828_v20 = vadd.f32 %v3827_v13, %v3826_v7  ;;  %v3787_v58 = vrot.slane %v3786_v14, 1  ;;  %v4437_v7 = vld [vmem:[#allocation21 + $0x240] sm:$0xff]  ;;  %v4436_v9 = vld [vmem:[#allocation21 + $0x238] sm:$0xff]  ;;  %v4434_v11 = vld [vmem:[#allocation21 + $0x228] sm:$0xff] }
 0x777   :  { %v4432_v13 = vld [vmem:[#allocation21 + $0x218] sm:$0xff] }
 0x778   :  { %v3793_v39 = vrot.slane %v3792_v16, 1  ;;  %v3834_v47 = vadd.f32 %v3833_v18, %v3832_v12  ;;  %v3829_v24 = vrot.slane %v3828_v20, 1  ;;  %v3788_v37 = vadd.f32 %v3787_v58, %v3786_v14  ;;  %v4433_v12 = vld [vmem:[#allocation21 + $0x220] sm:$0xff]  ;;  %v4431_v14 = vld [vmem:[#allocation21 + $0x210] sm:$0xff]  ;;  %v4488_v58 = vld [vmem:[#allocation21 + $0x3d8] sm:$0xff] }
 0x779   :  { %v4429_v18 = vld [vmem:[#allocation21 + $0x200] sm:$0xff] }
 0x77a   :  { %v3835_v33 = vrot.slane %v3834_v47, 1  ;;  %v3830_v34 = vadd.f32 %v3829_v24, %v3828_v20  ;;  %v3794_v35 = vadd.f32 %v3793_v39, %v3792_v16  ;;  %v4430_v16 = vld [vmem:[#allocation21 + $0x208] sm:$0xff]  ;;  %v4492_v20 = vld [vmem:[#allocation21 + $0x3f8] sm:$0xff]  ;;  %v4491_v39 = vld [vmem:[#allocation21 + $0x3f0] sm:$0xff] }
 0x77b   :  { %v4489_v24 = vld [vmem:[#allocation21 + $0x3e0] sm:$0xff] }
 0x77c   :  { %v3836_v53 = vadd.f32 %v3835_v33, %v3834_v47  ;;  %v3841_v40 = vsel %vm1292_vm5, %v3788_v37, %v3830_v34  ;;  %v4490_v47 = vld [vmem:[#allocation21 + $0x3e8] sm:$0xff]  ;;  %v4487_v33 = vld [vmem:[#allocation21 + $0x3d0] sm:$0xff] }
 0x77d   :  { %v4486_v34 = vld [vmem:[#allocation21 + $0x3c8] sm:$0xff]  ;;  %v4483_v37 = vld [vmem:[#allocation21 + $0x3b0] sm:$0xff] }
 0x77e   :  { %v3842_v10 = vsel %vm1292_vm5, %v3794_v35, %v3836_v53  ;;  %v4485_v35 = vld [vmem:[#allocation21 + $0x3c0] sm:$0xff]  ;;  %v4484_v53 = vld [vmem:[#allocation21 + $0x3b8] sm:$0xff] }
 0x77f   :  { %4047 = vmatprep.mubr.f32.mxu0 %v3842_v10  ;;  %v4482_v10 = vld [vmem:[#allocation21 + $0x3a8] sm:$0xff] }
 0x780   :  { %4048 = vmatmul.mubr.f32.vlgmr.msra.gmra.mxu0 %v3841_v40  ;;  %v4481_v40 = vld [vmem:[#allocation21 + $0x3a0] sm:$0xff] }
 0x781   :  { %4641 = vmatpush1.msra.mxu0 %v4459_v49 }
 0x782   :  { %4642 = vmatprep.subr.mxu0 %v4458_v42 }
 0x783   :  { %4643 = vmatpush1.msra.mxu0 %v4457_v50 }
 0x784   :  { %4644 = vmatprep.subr.mxu0 %v4456_v54 }
 0x785   :  { %4645 = vmatpush1.msra.mxu0 %v4455_v55  ;;  %v5531_v15 = vpop.f32.mrf.mxu0 }
 0x786   :  { %4646 = vmatprep.subr.mxu0 %v4454_v57 }
 0x787   :  { %4647 = vmatpush1.msra.mxu0 %v4453_v56  ;;  %v5532_v44 = vpop.f32.mrf.mxu0 }
 0x788   :  { %4648 = vmatprep.subr.mxu0 %v4452_v22  ;;  %v5533_v6 = vadd.f32 %v5532_v44, %v5531_v15  ;;  %v4385_v15 = vld [vmem:[#allocation21 + $0xa0] sm:$0xff]  ;;  %v4383_v44 = vld [vmem:[#allocation21 + $0x90] sm:$0xff] }
 0x789   :  { %4649 = vmatpush1.msra.mxu0 %v4451_v59 }
 0x78a   :  { %4650 = vmatprep.subr.mxu0 %v4450_v29 }
 0x78b   :  { %4651 = vmatpush1.msra.mxu0 %v4449_v61 }
 0x78c   :  { %4652 = vmatprep.subr.mxu0 %v4448_v2 }
 0x78d   :  { %4653 = vmatpush1.msra.mxu0 %v4447_v3 }
 0x78e   :  { %4654 = vmatprep.subr.mxu0 %v4446_v32  ;;  %v3757_v32 = vld [vmem:[#allocation18] sm:$0x1] }
 0x78f   :  { %4655 = vmatpush1.msra.mxu0 %v4445_v63 }
 0x790   :  { %4656 = vmatprep.subr.mxu0 %v4444_v8 }
 0x791   :  { %4657 = vmatpush1.msra.mxu0 %v4443_v26  ;;  %v3758_v26 = vld [vmem:[#allocation19] sm:$0x1] }
 0x792   :  { %4658 = vmatprep.subr.mxu0 %v4442_v17 }
 0x793   :  { %4659 = vmatpush1.msra.mxu0 %v4441_v19 }
 0x794   :  { %4660 = vmatprep.subr.mxu0 %v4440_v62 }
 0x795   :  { %4661 = vmatpush1.msra.mxu0 %v4439_v60  ;;  %v3753_v60 = vld [vmem:[#allocation16 + $0xa0] sm:$0xff] }
 0x796   :  { %4662 = vmatprep.subr.mxu0 %v4438_v46 }
 0x797   :  { %4663 = vmatpush1.msra.mxu0 %v4437_v7  ;;  %v3748_v7 = vld [vmem:[#allocation16 + $0x78] sm:$0xff] }
 0x798   :  { %4664 = vmatprep.subr.mxu0 %v4436_v9  ;;  %v3747_v9 = vld [vmem:[#allocation16 + $0x70] sm:$0xff] }
 0x799   :  { %4665 = vmatpush1.msra.mxu0 %v4435_v23  ;;  %v3742_v23 = vld [vmem:[#allocation16 + $0x48] sm:$0xff] }
 0x79a   :  { %4666 = vmatprep.subr.mxu0 %v4434_v11  ;;  %v3741_v11 = vld [vmem:[#allocation16 + $0x40] sm:$0xff] }
 0x79b   :  { %4667 = vmatpush1.msra.mxu0 %v4433_v12  ;;  %v3736_v12 = vld [vmem:[#allocation16 + $0x18] sm:$0xff] }
 0x79c   :  { %4668 = vmatprep.subr.mxu0 %v4432_v13  ;;  %v3735_v13 = vld [vmem:[#allocation16 + $0x10] sm:$0xff] }
 0x79d   :  { %4669 = vmatpush1.msra.mxu0 %v4431_v14  ;;  %v3756_v14 = vld [vmem:[#allocation16 + $0xb8] sm:$0xff] }
 0x79e   :  { %4670 = vmatprep.subr.mxu0 %v4430_v16  ;;  %v3755_v16 = vld [vmem:[#allocation16 + $0xb0] sm:$0xff] }
 0x79f   :  { %4671 = vmatpush1.msra.mxu0 %v4429_v18  ;;  %v3750_v18 = vld [vmem:[#allocation16 + $0x88] sm:$0xff] }
 0x7a0   :  { %4672 = vmatprep.subr.mxu0 %v4492_v20  ;;  %v3749_v20 = vld [vmem:[#allocation16 + $0x80] sm:$0xff] }
 0x7a1   :  { %4673 = vmatpush2.msra.mxu0 %v4491_v39  ;;  %v3744_v39 = vld [vmem:[#allocation16 + $0x58] sm:$0xff] }
 0x7a2   :  { %4674 = vmatprep.subr.mxu0 %v4490_v47  ;;  %v3743_v47 = vld [vmem:[#allocation16 + $0x50] sm:$0xff] }
 0x7a3   :  { %4675 = vmatpush2.msra.mxu0 %v4489_v24  ;;  %v3738_v24 = vld [vmem:[#allocation16 + $0x28] sm:$0xff] }
 0x7a4   :  { %4676 = vmatprep.subr.mxu0 %v4488_v58  ;;  %v3737_v58 = vld [vmem:[#allocation16 + $0x20] sm:$0xff] }
 0x7a5   :  { %4677 = vmatpush2.msra.mxu0 %v4487_v33  ;;  %v4396_v33 = vld [vmem:[#allocation21 + $0xf8] sm:$0xff] }
 0x7a6   :  { %4678 = vmatprep.subr.mxu0 %v4486_v34  ;;  %v4395_v34 = vld [vmem:[#allocation21 + $0xf0] sm:$0xff] }
 0x7a7   :  { %4679 = vmatpush2.msra.mxu0 %v4485_v35  ;;  %v4394_v35 = vld [vmem:[#allocation21 + $0xe8] sm:$0xff] }
 0x7a8   :  { %4680 = vmatprep.subr.mxu0 %v4484_v53  ;;  %v4393_v53 = vld [vmem:[#allocation21 + $0xe0] sm:$0xff] }
 0x7a9   :  { %4681 = vmatpush2.msra.mxu0 %v4483_v37  ;;  %v4392_v37 = vld [vmem:[#allocation21 + $0xd8] sm:$0xff] }
 0x7aa   :  { %4682 = vmatprep.subr.mxu0 %v4482_v10  ;;  %v4391_v10 = vld [vmem:[#allocation21 + $0xd0] sm:$0xff] }
 0x7ab   :  { %4683 = vmatpush2.msra.mxu0 %v4481_v40  ;;  %v4390_v40 = vld [vmem:[#allocation21 + $0xc8] sm:$0xff] }
 0x7ac   :  { %4684 = vmatprep.subr.mxu0 %v4480_v28  ;;  %v4389_v28 = vld [vmem:[#allocation21 + $0xc0] sm:$0xff] }
 0x7ad   :  { %4685 = vmatpush2.msra.mxu0 %v4479_v41  ;;  %v4388_v41 = vld [vmem:[#allocation21 + $0xb8] sm:$0xff] }
 0x7ae   :  { %4686 = vmatprep.subr.mxu0 %v4478_v1  ;;  %v4387_v1 = vld [vmem:[#allocation21 + $0xb0] sm:$0xff] }
 0x7bc   :  { %v5566_v31 = vpop.f32.mrf.mxu1 }
 0x7be   :  { %v5567_v43 = vpop.f32.mrf.mxu1 }
 0x7bf   :  { %v5568_v36 = vadd.f32 %v5567_v43, %v5566_v31  ;;  %v4386_v31 = vld [vmem:[#allocation21 + $0xa8] sm:$0xff]  ;;  %v4384_v43 = vld [vmem:[#allocation21 + $0x98] sm:$0xff] }
 0x7c1   :  { %v3980_v42 = vadd.f32 %v5568_v36, %v5533_v6  ;;  %v4382_v36 = vld [vmem:[#allocation21 + $0x88] sm:$0xff]  ;;  %v4380_v6 = vld [vmem:[#allocation21 + $0x78] sm:$0xff] }
 0x840   :  { %v5601_v51 = vpop.f32.mrf.mxu0 }
 0x842   :  { %v5602_v49 = vpop.f32.mrf.mxu0 }
 0x843   :  { %v5603_v50 = vadd.f32 %v5602_v49, %v5601_v51  ;;  %v4381_v51 = vld [vmem:[#allocation21 + $0x80] sm:$0xff]  ;;  %v4379_v49 = vld [vmem:[#allocation21 + $0x70] sm:$0xff] }
 0x845   :  { %v4050_v54 = vadd.f32 %v5603_v50, %v3980_v42  ;;  %v4378_v42 = vld [vmem:[#allocation21 + $0x68] sm:$0xff]  ;;  %v4377_v50 = vld [vmem:[#allocation21 + $0x60] sm:$0xff] }
 0x847   :  { %v4053_v55 = vmul.f32 0.0056818184, %v4050_v54  ;;  %v4376_v54 = vld [vmem:[#allocation21 + $0x58] sm:$0xff] }
 0x849   :  { %v4054_v57 = vmul.f32 %v4053_v55, %v4053_v55 }
 0x84b   :  { %v4056_v56 = vrot.slane %v4054_v57, 7  ;;  %v4374_v57 = vld [vmem:[#allocation21 + $0x48] sm:$0xff] }
 0x84d   :  { %v4058_v22 = vsub.f32 %v4053_v55, %v4056_v56  ;;  %v4373_v56 = vld [vmem:[#allocation21 + $0x40] sm:$0xff] }
 0x84f   :  { %v4059_v59 = vmax.f32 %v4058_v22, 0.0  ;;  %v4372_v22 = vld [vmem:[#allocation21 + $0x38] sm:$0xff] }
 0x851   :  { %v4060_v29 = vadd.f32 1e-05, %v4059_v59  ;;  %v4371_v59 = vld [vmem:[#allocation21 + $0x30] sm:$0xff] }
 0x853   :  { %5799 = vrsqrt.f32 %v4060_v29  ;;  %v4370_v29 = vld [vmem:[#allocation21 + $0x28] sm:$0xff] }
 0x860   :  { %v5800_v61 = vpop.eup %5799 }
 0x861   :  { %v4069_v2 = vrot.slane %v5800_v61, %v6964_v21  ;;  %v4369_v61 = vld [vmem:[#allocation21 + $0x20] sm:$0xff] }
 0x863   :  { %v4070_v3 = vcombine.high %v4069_v2, %v4069_v2  ;;  %v4368_v2 = vld [vmem:[#allocation21 + $0x18] sm:$0xff] }
 0x865   :  { %v4077_v63 = vrot.slane %v4070_v3, %v6964_v21  ;;  %v4367_v3 = vld [vmem:[#allocation21 + $0x10] sm:$0xff] }
 0x867   :  { %v4079_v8 = vmul.f32 %v4077_v63, %v3757_v32  ;;  %v4366_v32 = vld [vmem:[#allocation21 + $0x8] sm:$0xff]  ;;  %v4365_v63 = vld [vmem:[#allocation21] sm:$0xff] }
 0x869   :  { %v4080_v17 = vmul.f32 %v4079_v8, %v4053_v55  ;;  %v4375_v55 = vld [vmem:[#allocation21 + $0x50] sm:$0xff] }
 0x86b   :  { %v4081_v19 = vsub.f32 %v3758_v26, %v4080_v17  ;;  %v4427_v26 = vld [vmem:[#allocation21 + $0x1f0] sm:$0xff]  ;;  %v4426_v17 = vld [vmem:[#allocation21 + $0x1e8] sm:$0xff] }
 0x86d   :  { %v4086_v62 = vrot.slane %v4081_v19, %v6688_v27  ;;  %v4425_v19 = vld [vmem:[#allocation21 + $0x1e0] sm:$0xff] }
 0x86f   :  { %v4088_v46 = vsel %vm1292_vm5, %v4079_v8, %v4086_v62  ;;  %v4428_v8 = vld [vmem:[#allocation21 + $0x1f8] sm:$0xff] }
 0x870   :  { %5345 = vmatmul.mubr.msk.f32.vlgmr.msra.gmra.mxu1 %vm1617_vm6, %v4088_v46  ;;  %v4424_v62 = vld [vmem:[#allocation21 + $0x1d8] sm:$0xff] }
 0x871   :  { %4188 = vmatpush1.msra.mxu1 %v3753_v60  ;;  %4227 = vmatprep.mubr.f32.mxu1 %v6253_v0  ;;  %v4423_v60 = vld [vmem:[#allocation21 + $0x1d0] sm:$0xff] }
 0x872   :  { %4189 = vmatprep.subr.mxu1 %v3748_v7  ;;  %v4421_v7 = vld [vmem:[#allocation21 + $0x1c0] sm:$0xff] }
 0x873   :  { %4190 = vmatpush1.msra.mxu1 %v3747_v9  ;;  %v4420_v9 = vld [vmem:[#allocation21 + $0x1b8] sm:$0xff] }
 0x874   :  { %4191 = vmatprep.subr.mxu1 %v3742_v23  ;;  %v4419_v23 = vld [vmem:[#allocation21 + $0x1b0] sm:$0xff] }
 0x875   :  { %4192 = vmatpush1.msra.mxu1 %v3741_v11  ;;  %v4418_v11 = vld [vmem:[#allocation21 + $0x1a8] sm:$0xff] }
 0x876   :  { %4193 = vmatprep.subr.mxu1 %v3736_v12  ;;  %v4417_v12 = vld [vmem:[#allocation21 + $0x1a0] sm:$0xff] }
 0x877   :  { %4194 = vmatpush1.msra.mxu1 %v3735_v13  ;;  %v4416_v13 = vld [vmem:[#allocation21 + $0x198] sm:$0xff] }
 0x878   :  { %5346 = vmatmul.mubr.msk.f32.vlgmr.msra.gmra.mxu1 %vm1617_vm6, %v4088_v46  ;;  %4258 = vmatprep.subr.mxu1 %v3756_v14  ;;  %v4415_v14 = vld [vmem:[#allocation21 + $0x190] sm:$0xff] }
 0x879   :  { %4259 = vmatpush1.msra.mxu1 %v3755_v16  ;;  %4298 = vmatprep.mubr.f32.mxu1 %v6253_v0  ;;  %v4414_v16 = vld [vmem:[#allocation21 + $0x188] sm:$0xff] }
 0x87a   :  { %4260 = vmatprep.subr.mxu1 %v3750_v18  ;;  %v4413_v18 = vld [vmem:[#allocation21 + $0x180] sm:$0xff] }
 0x87b   :  { %4261 = vmatpush1.msra.mxu1 %v3749_v20  ;;  %v4412_v20 = vld [vmem:[#allocation21 + $0x178] sm:$0xff] }
 0x87c   :  { %4262 = vmatprep.subr.mxu1 %v3744_v39  ;;  %v4411_v39 = vld [vmem:[#allocation21 + $0x170] sm:$0xff] }
 0x87d   :  { %4263 = vmatpush1.msra.mxu1 %v3743_v47  ;;  %v4410_v47 = vld [vmem:[#allocation21 + $0x168] sm:$0xff] }
 0x87e   :  { %4264 = vmatprep.subr.mxu1 %v3738_v24  ;;  %v4409_v24 = vld [vmem:[#allocation21 + $0x160] sm:$0xff] }
 0x87f   :  { %4265 = vmatpush1.msra.mxu1 %v3737_v58  ;;  %v4477_v58 = vld [vmem:[#allocation21 + $0x380] sm:$0xff] }
 0x880   :  { %5347 = vmatmul.mubr.msk.f32.vlgmr.msra.gmra.mxu1 %vm1617_vm6, %v4088_v46  ;;  %4569 = vmatprep.subr.mxu1 %v4396_v33  ;;  %v4422_v46 = vld [vmem:[#allocation21 + $0x1c8] sm:$0xff]  ;;  %v4408_v33 = vld [vmem:[#allocation21 + $0x158] sm:$0xff] }
 0x881   :  { %4570 = vmatpush1.msra.mxu1 %v4395_v34  ;;  %4687 = vmatpush2.msra.mxu0 %v4477_v58  ;;  %v4476_v34 = vld [vmem:[#allocation21 + $0x378] sm:$0xff] }
 0x882   :  { %4571 = vmatprep.subr.mxu1 %v4394_v35  ;;  %v4407_v35 = vld [vmem:[#allocation21 + $0x150] sm:$0xff]  ;;  %4688 = vmatprep.subr.mxu0 %v4476_v34 }
 0x883   :  { %4572 = vmatpush1.msra.mxu1 %v4393_v53  ;;  %v4475_v53 = vld [vmem:[#allocation21 + $0x370] sm:$0xff] }
 0x884   :  { %4573 = vmatprep.subr.mxu1 %v4392_v37  ;;  %v4406_v37 = vld [vmem:[#allocation21 + $0x148] sm:$0xff]  ;;  %4689 = vmatpush2.msra.mxu0 %v4475_v53 }
 0x885   :  { %4574 = vmatpush1.msra.mxu1 %v4391_v10  ;;  %v4474_v10 = vld [vmem:[#allocation21 + $0x368] sm:$0xff] }
 0x886   :  { %4575 = vmatprep.subr.mxu1 %v4390_v40  ;;  %v4405_v40 = vld [vmem:[#allocation21 + $0x140] sm:$0xff]  ;;  %4690 = vmatprep.subr.mxu0 %v4474_v10  ;;  %v4514_v53 = vld [vmem:[#allocation21 + $0x4a8] sm:$0xff] }
 0x887   :  { %4576 = vmatpush1.msra.mxu1 %v4389_v28  ;;  %v4473_v28 = vld [vmem:[#allocation21 + $0x360] sm:$0xff] }
 0x888   :  { %4577 = vmatprep.subr.mxu1 %v4388_v41  ;;  %v4404_v41 = vld [vmem:[#allocation21 + $0x138] sm:$0xff]  ;;  %4691 = vmatpush2.msra.mxu0 %v4473_v28  ;;  %v4511_v28 = vld [vmem:[#allocation21 + $0x490] sm:$0xff] }
 0x889   :  { %4578 = vmatpush1.msra.mxu1 %v4387_v1  ;;  %v4472_v1 = vld [vmem:[#allocation21 + $0x358] sm:$0xff] }
 0x88a   :  { %4579 = vmatprep.subr.mxu1 %v4386_v31  ;;  %v4403_v31 = vld [vmem:[#allocation21 + $0x130] sm:$0xff]  ;;  %4692 = vmatprep.subr.mxu0 %v4472_v1 }
 0x88b   :  { %4580 = vmatpush1.msra.mxu1 %v4385_v15  ;;  %v4471_v15 = vld [vmem:[#allocation21 + $0x350] sm:$0xff] }
 0x88c   :  { %4581 = vmatprep.subr.mxu1 %v4384_v43  ;;  %v4402_v43 = vld [vmem:[#allocation21 + $0x128] sm:$0xff]  ;;  %4693 = vmatpush2.msra.mxu0 %v4471_v15  ;;  %v4509_v15 = vld [vmem:[#allocation21 + $0x480] sm:$0xff] }
 0x88d   :  { %4582 = vmatpush1.msra.mxu1 %v4383_v44  ;;  %v4470_v44 = vld [vmem:[#allocation21 + $0x348] sm:$0xff] }
 0x88e   :  { %4583 = vmatprep.subr.mxu1 %v4382_v36  ;;  %v4401_v36 = vld [vmem:[#allocation21 + $0x120] sm:$0xff]  ;;  %4694 = vmatprep.subr.mxu0 %v4470_v44  ;;  %v4508_v44 = vld [vmem:[#allocation21 + $0x478] sm:$0xff] }
 0x88f   :  { %4584 = vmatpush1.msra.mxu1 %v4381_v51  ;;  %v4469_v51 = vld [vmem:[#allocation21 + $0x340] sm:$0xff] }
 0x890   :  { %4585 = vmatprep.subr.mxu1 %v4380_v6  ;;  %v4400_v6 = vld [vmem:[#allocation21 + $0x118] sm:$0xff]  ;;  %4695 = vmatpush2.msra.mxu0 %v4469_v51  ;;  %v4506_v51 = vld [vmem:[#allocation21 + $0x468] sm:$0xff] }
 0x891   :  { %4586 = vmatpush1.msra.mxu1 %v4379_v49  ;;  %v4468_v49 = vld [vmem:[#allocation21 + $0x338] sm:$0xff] }
 0x892   :  { %4587 = vmatprep.subr.mxu1 %v4378_v42  ;;  %v4399_v42 = vld [vmem:[#allocation21 + $0x110] sm:$0xff]  ;;  %4696 = vmatprep.subr.mxu0 %v4468_v49  ;;  %v4504_v49 = vld [vmem:[#allocation21 + $0x458] sm:$0xff] }
 0x893   :  { %4588 = vmatpush1.msra.mxu1 %v4377_v50  ;;  %v4467_v50 = vld [vmem:[#allocation21 + $0x330] sm:$0xff] }
 0x894   :  { %4589 = vmatprep.subr.mxu1 %v4376_v54  ;;  %v4398_v54 = vld [vmem:[#allocation21 + $0x108] sm:$0xff]  ;;  %4697 = vmatpush2.msra.mxu0 %v4467_v50  ;;  %v4501_v50 = vld [vmem:[#allocation21 + $0x440] sm:$0xff] }
 0x895   :  { %4590 = vmatpush1.msra.mxu1 %v4375_v55  ;;  %v4466_v55 = vld [vmem:[#allocation21 + $0x328] sm:$0xff] }
 0x896   :  { %4591 = vmatprep.subr.mxu1 %v4374_v57  ;;  %v4397_v57 = vld [vmem:[#allocation21 + $0x100] sm:$0xff]  ;;  %4698 = vmatprep.subr.mxu0 %v4466_v55  ;;  %v4499_v55 = vld [vmem:[#allocation21 + $0x430] sm:$0xff] }
 0x897   :  { %4592 = vmatpush1.msra.mxu1 %v4373_v56  ;;  %v4465_v56 = vld [vmem:[#allocation21 + $0x320] sm:$0xff] }
 0x898   :  { %4593 = vmatprep.subr.mxu1 %v4372_v22  ;;  %v4524_v22 = vld [vmem:[#allocation21 + $0x4f8] sm:$0xff]  ;;  %4699 = vmatpush2.msra.mxu0 %v4465_v56  ;;  %v4497_v56 = vld [vmem:[#allocation21 + $0x420] sm:$0xff] }
 0x899   :  { %4594 = vmatpush1.msra.mxu1 %v4371_v59  ;;  %v4464_v59 = vld [vmem:[#allocation21 + $0x318] sm:$0xff] }
 0x89a   :  { %4595 = vmatprep.subr.mxu1 %v4370_v29  ;;  %4700 = vmatprep.subr.mxu0 %v4464_v59  ;;  %v4463_v29 = vld [vmem:[#allocation21 + $0x310] sm:$0xff] }
 0x89b   :  { %4596 = vmatpush1.msra.mxu1 %v4369_v61  ;;  %4701 = vmatpush2.msra.mxu0 %v4463_v29  ;;  %v4462_v61 = vld [vmem:[#allocation21 + $0x308] sm:$0xff]  ;;  %v4495_v59 = vld [vmem:[#allocation21 + $0x410] sm:$0xff] }
 0x89c   :  { %4597 = vmatprep.subr.mxu1 %v4368_v2  ;;  %4702 = vmatprep.subr.mxu0 %v4462_v61  ;;  %v4461_v2 = vld [vmem:[#allocation21 + $0x300] sm:$0xff]  ;;  %v4494_v29 = vld [vmem:[#allocation21 + $0x408] sm:$0xff] }
 0x89d   :  { %4598 = vmatpush1.msra.mxu1 %v4367_v3  ;;  %4703 = vmatpush2.msra.mxu0 %v4461_v2  ;;  %v4493_v61 = vld [vmem:[#allocation21 + $0x400] sm:$0xff]  ;;  %v4556_v2 = vld [vmem:[#allocation21 + $0x5f8] sm:$0xff] }
 0x89e   :  { %4599 = vmatprep.subr.mxu1 %v4366_v32 }
 0x89f   :  { %4600 = vmatpush1.msra.mxu1 %v4365_v63 }
 0x8a0   :  { %4601 = vmatprep.subr.mxu1 %v4428_v8 }
 0x8a1   :  { %4602 = vmatpush2.msra.mxu1 %v4427_v26 }
 0x8a2   :  { %4603 = vmatprep.subr.mxu1 %v4426_v17 }
 0x8a3   :  { %4604 = vmatpush2.msra.mxu1 %v4425_v19 }
 0x8a4   :  { %4605 = vmatprep.subr.mxu1 %v4424_v62 }
 0x8a5   :  { %4606 = vmatpush2.msra.mxu1 %v4423_v60 }
 0x8a6   :  { %4607 = vmatprep.subr.mxu1 %v4422_v46 }
 0x8a7   :  { %4608 = vmatpush2.msra.mxu1 %v4421_v7 }
 0x8a8   :  { %4609 = vmatprep.subr.mxu1 %v4420_v9  ;;  %v4523_v9 = vld [vmem:[#allocation21 + $0x4f0] sm:$0xff] }
 0x8a9   :  { %4610 = vmatpush2.msra.mxu1 %v4419_v23 }
 0x8aa   :  { %4611 = vmatprep.subr.mxu1 %v4418_v11  ;;  %v4522_v11 = vld [vmem:[#allocation21 + $0x4e8] sm:$0xff] }
 0x8ab   :  { %4612 = vmatpush2.msra.mxu1 %v4417_v12 }
 0x8ac   :  { %4613 = vmatprep.subr.mxu1 %v4416_v13  ;;  %v4521_v13 = vld [vmem:[#allocation21 + $0x4e0] sm:$0xff] }
 0x8ad   :  { %4614 = vmatpush2.msra.mxu1 %v4415_v14 }
 0x8ae   :  { %4615 = vmatprep.subr.mxu1 %v4414_v16  ;;  %v4519_v16 = vld [vmem:[#allocation21 + $0x4d0] sm:$0xff] }
 0x8af   :  { %4616 = vmatpush2.msra.mxu1 %v4413_v18 }
 0x8b0   :  { %4617 = vmatprep.subr.mxu1 %v4412_v20 }
 0x8b1   :  { %4618 = vmatpush2.msra.mxu1 %v4411_v39  ;;  %v4518_v39 = vld [vmem:[#allocation21 + $0x4c8] sm:$0xff] }
 0x8b2   :  { %4619 = vmatprep.subr.mxu1 %v4410_v47 }
 0x8b3   :  { %4620 = vmatpush2.msra.mxu1 %v4409_v24  ;;  %v4517_v24 = vld [vmem:[#allocation21 + $0x4c0] sm:$0xff] }
 0x8b4   :  { %4621 = vmatprep.subr.mxu1 %v4408_v33  ;;  %v4516_v33 = vld [vmem:[#allocation21 + $0x4b8] sm:$0xff] }
 0x8b5   :  { %4622 = vmatpush2.msra.mxu1 %v4407_v35 }
 0x8b6   :  { %4623 = vmatprep.subr.mxu1 %v4406_v37  ;;  %v4513_v37 = vld [vmem:[#allocation21 + $0x4a0] sm:$0xff] }
 0x8b7   :  { %4624 = vmatpush2.msra.mxu1 %v4405_v40  ;;  %v4512_v40 = vld [vmem:[#allocation21 + $0x498] sm:$0xff] }
 0x8b8   :  { %4625 = vmatprep.subr.mxu1 %v4404_v41 }
 0x8b9   :  { %4626 = vmatpush2.msra.mxu1 %v4403_v31  ;;  %v4510_v31 = vld [vmem:[#allocation21 + $0x488] sm:$0xff] }
 0x8ba   :  { %4627 = vmatprep.subr.mxu1 %v4402_v43 }
 0x8bb   :  { %4628 = vmatpush2.msra.mxu1 %v4401_v36  ;;  %v4507_v36 = vld [vmem:[#allocation21 + $0x470] sm:$0xff] }
 0x8bc   :  { %4629 = vmatprep.subr.mxu1 %v4400_v6  ;;  %v4505_v6 = vld [vmem:[#allocation21 + $0x460] sm:$0xff] }
 0x8bd   :  { %4630 = vmatpush2.msra.mxu1 %v4399_v42  ;;  %v4502_v42 = vld [vmem:[#allocation21 + $0x448] sm:$0xff] }
 0x8be   :  { %4631 = vmatprep.subr.mxu1 %v4398_v54  ;;  %v4500_v54 = vld [vmem:[#allocation21 + $0x438] sm:$0xff] }
 0x8bf   :  { %4632 = vmatpush2.msra.mxu1 %v4397_v57  ;;  %v4498_v57 = vld [vmem:[#allocation21 + $0x428] sm:$0xff] }
 0x8c0   :  { %4711 = vmatprep.subr.mxu1 %v4524_v22  ;;  %v4496_v22 = vld [vmem:[#allocation21 + $0x418] sm:$0xff] }
 0x930   :  { %v4158_v3 = vpop.f32.mrf.mxu1 }
 0x931   :  { %v4308_v32 = vrot.slane %v4158_v3, %v6688_v27  ;;  %v4338_v62 = vrot.slane %v4158_v3, %v6694_v30  ;;  %v4555_v3 = vld [vmem:[#allocation21 + $0x5f0] sm:$0xff] }
 0x932   :  { %v4160_v63 = vpop.f32.mrf.mxu1 }
 0x933   :  { %v4312_v8 = vrot.slane %v4160_v63, %v6688_v27  ;;  %v4329_v26 = vmul.f32 %v4308_v32, %v7083_v45  ;;  %v4342_v19 = vrot.slane %v4160_v63, %v6694_v30  ;;  %v4520_v45 = vld [vmem:[#allocation21 + $0x4d8] sm:$0xff]  ;;  %v4554_v32 = vld [vmem:[#allocation21 + $0x5e8] sm:$0xff]  ;;  %v4553_v63 = vld [vmem:[#allocation21 + $0x5e0] sm:$0xff] }
 0x935   :  { %v4330_v17 = vmul.f32 %v4312_v8, %v7064_v4  ;;  %v4359_v46 = vadd.f32 %v4338_v62, %v4329_v26  ;;  %v4552_v8 = vld [vmem:[#allocation21 + $0x5d8] sm:$0xff]  ;;  %v4551_v26 = vld [vmem:[#allocation21 + $0x5d0] sm:$0xff] }
 0x936   :  { %v4548_v62 = vld [vmem:[#allocation21 + $0x5b8] sm:$0xff] }
 0x937   :  { %v4360_v60 = vadd.f32 %v4342_v19, %v4330_v17  ;;  %v4550_v17 = vld [vmem:[#allocation21 + $0x5c8] sm:$0xff]  ;;  %v4549_v19 = vld [vmem:[#allocation21 + $0x5c0] sm:$0xff] }
 0x938   :  { %v4229_v7 = vpop.f32.mrf.mxu1 }
 0x939   :  { %v4316_v23 = vrot.slane %v4229_v7, %v6688_v27  ;;  %4633 = vmatprep.mubr.f32.mxu1 %v4360_v60  ;;  %v4346_v47 = vrot.slane %v4229_v7, %v6694_v30  ;;  %v4547_v60 = vld [vmem:[#allocation21 + $0x5b0] sm:$0xff]  ;;  %v4545_v7 = vld [vmem:[#allocation21 + $0x5a0] sm:$0xff] }
 0x93a   :  { %v4231_v12 = vpop.f32.mrf.mxu1  ;;  %4634 = vmatmul.mubr.f32.vlgmr.msra.gmra.mxu1 %v4359_v46  ;;  %v4546_v46 = vld [vmem:[#allocation21 + $0x5a8] sm:$0xff] }
 0x93b   :  { %v4320_v14 = vrot.slane %v4231_v12, %v6688_v27  ;;  %4712 = vmatpush1.msra.mxu1 %v4523_v9  ;;  %v4331_v4 = vmul.f32 %v4316_v23, %v7314_v48  ;;  %v4350_v20 = vrot.slane %v4231_v12, %v6694_v30  ;;  %v4515_v48 = vld [vmem:[#allocation21 + $0x4b0] sm:$0xff]  ;;  %v4544_v9 = vld [vmem:[#allocation21 + $0x598] sm:$0xff]  ;;  %v4541_v12 = vld [vmem:[#allocation21 + $0x580] sm:$0xff] }
 0x93c   :  { %4713 = vmatprep.subr.mxu1 %v4522_v11  ;;  %v4543_v23 = vld [vmem:[#allocation21 + $0x590] sm:$0xff]  ;;  %v4542_v11 = vld [vmem:[#allocation21 + $0x588] sm:$0xff] }
 0x93d   :  { %v4332_v18 = vmul.f32 %v4320_v14, %v7322_v52  ;;  %4714 = vmatpush1.msra.mxu1 %v4521_v13  ;;  %v4361_v34 = vadd.f32 %v4346_v47, %v4331_v4  ;;  %v4540_v13 = vld [vmem:[#allocation21 + $0x578] sm:$0xff]  ;;  %v4539_v14 = vld [vmem:[#allocation21 + $0x570] sm:$0xff]  ;;  %v4537_v4 = vld [vmem:[#allocation21 + $0x560] sm:$0xff] }
 0x93e   :  { %4715 = vmatprep.subr.mxu1 %v4520_v45  ;;  %v4538_v45 = vld [vmem:[#allocation21 + $0x568] sm:$0xff]  ;;  %v4532_v47 = vld [vmem:[#allocation21 + $0x538] sm:$0xff] }
 0x93f   :  { %v4362_v58 = vadd.f32 %v4350_v20, %v4332_v18  ;;  %4716 = vmatpush1.msra.mxu1 %v4519_v16  ;;  %v4536_v16 = vld [vmem:[#allocation21 + $0x558] sm:$0xff]  ;;  %v4535_v18 = vld [vmem:[#allocation21 + $0x550] sm:$0xff]  ;;  %v4534_v20 = vld [vmem:[#allocation21 + $0x548] sm:$0xff] }
 0x940   :  { %v7436_v35 = vpop.f32.mrf.mxu1  ;;  %4717 = vmatprep.subr.mxu1 %v4518_v39  ;;  %v4533_v39 = vld [vmem:[#allocation21 + $0x540] sm:$0xff] }
 0x941   :  { %4704 = vmatprep.mubr.f32.mxu0 %v4362_v58  ;;  %4718 = vmatpush1.msra.mxu1 %v4517_v24  ;;  %v4324_v24 = vrot.slane %v7436_v35, %v6688_v27  ;;  %v4531_v58 = vld [vmem:[#allocation21 + $0x530] sm:$0xff] }
 0x942   :  { %v4302_v52 = vpop.f32.mrf.mxu1  ;;  %4705 = vmatmul.mubr.f32.vlgmr.msra.gmra.mxu0 %v4361_v34  ;;  %4719 = vmatprep.subr.mxu1 %v4516_v33  ;;  %v4530_v33 = vld [vmem:[#allocation21 + $0x528] sm:$0xff]  ;;  %v4529_v34 = vld [vmem:[#allocation21 + $0x520] sm:$0xff] }
 0x943   :  { %v4328_v10 = vrot.slane %v4302_v52, %v6688_v27  ;;  %4720 = vmatpush1.msra.mxu1 %v4515_v48  ;;  %v4358_v1 = vrot.slane %v4302_v52, %v6694_v30  ;;  %v4528_v48 = vld [vmem:[#allocation21 + $0x518] sm:$0xff]  ;;  %v4527_v52 = vld [vmem:[#allocation21 + $0x510] sm:$0xff] }
 0x944   :  { %4721 = vmatprep.subr.mxu1 %v4514_v53  ;;  %v4333_v53 = vmul.f32 %v4324_v24, %v7401_v5  ;;  %v4813_v5 = vld [vmem:[%s7665_s17 + $0xf8] sm:$0xff] }
 0x945   :  { %v4334_v41 = vmul.f32 %v4328_v10, %v7406_v38  ;;  %4722 = vmatpush1.msra.mxu1 %v4513_v37  ;;  %v4503_v38 = vld [vmem:[#allocation21 + $0x450] sm:$0xff]  ;;  %v4526_v37 = vld [vmem:[#allocation21 + $0x508] sm:$0xff]  ;;  %v4354_v10 = vrot.slane %v7436_v35, %v6694_v30  ;;  %v4797_v35 = vld [vmem:[%s7665_s17 + $0x78] sm:$0xff]  ;;  %5604 = vmatprep.subr.mxu0 %v4813_v5 }
 0x946   :  { %4723 = vmatprep.subr.mxu1 %v4512_v40  ;;  %v4525_v40 = vld [vmem:[#allocation21 + $0x500] sm:$0xff]  ;;  %5605 = vmatpush3.msra.mxu0 %v4797_v35 }
 0x947   :  { %v4364_v43 = vadd.f32 %v4358_v1, %v4334_v41  ;;  %4724 = vmatpush1.msra.mxu1 %v4511_v28  ;;  %v4363_v28 = vadd.f32 %v4354_v10, %v4333_v53  ;;  %v4812_v41 = vld [vmem:[%s7665_s17 + $0xf0] sm:$0xff] }
 0x948   :  { %4725 = vmatprep.subr.mxu1 %v4510_v31  ;;  %v4796_v1 = vld [vmem:[%s7665_s17 + $0x70] sm:$0xff]  ;;  %v4811_v31 = vld [vmem:[%s7665_s17 + $0xe8] sm:$0xff]  ;;  %5606 = vmatprep.subr.mxu0 %v4812_v41 }
 0x949   :  { %4726 = vmatpush1.msra.mxu1 %v4509_v15  ;;  %4775 = vmatprep.mubr.f32.mxu1 %v4364_v43  ;;  %v4795_v15 = vld [vmem:[%s7665_s17 + $0x68] sm:$0xff]  ;;  %v4810_v43 = vld [vmem:[%s7665_s17 + $0xe0] sm:$0xff] }
 0x94a   :  { %4727 = vmatprep.subr.mxu1 %v4508_v44  ;;  %5607 = vmatpush3.msra.mxu0 %v4796_v1  ;;  %v4794_v44 = vld [vmem:[%s7665_s17 + $0x60] sm:$0xff] }
 0x94b   :  { %4728 = vmatpush1.msra.mxu1 %v4507_v36  ;;  %5608 = vmatprep.subr.mxu0 %v4811_v31  ;;  %v4809_v36 = vld [vmem:[%s7665_s17 + $0xd8] sm:$0xff] }
 0x94c   :  { %4729 = vmatprep.subr.mxu1 %v4506_v51  ;;  %5609 = vmatpush3.msra.mxu0 %v4795_v15  ;;  %v4793_v51 = vld [vmem:[%s7665_s17 + $0x58] sm:$0xff] }
 0x94d   :  { %4730 = vmatpush1.msra.mxu1 %v4505_v6  ;;  %5610 = vmatprep.subr.mxu0 %v4810_v43  ;;  %v4808_v6 = vld [vmem:[%s7665_s17 + $0xd0] sm:$0xff] }
 0x94e   :  { %4731 = vmatprep.subr.mxu1 %v4504_v49  ;;  %5611 = vmatpush3.msra.mxu0 %v4794_v44  ;;  %v4792_v49 = vld [vmem:[%s7665_s17 + $0x50] sm:$0xff] }
 0x94f   :  { %4732 = vmatpush1.msra.mxu1 %v4503_v38  ;;  %5612 = vmatprep.subr.mxu0 %v4809_v36  ;;  %v4807_v38 = vld [vmem:[%s7665_s17 + $0xc8] sm:$0xff] }
 0x950   :  { %4733 = vmatprep.subr.mxu1 %v4502_v42  ;;  %5613 = vmatpush3.msra.mxu0 %v4793_v51  ;;  %v4791_v42 = vld [vmem:[%s7665_s17 + $0x48] sm:$0xff] }
 0x951   :  { %4734 = vmatpush1.msra.mxu1 %v4501_v50  ;;  %5614 = vmatprep.subr.mxu0 %v4808_v6  ;;  %v4806_v50 = vld [vmem:[%s7665_s17 + $0xc0] sm:$0xff] }
 0x952   :  { %4735 = vmatprep.subr.mxu1 %v4500_v54  ;;  %5615 = vmatpush3.msra.mxu0 %v4792_v49  ;;  %v4790_v54 = vld [vmem:[%s7665_s17 + $0x40] sm:$0xff] }
 0x953   :  { %4736 = vmatpush1.msra.mxu1 %v4499_v55  ;;  %5616 = vmatprep.subr.mxu0 %v4807_v38  ;;  %v4805_v55 = vld [vmem:[%s7665_s17 + $0xb8] sm:$0xff] }
 0x954   :  { %4737 = vmatprep.subr.mxu1 %v4498_v57  ;;  %5617 = vmatpush3.msra.mxu0 %v4791_v42  ;;  %v4789_v57 = vld [vmem:[%s7665_s17 + $0x38] sm:$0xff] }
 0x955   :  { %4738 = vmatpush1.msra.mxu1 %v4497_v56  ;;  %5618 = vmatprep.subr.mxu0 %v4806_v50  ;;  %v4804_v56 = vld [vmem:[%s7665_s17 + $0xb0] sm:$0xff] }
 0x956   :  { %4739 = vmatprep.subr.mxu1 %v4496_v22  ;;  %5619 = vmatpush3.msra.mxu0 %v4790_v54  ;;  %v4788_v22 = vld [vmem:[%s7665_s17 + $0x30] sm:$0xff] }
 0x957   :  { %4740 = vmatpush1.msra.mxu1 %v4495_v59  ;;  %5620 = vmatprep.subr.mxu0 %v4805_v55  ;;  %v4803_v59 = vld [vmem:[%s7665_s17 + $0xa8] sm:$0xff]  ;;  %v4817_v55 = vld [vmem:[#allocation24 + $0x18] sm:$0xff] }
 0x958   :  { %4741 = vmatprep.subr.mxu1 %v4494_v29  ;;  %5621 = vmatpush3.msra.mxu0 %v4789_v57  ;;  %v4787_v29 = vld [vmem:[%s7665_s17 + $0x28] sm:$0xff]  ;;  %v4816_v57 = vld [vmem:[#allocation24 + $0x10] sm:$0xff] }
 0x959   :  { %4742 = vmatpush1.msra.mxu1 %v4493_v61  ;;  %5622 = vmatprep.subr.mxu0 %v4804_v56  ;;  %v4802_v61 = vld [vmem:[%s7665_s17 + $0xa0] sm:$0xff]  ;;  %v4815_v56 = vld [vmem:[#allocation24 + $0x8] sm:$0xff] }
 0x95a   :  { %4743 = vmatprep.subr.mxu1 %v4556_v2  ;;  %5623 = vmatpush3.msra.mxu0 %v4788_v22  ;;  %v4786_v2 = vld [vmem:[%s7665_s17 + $0x20] sm:$0xff] }
 0x95b   :  { %4744 = vmatpush2.msra.mxu1 %v4555_v3  ;;  %5624 = vmatprep.subr.mxu0 %v4803_v59  ;;  %v4801_v3 = vld [vmem:[%s7665_s17 + $0x98] sm:$0xff]  ;;  %v4814_v22 = vld [vmem:[#allocation24] sm:$0xff] }
 0x95c   :  { %4745 = vmatprep.subr.mxu1 %v4554_v32  ;;  %5625 = vmatpush3.msra.mxu0 %v4787_v29  ;;  %v4785_v32 = vld [vmem:[%s7665_s17 + $0x18] sm:$0xff] }
 0x95d   :  { %4746 = vmatpush2.msra.mxu1 %v4553_v63  ;;  %5626 = vmatprep.subr.mxu0 %v4802_v61  ;;  %v4800_v63 = vld [vmem:[%s7665_s17 + $0x90] sm:$0xff] }
 0x95e   :  { %4747 = vmatprep.subr.mxu1 %v4552_v8  ;;  %5627 = vmatpush3.msra.mxu0 %v4786_v2  ;;  %v4784_v8 = vld [vmem:[%s7665_s17 + $0x10] sm:$0xff] }
 0x95f   :  { %4748 = vmatpush2.msra.mxu1 %v4551_v26  ;;  %5628 = vmatprep.subr.mxu0 %v4801_v3  ;;  %v4799_v26 = vld [vmem:[%s7665_s17 + $0x88] sm:$0xff] }
 0x960   :  { %4749 = vmatprep.subr.mxu1 %v4550_v17  ;;  %5629 = vmatpush3.msra.mxu0 %v4785_v32  ;;  %v4783_v17 = vld [vmem:[%s7665_s17 + $0x8] sm:$0xff] }
 0x961   :  { %4750 = vmatpush2.msra.mxu1 %v4549_v19  ;;  %5630 = vmatprep.subr.mxu0 %v4800_v63  ;;  %v4798_v19 = vld [vmem:[%s7665_s17 + $0x80] sm:$0xff] }
 0x962   :  { %4751 = vmatprep.subr.mxu1 %v4548_v62  ;;  %5631 = vmatpush3.msra.mxu0 %v4784_v8  ;;  %v4782_v62 = vld [vmem:[%s7665_s17] sm:$0xff] }
 0x963   :  { %4752 = vmatpush2.msra.mxu1 %v4547_v60  ;;  %5632 = vmatprep.subr.mxu0 %v4799_v26  ;;  %v4557_v60 = vld [vmem:[#allocation22] sm:$0x3] }
 0x964   :  { %4753 = vmatprep.subr.mxu1 %v4546_v46  ;;  %5633 = vmatpush3.msra.mxu0 %v4783_v17 }
 0x965   :  { %4754 = vmatpush2.msra.mxu1 %v4545_v7  ;;  %5634 = vmatprep.subr.mxu0 %v4798_v19  ;;  %v4562_v7 = vrot.slane %v4557_v60, %v6688_v27 }
 0x966   :  { %4755 = vmatprep.subr.mxu1 %v4544_v9  ;;  %5635 = vmatpush3.msra.mxu0 %v4782_v62 }
 0x967   :  { %4756 = vmatpush2.msra.mxu1 %v4543_v23  ;;  %v4566_v23 = vrot.slane %v4557_v60, %v6694_v30  ;;  %4986 = vmatprep.subr.mxu0 %v4817_v55  ;;  %v4818_v60 = vld [vmem:[#allocation25] sm:$0x1] }
 0x968   :  { %4757 = vmatprep.subr.mxu1 %v4542_v11 }
 0x969   :  { %4758 = vmatpush2.msra.mxu1 %v4541_v12 }
 0x96a   :  { %4759 = vmatprep.subr.mxu1 %v4540_v13 }
 0x96b   :  { %4760 = vmatpush2.msra.mxu1 %v4539_v14 }
 0x96c   :  { %4761 = vmatprep.subr.mxu1 %v4538_v45 }
 0x96d   :  { %4762 = vmatpush2.msra.mxu1 %v4537_v4 }
 0x96e   :  { %4763 = vmatprep.subr.mxu1 %v4536_v16 }
 0x96f   :  { %4764 = vmatpush2.msra.mxu1 %v4535_v18 }
 0x970   :  { %4765 = vmatprep.subr.mxu1 %v4534_v20 }
 0x971   :  { %4766 = vmatpush2.msra.mxu1 %v4533_v39 }
 0x972   :  { %4767 = vmatprep.subr.mxu1 %v4532_v47 }
 0x973   :  { %4768 = vmatpush2.msra.mxu1 %v4531_v58 }
 0x974   :  { %4769 = vmatprep.subr.mxu1 %v4530_v33 }
 0x975   :  { %4770 = vmatpush2.msra.mxu1 %v4529_v34 }
 0x976   :  { %4771 = vmatprep.subr.mxu1 %v4528_v48 }
 0x977   :  { %4772 = vmatpush2.msra.mxu1 %v4527_v52 }
 0x978   :  { %4773 = vmatprep.subr.mxu1 %v4526_v37 }
 0x979   :  { %4774 = vmatpush2.msra.mxu1 %v4525_v40 }
 0x97a   :  { %4776 = vmatmul.mubr.f32.vlgmr.msra.gmra.mxu1 %v4363_v28  ;;  %5711 = vmatprep.subr.mxu1 %v6253_v0 }
 0x97b   :  { %5743 = vmatprep.mubr.msk.f32.mxu1 %vm6254_vm0, %v6253_v0 }
 0x9fa   :  { %v4635_v46 = vpop.f32.mrf.mxu1 }
 0x9fb   :  { %v4636_v12 = vadd.f32 %v4635_v46, %v4562_v7 }
 0x9fc   :  { %v4637_v11 = vpop.f32.mrf.mxu1 }
 0x9fd   :  { %v4638_v14 = vadd.f32 %v4637_v11, %v4566_v23 }
 0xa02   :  { %v4706_v9 = vpop.f32.mrf.mxu0 }
 0xa03   :  { %v4707_v45 = vadd.f32 %v4706_v9, %v4636_v12  ;;  %v4819_v9 = vld [vmem:[#allocation27] sm:$0x1] }
 0xa04   :  { %v4708_v13 = vpop.f32.mrf.mxu0 }
 0xa05   :  { %v4709_v16 = vadd.f32 %v4708_v13, %v4638_v14  ;;  %v5109_v14 = vld [vmem:[#allocation28 + $0xf8] sm:$0xff] }
 0xa3a   :  { %v4777_v4 = vpop.f32.mrf.mxu1 }
 0xa3b   :  { %v7547_v18 = vadd.f32 %v4777_v4, %v4707_v45  ;;  %v5093_v45 = vld [vmem:[#allocation28 + $0x78] sm:$0xff]  ;;  %v5108_v4 = vld [vmem:[#allocation28 + $0xf0] sm:$0xff] }
 0xa3c   :  { %v4779_v20 = vpop.f32.mrf.mxu1 }
 0xa3d   :  { %v4820_v39 = vrot.slane %v7547_v18, 4  ;;  %v4832_v47 = vmul.f32 %v7547_v18, %v7547_v18  ;;  %v7552_v24 = vadd.f32 %v4779_v20, %v4709_v16  ;;  %v5092_v16 = vld [vmem:[#allocation28 + $0x70] sm:$0xff]  ;;  %v5107_v20 = vld [vmem:[#allocation28 + $0xe8] sm:$0xff] }
 0xa3f   :  { %v4821_v58 = vadd.f32 %v4820_v39, %v7547_v18  ;;  %v4834_v33 = vrot.slane %v4832_v47, 4  ;;  %v4826_v34 = vrot.slane %v7552_v24, 4  ;;  %v4833_v48 = vmul.f32 %v7552_v24, %v7552_v24  ;;  %v5091_v39 = vld [vmem:[#allocation28 + $0x68] sm:$0xff] }
 0xa41   :  { %v4822_v53 = vrot.slane %v4821_v58, 2  ;;  %v4835_v52 = vadd.f32 %v4834_v33, %v4832_v47  ;;  %v4827_v37 = vadd.f32 %v4826_v34, %v7552_v24  ;;  %v4840_v10 = vrot.slane %v4833_v48, 4  ;;  %v5090_v47 = vld [vmem:[#allocation28 + $0x60] sm:$0xff]  ;;  %v5089_v33 = vld [vmem:[#allocation28 + $0x58] sm:$0xff]  ;;  %v5104_v34 = vld [vmem:[#allocation28 + $0xd0] sm:$0xff] }
 0xa43   :  { %v4828_v40 = vrot.slane %v4827_v37, 2  ;;  %v4841_v28 = vadd.f32 %v4840_v10, %v4833_v48  ;;  %v4836_v5 = vrot.slane %v4835_v52, 2  ;;  %v4823_v35 = vadd.f32 %v4822_v53, %v4821_v58  ;;  %v5105_v58 = vld [vmem:[#allocation28 + $0xd8] sm:$0xff]  ;;  %v5088_v48 = vld [vmem:[#allocation28 + $0x50] sm:$0xff]  ;;  %v5103_v53 = vld [vmem:[#allocation28 + $0xc8] sm:$0xff] }
 0xa44   :  { %v5086_v10 = vld [vmem:[#allocation28 + $0x40] sm:$0xff] }
 0xa45   :  { %v4829_v41 = vadd.f32 %v4828_v40, %v4827_v37  ;;  %v4842_v1 = vrot.slane %v4841_v28, 2  ;;  %v4837_v31 = vadd.f32 %v4836_v5, %v4835_v52  ;;  %v4824_v36 = vrot.slane %v4823_v35, 1  ;;  %v5087_v52 = vld [vmem:[#allocation28 + $0x48] sm:$0xff]  ;;  %v5102_v37 = vld [vmem:[#allocation28 + $0xc0] sm:$0xff]  ;;  %v5101_v40 = vld [vmem:[#allocation28 + $0xb8] sm:$0xff] }
 0xa46   :  { %v5100_v5 = vld [vmem:[#allocation28 + $0xb0] sm:$0xff] }
 0xa47   :  { %v4830_v15 = vrot.slane %v4829_v41, 1  ;;  %v4843_v43 = vadd.f32 %v4842_v1, %v4841_v28  ;;  %v4838_v44 = vrot.slane %v4837_v31, 1  ;;  %v4825_v42 = vadd.f32 %v4824_v36, %v4823_v35  ;;  %v5085_v28 = vld [vmem:[#allocation28 + $0x38] sm:$0xff]  ;;  %v5084_v35 = vld [vmem:[#allocation28 + $0x30] sm:$0xff]  ;;  %v5083_v1 = vld [vmem:[#allocation28 + $0x28] sm:$0xff] }
 0xa48   :  { %v5097_v36 = vld [vmem:[#allocation28 + $0x98] sm:$0xff] }
 0xa49   :  { %v4844_v51 = vrot.slane %v4843_v43, 1  ;;  %v4839_v6 = vadd.f32 %v4838_v44, %v4837_v31  ;;  %v4831_v49 = vadd.f32 %v4830_v15, %v4829_v41  ;;  %v5099_v41 = vld [vmem:[#allocation28 + $0xa8] sm:$0xff]  ;;  %v5098_v31 = vld [vmem:[#allocation28 + $0xa0] sm:$0xff] }
 0xa4b   :  { %v4845_v38 = vadd.f32 %v4844_v51, %v4843_v43  ;;  %v4846_v54 = vsel %vm1292_vm5, %v4825_v42, %v4839_v6  ;;  %v5082_v43 = vld [vmem:[#allocation28 + $0x20] sm:$0xff]  ;;  %v5081_v6 = vld [vmem:[#allocation28 + $0x18] sm:$0xff]  ;;  %v5096_v42 = vld [vmem:[#allocation28 + $0x90] sm:$0xff] }
 0xa4d   :  { %v4847_v50 = vsel %vm1292_vm5, %v4831_v49, %v4845_v38 }
 0xa4e   :  { %4912 = vmatprep.mubr.f32.mxu0 %v4847_v50  ;;  %v5080_v50 = vld [vmem:[#allocation28 + $0x10] sm:$0xff] }
 0xa4f   :  { %4913 = vmatmul.mubr.f32.vlgmr.msra.gmra.mxu0 %v4846_v54 }
 0xa50   :  { %5022 = vmatprep.mubr.f32.mxu0 %v6253_v0  ;;  %4987 = vmatpush1.msra.mxu0 %v4816_v57 }
 0xa51   :  { %4988 = vmatprep.subr.mxu0 %v4815_v56  ;;  %v5095_v56 = vld [vmem:[#allocation28 + $0x88] sm:$0xff] }
 0xa52   :  { %4989 = vmatpush1.msra.mxu0 %v4814_v22  ;;  %v5079_v22 = vld [vmem:[#allocation28 + $0x8] sm:$0xff] }
 0xa53   :  { %5639 = vmatprep.subr.mxu0 %v5109_v14 }
 0xb0f   :  { %v5636_v59 = vpop.f32.mrf.mxu0 }
 0xb11   :  { %v5637_v29 = vpop.f32.mrf.mxu0 }
 0xb12   :  { %v5638_v61 = vadd.f32 %v5637_v29, %v5636_v59  ;;  %v5094_v59 = vld [vmem:[#allocation28 + $0x80] sm:$0xff] }
 0xb13   :  { %v5078_v29 = vld [vmem:[#allocation28] sm:$0xff] }
 0xb14   :  { %v4918_v2 = vmul.f32 0.008333334, %v5638_v61 }
 0xb16   :  { %v4919_v3 = vmul.f32 %v4918_v2, %v4918_v2 }
 0xb18   :  { %v4921_v32 = vrot.slane %v4919_v3, 7  ;;  %v5202_v3 = vld [vmem:[%s7671_s23 + $0x60] sm:$0xff] }
 0xb1a   :  { %v4923_v63 = vsub.f32 %v4918_v2, %v4921_v32  ;;  %v5201_v32 = vld [vmem:[%s7671_s23 + $0x58] sm:$0xff] }
 0xb1c   :  { %v4924_v8 = vmax.f32 %v4923_v63, 0.0  ;;  %v5200_v63 = vld [vmem:[%s7671_s23 + $0x50] sm:$0xff] }
 0xb1e   :  { %v4925_v26 = vadd.f32 1e-05, %v4924_v8  ;;  %v5199_v8 = vld [vmem:[%s7671_s23 + $0x48] sm:$0xff] }
 0xb20   :  { %5801 = vrsqrt.f32 %v4925_v26  ;;  %v5198_v26 = vld [vmem:[%s7671_s23 + $0x40] sm:$0xff] }
 0xb2d   :  { %v5802_v17 = vpop.eup %5801 }
 0xb2e   :  { %v4934_v19 = vrot.slane %v5802_v17, %v6964_v21  ;;  %v5197_v17 = vld [vmem:[%s7671_s23 + $0x38] sm:$0xff] }
 0xb30   :  { %v4935_v62 = vcombine.high %v4934_v19, %v4934_v19  ;;  %v5196_v19 = vld [vmem:[%s7671_s23 + $0x30] sm:$0xff] }
 0xb32   :  { %v4942_v46 = vrot.slane %v4935_v62, %v6964_v21  ;;  %v5106_v21 = vld [vmem:[#allocation28 + $0xe0] sm:$0xff] }
 0xb33   :  { %v5195_v62 = vld [vmem:[%s7671_s23 + $0x28] sm:$0xff] }
 0xb34   :  { %v4944_v7 = vmul.f32 %v4942_v46, %v4818_v60  ;;  %v5054_v60 = vand.u32 127, %v698_v25 }
 0xb36   :  { %v4945_v23 = vmul.f32 %v4944_v7, %v4918_v2  ;;  %v5203_v2 = vld [vmem:[%s7671_s23 + $0x68] sm:$0xff]  ;;  %vm5055_vm8 = vcmp.lt.s32.totalorder %v5054_v60, 1  ;;  %vm5064_vm9 = vcmp.lt.s32.totalorder %v5054_v60, 2  ;;  %vm5073_vm10 = vcmp.lt.s32.totalorder %v5054_v60, 3 }
 0xb38   :  { %v4946_v11 = vsub.f32 %v4819_v9, %v4945_v23 }
 0xb3a   :  { %v4951_v12 = vrot.slane %v4946_v11, %v6688_v27 }
 0xb3c   :  { %v4953_v13 = vsel %vm1292_vm5, %v4944_v7, %v4951_v12 }
 0xb3d   :  { %5348 = vmatmul.mubr.msk.f32.vlgmr.msra.gmra.mxu0 %vm4954_vm7, %v4953_v13 }
 0xb3e   :  { %5640 = vmatpush3.msra.mxu0 %v5093_v45 }
 0xb3f   :  { %5641 = vmatprep.subr.mxu0 %v5108_v4 }
 0xb40   :  { %5642 = vmatpush3.msra.mxu0 %v5092_v16 }
 0xb41   :  { %5643 = vmatprep.subr.mxu0 %v5107_v20 }
 0xb42   :  { %5644 = vmatpush3.msra.mxu0 %v5091_v39 }
 0xb43   :  { %5645 = vmatprep.subr.mxu0 %v5106_v21 }
 0xb44   :  { %5646 = vmatpush3.msra.mxu0 %v5090_v47 }
 0xb45   :  { %5647 = vmatprep.subr.mxu0 %v5105_v58 }
 0xb46   :  { %5648 = vmatpush3.msra.mxu0 %v5089_v33 }
 0xb47   :  { %5649 = vmatprep.subr.mxu0 %v5104_v34 }
 0xb48   :  { %5650 = vmatpush3.msra.mxu0 %v5088_v48 }
 0xb49   :  { %5651 = vmatprep.subr.mxu0 %v5103_v53 }
 0xb4a   :  { %5652 = vmatpush3.msra.mxu0 %v5087_v52  ;;  %v5194_v52 = vld [vmem:[%s7671_s23 + $0x20] sm:$0xff] }
 0xb4b   :  { %5653 = vmatprep.subr.mxu0 %v5102_v37  ;;  %v5193_v37 = vld [vmem:[%s7671_s23 + $0x18] sm:$0xff] }
 0xb4c   :  { %5654 = vmatpush3.msra.mxu0 %v5086_v10  ;;  %v5192_v10 = vld [vmem:[%s7671_s23 + $0x10] sm:$0xff] }
 0xb4d   :  { %5655 = vmatprep.subr.mxu0 %v5101_v40  ;;  %v5191_v40 = vld [vmem:[%s7671_s23 + $0x8] sm:$0xff] }
 0xb4e   :  { %5656 = vmatpush3.msra.mxu0 %v5085_v28  ;;  %v5190_v28 = vld [vmem:[%s7671_s23] sm:$0xff] }
 0xb4f   :  { %5657 = vmatprep.subr.mxu0 %v5100_v5 }
 0xb50   :  { %5658 = vmatpush3.msra.mxu0 %v5084_v35  ;;  %v5349_v35 = vld [vmem:[#allocation30] ss:$0 sm:$0xff] }
 0xb51   :  { %5659 = vmatprep.subr.mxu0 %v5099_v41 }
 0xb52   :  { %5660 = vmatpush3.msra.mxu0 %v5083_v1 }
 0xb53   :  { %5661 = vmatprep.subr.mxu0 %v5098_v31 }
 0xb54   :  { %5662 = vmatpush3.msra.mxu0 %v5082_v43 }
 0xb55   :  { %5663 = vmatprep.subr.mxu0 %v5097_v36 }
 0xb56   :  { %5664 = vmatpush3.msra.mxu0 %v5081_v6 }
 0xb57   :  { %5665 = vmatprep.subr.mxu0 %v5096_v42 }
 0xb58   :  { %5666 = vmatpush3.msra.mxu0 %v5080_v50 }
 0xb59   :  { %5667 = vmatprep.subr.mxu0 %v5095_v56 }
 0xb5a   :  { %5668 = vmatpush3.msra.mxu0 %v5079_v22 }
 0xb5b   :  { %5669 = vmatprep.subr.mxu0 %v5094_v59 }
 0xb5c   :  { %5670 = vmatpush3.msra.mxu0 %v5078_v29 }
 0xbfd   :  { %v5024_v15 = vpop.f32.mrf.mxu0 }
 0xbfe   :  { %v5032_v44 = vrot.slane %v5024_v15, %v6688_v27  ;;  %v5042_v54 = vrot.slane %v5024_v15, %v6694_v30 }
 0xbff   :  { %v5026_v51 = vpop.f32.mrf.mxu0 }
 0xc00   :  { %v5037_v49 = vmul.f32 %v5032_v44, %v7547_v18  ;;  %v5036_v38 = vrot.slane %v5026_v51, %v6688_v27  ;;  %v5046_v57 = vrot.slane %v5026_v51, %v6694_v30  ;;  %v5205_v30 = vld [vmem:[%s7671_s23 + $0x78] sm:$0xff]  ;;  %v5350_v44 = vld [vmem:[#allocation31] ss:$0 sm:$0xff] }
 0xc01   :  { %5712 = vmatpush3.msra.mxu1 %v5205_v30 }
 0xc02   :  { %v5038_v55 = vmul.f32 %v5036_v38, %v7552_v24  ;;  %v7572_v61 = vadd.f32 %v5042_v54, %v5037_v49  ;;  %v5204_v24 = vld [vmem:[%s7671_s23 + $0x70] sm:$0xff]  ;;  %5713 = vmatprep.subr.mxu1 %v6253_v0 }
 0xc03   :  { %5714 = vmatpush3.msra.mxu1 %v5204_v24 }
 0xc04   :  { %v7574_v18 = vadd.f32 %v5046_v57, %v5038_v55  ;;  %5715 = vmatprep.subr.mxu1 %v6253_v0 }
 0xc05   :  { %5716 = vmatpush3.msra.mxu1 %v5203_v2 }
 0xc06   :  { %v5790_v27 = vpack.i.bf16 %v7574_v18, %v7572_v61  ;;  %5717 = vmatprep.subr.mxu1 %v6253_v0 }
 0xc07   :  { %5718 = vmatpush3.msra.mxu1 %v5202_v3 }
 0xc08   :  { %5791 = vrot.lane.b32.xlu1 %v5790_v27, %s6256_s0  ;;  %5781 = vrot.lane.b32.xlu0 %v5790_v27, %s6257_s2 }
 0xc09   :  { %5719 = vmatprep.subr.mxu1 %v6253_v0 }
 0xc0a   :  { %5720 = vmatpush3.msra.mxu1 %v5201_v32 }
 0xc0b   :  { %5721 = vmatprep.subr.mxu1 %v6253_v0 }
 0xc0c   :  { %5786 = vrot.lane.b32.xlu0 %v5790_v27, %s6258_s3  ;;  %5722 = vmatpush3.msra.mxu1 %v5200_v63 }
 0xc0d   :  { %5723 = vmatprep.subr.mxu1 %v6253_v0 }
 0xc0e   :  { %5724 = vmatpush3.msra.mxu1 %v5199_v8 }
 0xc0f   :  { %5725 = vmatprep.subr.mxu1 %v6253_v0 }
 0xc10   :  { %5726 = vmatpush3.msra.mxu1 %v5198_v26 }
 0xc11   :  { %5727 = vmatprep.subr.mxu1 %v6253_v0 }
 0xc12   :  { %5728 = vmatpush3.msra.mxu1 %v5197_v17 }
 0xc13   :  { %5729 = vmatprep.subr.mxu1 %v6253_v0 }
 0xc14   :  { %5730 = vmatpush3.msra.mxu1 %v5196_v19 }
 0xc15   :  { %5731 = vmatprep.subr.mxu1 %v6253_v0 }
 0xc16   :  { %5732 = vmatpush3.msra.mxu1 %v5195_v62 }
 0xc17   :  { %5733 = vmatprep.subr.mxu1 %v6253_v0 }
 0xc18   :  { %5734 = vmatpush3.msra.mxu1 %v5194_v52 }
 0xc19   :  { %5735 = vmatprep.subr.mxu1 %v6253_v0 }
 0xc1a   :  { %5736 = vmatpush3.msra.mxu1 %v5193_v37 }
 0xc1b   :  { %5737 = vmatprep.subr.mxu1 %v6253_v0 }
 0xc1c   :  { %5738 = vmatpush3.msra.mxu1 %v5192_v10 }
 0xc1d   :  { %5739 = vmatprep.subr.mxu1 %v6253_v0 }
 0xc1e   :  { %5740 = vmatpush3.msra.mxu1 %v5191_v40 }
 0xc1f   :  { %5741 = vmatprep.subr.mxu1 %v6253_v0 }
 0xc20   :  { %5742 = vmatpush3.msra.mxu1 %v5190_v28 }
 0xc7a   :  { %v5782_v46 = vpop.permute.xlu0 %5781  ;;  %v5792_v23 = vpop.permute.xlu1 %5791 }
 0xc7b   :  { %v5784_v7 = vunpack.i.h.bf16 %v5782_v46  ;;  %v5783_v9 = vunpack.i.l.bf16 %v5782_v46  ;;  %v5794_v14 = vunpack.i.h.bf16 %v5792_v23  ;;  %v5793_v45 = vunpack.i.l.bf16 %v5792_v23 }
 0xc7d   :  { %v5056_v11 = vsel %vm5055_vm8, %v5783_v9, %v5784_v7  ;;  %v5057_v12 = vsel %vm5055_vm8, %v5784_v7, %v5783_v9  ;;  %v5075_v33 = vsel %vm5073_vm10, %v5794_v14, %v5793_v45  ;;  %v5074_v34 = vsel %vm5073_vm10, %v5793_v45, %v5794_v14 }
 0xc7e   :  { %v5787_v13 = vpop.permute.xlu0 %5786  ;;  %v5058_v20 = vmax.f32 %v7572_v61, %v5057_v12  ;;  %v5059_v39 = vmax.f32 %v7574_v18, %v5056_v11 }
 0xc7f   :  { %v5789_v4 = vunpack.i.h.bf16 %v5787_v13  ;;  %v5788_v16 = vunpack.i.l.bf16 %v5787_v13 }
 0xc81   :  { %v5065_v21 = vsel %vm5064_vm9, %v5788_v16, %v5789_v4  ;;  %v5066_v25 = vsel %vm5064_vm9, %v5789_v4, %v5788_v16 }
 0xc82   :  { %v5067_v47 = vmax.f32 %v5058_v20, %v5066_v25  ;;  %v5068_v58 = vmax.f32 %v5059_v39, %v5065_v21 }
 0xc84   :  { %v5077_v48 = vmax.f32 %v5068_v58, %v5074_v34  ;;  %v5076_v53 = vmax.f32 %v5067_v47, %v5075_v33 }
 0xc86   :  { %5181 = vmatprep.mubr.f32.mxu0 %v5077_v48 }
 0xc87   :  { %5182 = vmatmul.mubr.f32.vlgmr.msra.gmra.mxu0 %v5076_v53 }
 0xd47   :  { %v5671_v5 = vpop.f32.mrf.mxu0 }
 0xd49   :  { %v5672_v41 = vpop.f32.mrf.mxu0 }
 0xd4a   :  { %v5673_v1 = vadd.f32 %v5672_v41, %v5671_v5 }
 0xd4c   :  { %v5184_v31 = vadd.f32 %v5673_v1, %v5349_v35 }
 0xd4e   :  { %v5188_v15 = vmul.f32 0.2, %v5184_v31  ;;  %vm5187_vm11 = vcmp.ge.f32.partialorder %v5184_v31, 0.0 }
 0xd50   :  { %v5189_v43 = vsel %vm5187_vm11, %v5184_v31, %v5188_v15 }
 0xd51   :  { %5744 = vmatmul.mubr.f32.vlgmr.msra.gmra.mxu1 %v5189_v43 }
 0xe11   :  { %v5279_v36 = vpop.f32.mrf.mxu1 }
 0xe12   :  { %v5280_v51 = vadd.f32 %v5350_v44, %v5279_v36 }
 0xe13   :  { %v5745_v6 = vpop.f32.mrf.mxu1 }
 0xe14   :  { %5283 = vxpose.xlu1.b32.start.end [1/1] (short) (narrow) %v5280_v51, 8 }
 0xe90   :  { %v5299_v49 = vpop.trf.xlu1 }
 0xe91   :  { %5315 = vst.msk [vmem:[%s7673_s25] sm:$0xff] %vm327_vm1, %v5299_v49 }
 0xe92   :  { %5320 = vsyncpa [#allocation3], 1 }
 0xe93   :  { %5321 = vsyncpa [#allocation5], 1 }
 0xe94   :  { %5322 = vsyncpa [#allocation8], 1 }
 0xe95   :  { %5323 = vsyncpa [#allocation11], 1 }
 0xe96   :  { %5324 = vsyncpa [#allocation14], 1 }
 0xe97   :  { %5325 = vsyncpa [#allocation17], 1 }
 0xe98   :  { %5326 = vsyncpa [#allocation20], 1 }
 0xe99   :  { %5327 = vsyncpa [#allocation23], 1 }
 0xe9a   :  { %5328 = vsyncpa [#allocation26], 1 }
 0xe9b   :  { %5329 = vsyncpa [#allocation29], 1 }
 0xe9c   :  { %5330 = vsyncpa [#allocation32], 1 }

</bundles_post_ra>
